<compile_context>
chip_gen: v7x
topology: tpu7x:2x2x1
jax: 0.10.0
libtpu: 0.0.40
codegen_flags: <defaults>
</compile_context>

<pallas_src>
import jax
import jax.numpy as jnp
from jax.experimental import pallas as pl
from jax.experimental.pallas import tpu as pltpu

# Layer sizes of the PyTorch Net (fc1..fc10): 400 -> 390 -> ... -> 300
SIZES = [400, 390, 380, 370, 360, 350, 340, 330, 320, 310, 300]
NUM_LAYERS = len(SIZES) - 1

PAD_BIG = 512     # layers 0..1 (dims 400/390)
PAD_SMALL = 384   # layers 2..9 (dims 380..300)
NUM_BIG = 2
NUM_SMALL = NUM_LAYERS - NUM_BIG
MAX_BATCH_TILE = 256


def _round_up(n, m):
    return ((n + m - 1) // m) * m


def mlp_kernel(x_ref, wb_ref, ws_ref, b_ref, o_ref):
    """One grid step = one batch tile; all 10 layers statically unrolled.

    x_ref : (TB, PAD_BIG)                     bf16  input tile (zero-padded cols)
    wb_ref: (NUM_BIG, PAD_BIG, PAD_BIG)       bf16  W^T layers 0..1 (VMEM-resident)
    ws_ref: (NUM_SMALL, PAD_SMALL, PAD_SMALL) bf16  W^T layers 2..9 (VMEM-resident)
    b_ref : (NUM_LAYERS, PAD_BIG)             f32   biases (zero padded, resident)
    o_ref : (TB, PAD_SMALL)                   f32   output tile
    """
    h = x_ref[...]                                        # (TB, 512) bf16

    # Layers 0..1: 512-wide path, tanh.
    for l in range(NUM_BIG):
        y = jnp.dot(h, wb_ref[l], preferred_element_type=jnp.float32)
        y = y + b_ref[l:l + 1, :]                         # (1, 512) f32 broadcast
        h = jnp.tanh(y).astype(jnp.bfloat16)

    # Valid width after layer 1 is 380 <= 384; padded lanes are exactly zero.
    h = h[:, :PAD_SMALL]                                  # (TB, 384) bf16

    # Layers 2..8: 384-wide path, tanh.
    for l in range(NUM_BIG, NUM_LAYERS - 1):
        y = jnp.dot(h, ws_ref[l - NUM_BIG], preferred_element_type=jnp.float32)
        y = y + b_ref[l:l + 1, :PAD_SMALL]
        h = jnp.tanh(y).astype(jnp.bfloat16)

    # Final layer: linear, f32 output.
    l = NUM_LAYERS - 1
    y = jnp.dot(h, ws_ref[l - NUM_BIG], preferred_element_type=jnp.float32)
    o_ref[...] = y + b_ref[l:l + 1, :PAD_SMALL]


@jax.jit
def mlp_pallas(x, w_big, w_small, b_stack):
    """x: (B, 400) f32; returns (B, 300) f32."""
    B = x.shape[0]
    Bp0 = _round_up(max(B, 8), 8)
    # Aim for >= 2 batch tiles (v7x has 2 TensorCores), tile capped at 256 rows.
    TB = min(MAX_BATCH_TILE, _round_up(max(-(-Bp0 // 2), 8), 8))
    Bp = _round_up(Bp0, TB)

    xp = jnp.pad(x.astype(jnp.float32),
                 ((0, Bp - B), (0, PAD_BIG - SIZES[0]))).astype(jnp.bfloat16)

    out_padded = pl.pallas_call(
        mlp_kernel,
        out_shape=jax.ShapeDtypeStruct((Bp, PAD_SMALL), jnp.float32),
        grid_spec=pltpu.PrefetchScalarGridSpec(
            num_scalar_prefetch=0,
            grid=(Bp // TB,),
            in_specs=[
                # input batch tile
                pl.BlockSpec((TB, PAD_BIG), lambda b: (b, 0)),
                # resident weight stacks: constant block index -> fetched once
                pl.BlockSpec((NUM_BIG, PAD_BIG, PAD_BIG), lambda b: (0, 0, 0)),
                pl.BlockSpec((NUM_SMALL, PAD_SMALL, PAD_SMALL),
                             lambda b: (0, 0, 0)),
                # resident bias stack
                pl.BlockSpec((NUM_LAYERS, PAD_BIG), lambda b: (0, 0)),
            ],
            out_specs=pl.BlockSpec((TB, PAD_SMALL), lambda b: (b, 0)),
        ),
        compiler_params=pltpu.CompilerParams(
            dimension_semantics=("parallel",),
            vmem_limit_bytes=32 * 1024 * 1024,
        ),
    )(xp, w_big, w_small, b_stack)

    return out_padded[:B, : SIZES[-1]]


def init_params(key):
    """Deterministic params, PyTorch-style uniform(-1/sqrt(fan_in), 1/sqrt(fan_in)).

    Padded regions are exactly zero (required for the :PAD_SMALL slice at layer 2).
    Returns padded bf16 weight stacks, f32 bias stack, and unpadded ref params.
    """
    w_big = jnp.zeros((NUM_BIG, PAD_BIG, PAD_BIG), jnp.float32)
    w_small = jnp.zeros((NUM_SMALL, PAD_SMALL, PAD_SMALL), jnp.float32)
    b_stack = jnp.zeros((NUM_LAYERS, PAD_BIG), jnp.float32)
    ref_params = []
    for l in range(NUM_LAYERS):
        in_f, out_f = SIZES[l], SIZES[l + 1]
        key, kw, kb = jax.random.split(key, 3)
        bound = 1.0 / (in_f ** 0.5)
        wt = jax.random.uniform(kw, (in_f, out_f), jnp.float32, -bound, bound)
        b = jax.random.uniform(kb, (out_f,), jnp.float32, -bound, bound)
        if l < NUM_BIG:
            w_big = w_big.at[l, :in_f, :out_f].set(wt)
        else:
            w_small = w_small.at[l - NUM_BIG, :in_f, :out_f].set(wt)
        b_stack = b_stack.at[l, :out_f].set(b)
        ref_params.append((wt, b))
    return (w_big.astype(jnp.bfloat16), w_small.astype(jnp.bfloat16),
            b_stack, ref_params)


def mlp_ref(x, ref_params, cast_bf16):
    h = x.astype(jnp.float32)
    for l, (wt, b) in enumerate(ref_params):
        if cast_bf16:
            y = jnp.dot(h.astype(jnp.bfloat16), wt.astype(jnp.bfloat16),
                        preferred_element_type=jnp.float32) + b
        else:
            y = jnp.dot(h, wt, preferred_element_type=jnp.float32) + b
        h = jnp.tanh(y) if l < NUM_LAYERS - 1 else y
    return h


if __name__ == "__main__":
    key = jax.random.PRNGKey(0)
    key, kx, kp = jax.random.split(key, 3)

    B = 8
    x = jax.random.normal(kx, (B, SIZES[0]), jnp.float32)

    w_big, w_small, b_stack, ref_params = init_params(kp)

    out = mlp_pallas(x, w_big, w_small, b_stack)
    out = jax.block_until_ready(out)
    assert out.shape == (B, SIZES[-1]), out.shape

    # Tight check vs. a reference that mimics the bf16 weight/activation cast.
    ref_bf16 = mlp_ref(x, ref_params, cast_bf16=True)
    assert jnp.allclose(out, ref_bf16, atol=1e-2, rtol=1e-2), (
        float(jnp.max(jnp.abs(out - ref_bf16)))
    )
    # Loose sanity check vs. the full-f32 reference (bf16 quantization over 10 layers).
    ref_f32 = mlp_ref(x, ref_params, cast_bf16=False)
    assert jnp.allclose(out, ref_f32, atol=1.5e-1, rtol=1.5e-1), (
        float(jnp.max(jnp.abs(out - ref_f32)))
    )

    print("KERNEL_OK")
</pallas_src>

<mosaic_0001>
module attributes {stable_mosaic.version = 11 : i64} {
  func.func @mlp_kernel(%arg0: i32, %arg1: memref<8x512xbf16, #tpu.memory_space<vmem>>, %arg2: memref<2x512x512xbf16, #tpu.memory_space<vmem>>, %arg3: memref<8x384x384xbf16, #tpu.memory_space<vmem>>, %arg4: memref<10x512xf32, #tpu.memory_space<vmem>>, %arg5: memref<8x384xf32, #tpu.memory_space<vmem>>) attributes {dimension_semantics = [#tpu.dimension_semantics<parallel>], iteration_bounds = array<i64: 1>, scalar_prefetch = 0 : i64, scratch_operands = 0 : i64, tpu.core_type = #tpu.core_type<tc>, window_params = [{transform_indices = @transform_0, window_bounds = array<i64: 8, 512>}, {pipeline_mode = #tpu.pipeline_mode<synchronous>, transform_indices = @transform_1, window_bounds = array<i64: 2, 512, 512>}, {pipeline_mode = #tpu.pipeline_mode<synchronous>, transform_indices = @transform_2, window_bounds = array<i64: 8, 384, 384>}, {pipeline_mode = #tpu.pipeline_mode<synchronous>, transform_indices = @transform_3, window_bounds = array<i64: 10, 512>}, {transform_indices = @transform_4, window_bounds = array<i64: 8, 384>}]} {
    %c0 = arith.constant 0 : index
    %c0_0 = arith.constant 0 : index
    %0 = vector.load %arg1[%c0, %c0_0] : memref<8x512xbf16, #tpu.memory_space<vmem>>, vector<8x512xbf16>
    %c0_1 = arith.constant 0 : index
    %c0_2 = arith.constant 0 : index
    %c0_3 = arith.constant 0 : index
    %1 = vector.load %arg2[%c0_1, %c0_2, %c0_3] : memref<2x512x512xbf16, #tpu.memory_space<vmem>>, vector<1x512x512xbf16>
    %2 = vector.shape_cast %1 : vector<1x512x512xbf16> to vector<512x512xbf16>
    %cst = arith.constant dense<0.000000e+00> : vector<8x512xf32>
    %3 = tpu.matmul %0, %2, %cst {dimension_numbers = #tpu.dot_dimension_numbers<[1], [0], [0], [1], [0, 0, 1, 1], [], []>} : vector<8x512xbf16>, vector<512x512xbf16>, vector<8x512xf32> -> vector<8x512xf32>
    %c0_4 = arith.constant 0 : index
    %c0_5 = arith.constant 0 : index
    %4 = vector.load %arg4[%c0_4, %c0_5] : memref<10x512xf32, #tpu.memory_space<vmem>>, vector<1x512xf32>
    %5 = vector.broadcast %4 : vector<1x512xf32> to vector<8x512xf32>
    %6 = arith.addf %3, %5 : vector<8x512xf32>
    %7 = math.tanh %6 : vector<8x512xf32>
    %8 = arith.truncf %7 : vector<8x512xf32> to vector<8x512xbf16>
    %c1 = arith.constant 1 : index
    %c0_6 = arith.constant 0 : index
    %c0_7 = arith.constant 0 : index
    %9 = vector.load %arg2[%c1, %c0_6, %c0_7] : memref<2x512x512xbf16, #tpu.memory_space<vmem>>, vector<1x512x512xbf16>
    %10 = vector.shape_cast %9 : vector<1x512x512xbf16> to vector<512x512xbf16>
    %cst_8 = arith.constant dense<0.000000e+00> : vector<8x512xf32>
    %11 = tpu.matmul %8, %10, %cst_8 {dimension_numbers = #tpu.dot_dimension_numbers<[1], [0], [0], [1], [0, 0, 1, 1], [], []>} : vector<8x512xbf16>, vector<512x512xbf16>, vector<8x512xf32> -> vector<8x512xf32>
    %c1_9 = arith.constant 1 : index
    %c0_10 = arith.constant 0 : index
    %12 = vector.load %arg4[%c1_9, %c0_10] : memref<10x512xf32, #tpu.memory_space<vmem>>, vector<1x512xf32>
    %13 = vector.broadcast %12 : vector<1x512xf32> to vector<8x512xf32>
    %14 = arith.addf %11, %13 : vector<8x512xf32>
    %15 = math.tanh %14 : vector<8x512xf32>
    %16 = arith.truncf %15 : vector<8x512xf32> to vector<8x512xbf16>
    %17 = vector.extract_strided_slice %16 {offsets = [0, 0], sizes = [8, 384], strides = [1, 1]} : vector<8x512xbf16> to vector<8x384xbf16>
    %c0_11 = arith.constant 0 : index
    %c0_12 = arith.constant 0 : index
    %c0_13 = arith.constant 0 : index
    %18 = vector.load %arg3[%c0_11, %c0_12, %c0_13] : memref<8x384x384xbf16, #tpu.memory_space<vmem>>, vector<1x384x384xbf16>
    %19 = vector.shape_cast %18 : vector<1x384x384xbf16> to vector<384x384xbf16>
    %cst_14 = arith.constant dense<0.000000e+00> : vector<8x384xf32>
    %20 = tpu.matmul %17, %19, %cst_14 {dimension_numbers = #tpu.dot_dimension_numbers<[1], [0], [0], [1], [0, 0, 1, 1], [], []>} : vector<8x384xbf16>, vector<384x384xbf16>, vector<8x384xf32> -> vector<8x384xf32>
    %c2 = arith.constant 2 : index
    %c0_15 = arith.constant 0 : index
    %21 = vector.load %arg4[%c2, %c0_15] : memref<10x512xf32, #tpu.memory_space<vmem>>, vector<1x384xf32>
    %22 = vector.broadcast %21 : vector<1x384xf32> to vector<8x384xf32>
    %23 = arith.addf %20, %22 : vector<8x384xf32>
    %24 = math.tanh %23 : vector<8x384xf32>
    %25 = arith.truncf %24 : vector<8x384xf32> to vector<8x384xbf16>
    %c1_16 = arith.constant 1 : index
    %c0_17 = arith.constant 0 : index
    %c0_18 = arith.constant 0 : index
    %26 = vector.load %arg3[%c1_16, %c0_17, %c0_18] : memref<8x384x384xbf16, #tpu.memory_space<vmem>>, vector<1x384x384xbf16>
    %27 = vector.shape_cast %26 : vector<1x384x384xbf16> to vector<384x384xbf16>
    %cst_19 = arith.constant dense<0.000000e+00> : vector<8x384xf32>
    %28 = tpu.matmul %25, %27, %cst_19 {dimension_numbers = #tpu.dot_dimension_numbers<[1], [0], [0], [1], [0, 0, 1, 1], [], []>} : vector<8x384xbf16>, vector<384x384xbf16>, vector<8x384xf32> -> vector<8x384xf32>
    %c3 = arith.constant 3 : index
    %c0_20 = arith.constant 0 : index
    %29 = vector.load %arg4[%c3, %c0_20] : memref<10x512xf32, #tpu.memory_space<vmem>>, vector<1x384xf32>
    %30 = vector.broadcast %29 : vector<1x384xf32> to vector<8x384xf32>
    %31 = arith.addf %28, %30 : vector<8x384xf32>
    %32 = math.tanh %31 : vector<8x384xf32>
    %33 = arith.truncf %32 : vector<8x384xf32> to vector<8x384xbf16>
    %c2_21 = arith.constant 2 : index
    %c0_22 = arith.constant 0 : index
    %c0_23 = arith.constant 0 : index
    %34 = vector.load %arg3[%c2_21, %c0_22, %c0_23] : memref<8x384x384xbf16, #tpu.memory_space<vmem>>, vector<1x384x384xbf16>
    %35 = vector.shape_cast %34 : vector<1x384x384xbf16> to vector<384x384xbf16>
    %cst_24 = arith.constant dense<0.000000e+00> : vector<8x384xf32>
    %36 = tpu.matmul %33, %35, %cst_24 {dimension_numbers = #tpu.dot_dimension_numbers<[1], [0], [0], [1], [0, 0, 1, 1], [], []>} : vector<8x384xbf16>, vector<384x384xbf16>, vector<8x384xf32> -> vector<8x384xf32>
    %c4 = arith.constant 4 : index
    %c0_25 = arith.constant 0 : index
    %37 = vector.load %arg4[%c4, %c0_25] : memref<10x512xf32, #tpu.memory_space<vmem>>, vector<1x384xf32>
    %38 = vector.broadcast %37 : vector<1x384xf32> to vector<8x384xf32>
    %39 = arith.addf %36, %38 : vector<8x384xf32>
    %40 = math.tanh %39 : vector<8x384xf32>
    %41 = arith.truncf %40 : vector<8x384xf32> to vector<8x384xbf16>
    %c3_26 = arith.constant 3 : index
    %c0_27 = arith.constant 0 : index
    %c0_28 = arith.constant 0 : index
    %42 = vector.load %arg3[%c3_26, %c0_27, %c0_28] : memref<8x384x384xbf16, #tpu.memory_space<vmem>>, vector<1x384x384xbf16>
    %43 = vector.shape_cast %42 : vector<1x384x384xbf16> to vector<384x384xbf16>
    %cst_29 = arith.constant dense<0.000000e+00> : vector<8x384xf32>
    %44 = tpu.matmul %41, %43, %cst_29 {dimension_numbers = #tpu.dot_dimension_numbers<[1], [0], [0], [1], [0, 0, 1, 1], [], []>} : vector<8x384xbf16>, vector<384x384xbf16>, vector<8x384xf32> -> vector<8x384xf32>
    %c5 = arith.constant 5 : index
    %c0_30 = arith.constant 0 : index
    %45 = vector.load %arg4[%c5, %c0_30] : memref<10x512xf32, #tpu.memory_space<vmem>>, vector<1x384xf32>
    %46 = vector.broadcast %45 : vector<1x384xf32> to vector<8x384xf32>
    %47 = arith.addf %44, %46 : vector<8x384xf32>
    %48 = math.tanh %47 : vector<8x384xf32>
    %49 = arith.truncf %48 : vector<8x384xf32> to vector<8x384xbf16>
    %c4_31 = arith.constant 4 : index
    %c0_32 = arith.constant 0 : index
    %c0_33 = arith.constant 0 : index
    %50 = vector.load %arg3[%c4_31, %c0_32, %c0_33] : memref<8x384x384xbf16, #tpu.memory_space<vmem>>, vector<1x384x384xbf16>
    %51 = vector.shape_cast %50 : vector<1x384x384xbf16> to vector<384x384xbf16>
    %cst_34 = arith.constant dense<0.000000e+00> : vector<8x384xf32>
    %52 = tpu.matmul %49, %51, %cst_34 {dimension_numbers = #tpu.dot_dimension_numbers<[1], [0], [0], [1], [0, 0, 1, 1], [], []>} : vector<8x384xbf16>, vector<384x384xbf16>, vector<8x384xf32> -> vector<8x384xf32>
    %c6 = arith.constant 6 : index
    %c0_35 = arith.constant 0 : index
    %53 = vector.load %arg4[%c6, %c0_35] : memref<10x512xf32, #tpu.memory_space<vmem>>, vector<1x384xf32>
    %54 = vector.broadcast %53 : vector<1x384xf32> to vector<8x384xf32>
    %55 = arith.addf %52, %54 : vector<8x384xf32>
    %56 = math.tanh %55 : vector<8x384xf32>
    %57 = arith.truncf %56 : vector<8x384xf32> to vector<8x384xbf16>
    %c5_36 = arith.constant 5 : index
    %c0_37 = arith.constant 0 : index
    %c0_38 = arith.constant 0 : index
    %58 = vector.load %arg3[%c5_36, %c0_37, %c0_38] : memref<8x384x384xbf16, #tpu.memory_space<vmem>>, vector<1x384x384xbf16>
    %59 = vector.shape_cast %58 : vector<1x384x384xbf16> to vector<384x384xbf16>
    %cst_39 = arith.constant dense<0.000000e+00> : vector<8x384xf32>
    %60 = tpu.matmul %57, %59, %cst_39 {dimension_numbers = #tpu.dot_dimension_numbers<[1], [0], [0], [1], [0, 0, 1, 1], [], []>} : vector<8x384xbf16>, vector<384x384xbf16>, vector<8x384xf32> -> vector<8x384xf32>
    %c7 = arith.constant 7 : index
    %c0_40 = arith.constant 0 : index
    %61 = vector.load %arg4[%c7, %c0_40] : memref<10x512xf32, #tpu.memory_space<vmem>>, vector<1x384xf32>
    %62 = vector.broadcast %61 : vector<1x384xf32> to vector<8x384xf32>
    %63 = arith.addf %60, %62 : vector<8x384xf32>
    %64 = math.tanh %63 : vector<8x384xf32>
    %65 = arith.truncf %64 : vector<8x384xf32> to vector<8x384xbf16>
    %c6_41 = arith.constant 6 : index
    %c0_42 = arith.constant 0 : index
    %c0_43 = arith.constant 0 : index
    %66 = vector.load %arg3[%c6_41, %c0_42, %c0_43] : memref<8x384x384xbf16, #tpu.memory_space<vmem>>, vector<1x384x384xbf16>
    %67 = vector.shape_cast %66 : vector<1x384x384xbf16> to vector<384x384xbf16>
    %cst_44 = arith.constant dense<0.000000e+00> : vector<8x384xf32>
    %68 = tpu.matmul %65, %67, %cst_44 {dimension_numbers = #tpu.dot_dimension_numbers<[1], [0], [0], [1], [0, 0, 1, 1], [], []>} : vector<8x384xbf16>, vector<384x384xbf16>, vector<8x384xf32> -> vector<8x384xf32>
    %c8 = arith.constant 8 : index
    %c0_45 = arith.constant 0 : index
    %69 = vector.load %arg4[%c8, %c0_45] : memref<10x512xf32, #tpu.memory_space<vmem>>, vector<1x384xf32>
    %70 = vector.broadcast %69 : vector<1x384xf32> to vector<8x384xf32>
    %71 = arith.addf %68, %70 : vector<8x384xf32>
    %72 = math.tanh %71 : vector<8x384xf32>
    %73 = arith.truncf %72 : vector<8x384xf32> to vector<8x384xbf16>
    %c7_46 = arith.constant 7 : index
    %c0_47 = arith.constant 0 : index
    %c0_48 = arith.constant 0 : index
    %74 = vector.load %arg3[%c7_46, %c0_47, %c0_48] : memref<8x384x384xbf16, #tpu.memory_space<vmem>>, vector<1x384x384xbf16>
    %75 = vector.shape_cast %74 : vector<1x384x384xbf16> to vector<384x384xbf16>
    %cst_49 = arith.constant dense<0.000000e+00> : vector<8x384xf32>
    %76 = tpu.matmul %73, %75, %cst_49 {dimension_numbers = #tpu.dot_dimension_numbers<[1], [0], [0], [1], [0, 0, 1, 1], [], []>} : vector<8x384xbf16>, vector<384x384xbf16>, vector<8x384xf32> -> vector<8x384xf32>
    %c9 = arith.constant 9 : index
    %c0_50 = arith.constant 0 : index
    %77 = vector.load %arg4[%c9, %c0_50] : memref<10x512xf32, #tpu.memory_space<vmem>>, vector<1x384xf32>
    %78 = vector.broadcast %77 : vector<1x384xf32> to vector<8x384xf32>
    %79 = arith.addf %76, %78 : vector<8x384xf32>
    %c0_51 = arith.constant 0 : index
    %c0_52 = arith.constant 0 : index
    %80 = vector.load %arg5[%c0_51, %c0_52] : memref<8x384xf32, #tpu.memory_space<vmem>>, vector<8x384xf32>
    tpu.vector_store %arg5[%c0_51, %c0_52], %79 {strides = array<i32>} : memref<8x384xf32, #tpu.memory_space<vmem>>, vector<8x384xf32>,
    return
  }
  func.func @transform_0(%arg0: i32) -> (i32, i32) {
    %c0_i32 = arith.constant 0 : i32
    %c0_i32_0 = arith.constant 0 : i32
    return %arg0, %c0_i32 : i32, i32
  }
  func.func @transform_1(%arg0: i32) -> (i32, i32, i32) {
    %c0_i32 = arith.constant 0 : i32
    %c0_i32_0 = arith.constant 0 : i32
    %c0_i32_1 = arith.constant 0 : i32
    %c0_i32_2 = arith.constant 0 : i32
    return %c0_i32, %c0_i32_0, %c0_i32_1 : i32, i32, i32
  }
  func.func @transform_2(%arg0: i32) -> (i32, i32, i32) {
    %c0_i32 = arith.constant 0 : i32
    %c0_i32_0 = arith.constant 0 : i32
    %c0_i32_1 = arith.constant 0 : i32
    %c0_i32_2 = arith.constant 0 : i32
    return %c0_i32, %c0_i32_0, %c0_i32_1 : i32, i32, i32
  }
  func.func @transform_3(%arg0: i32) -> (i32, i32) {
    %c0_i32 = arith.constant 0 : i32
    %c0_i32_0 = arith.constant 0 : i32
    %c0_i32_1 = arith.constant 0 : i32
    return %c0_i32, %c0_i32_0 : i32, i32
  }
  func.func @transform_4(%arg0: i32) -> (i32, i32) {
    %c0_i32 = arith.constant 0 : i32
    %c0_i32_0 = arith.constant 0 : i32
    return %arg0, %c0_i32 : i32, i32
  }
}

</mosaic_0001>

<bundles_post_ra>
// kernel: mlp_pallas.1
= control target key start
LH: loop header
LB: loop body
LE: loop exit
PB: predicated region body
PF: predicated region fallthrough
CT: control target
= control target key end

     0   :  { %9 = vsyncpa [#allocation3], 0  ;;  %s10212_s0 = inlined_call_operand.vmem [shape: bf16[8,512], index: 0, kind: input, shape index: {}]   ;;  %s10213_s1 = inlined_call_operand.hbm [shape: bf16[2,512,512], index: 1, kind: input, shape index: {}]   ;;  %s10214_s2 = inlined_call_operand.hbm [shape: bf16[8,384,384], index: 2, kind: input, shape index: {}]   ;;  %s10215_s3 = inlined_call_operand.hbm [shape: f32[10,512], index: 3, kind: input, shape index: {}]   ;;  %s10216_s4 = inlined_call_operand.hbm [shape: f32[8,384], index: 4, kind: output, shape index: {}]  }
   0x1   :  { %10 = vsyncpa [#allocation6], 0 }
   0x2   :  { %11 = vsyncpa [#allocation4], 0  ;;  %s9975_s15 = smov [#allocation5]   ;;  %s9881_s19 = scalar_lea.hbm %s10214_s2, 73728 }
   0x3   :  { %s31_s16 = sshll.u32 %s9975_s15, 4  ;;  %p9882_p0 = scmp.ne.s32.totalorder %s10214_s2, %s9881_s19  ;;  %s32_s16 = int_to_ptr.vmem [resolvable:$true] %s31_s16 }
   0x4   :  { %p9885_p1 = scmp.lt.u32.totalorder %s9881_s19, %s10214_s2 }
   0x6   :  { %p9887_p2 = pnand %p9885_p1, %p9882_p0 }
   0x8   :  { %9890 = shalt.err (!%p9887_p2)
}
   0x9   :  { %s9891_s24 = scalar_lea.vmem %s32_s16, 73728  ;;  %p9896_p4 = scmp.lt.s32.totalorder %s32_s16, %s32_s16 }
   0xa   :  { %p9892_p3 = scmp.ne.s32.totalorder %s32_s16, %s9891_s24  ;;  %p9897_p5 = scmp.lt.s32.totalorder %s9891_s24, %s9891_s24 }
   0xc   :  { %p9898_p6 = por %p9897_p5, %p9896_p4 }
   0xe   :  { %p9899_p7 = pnand %p9898_p6, %p9892_p3 }
  0x10   :  { %9902 = shalt.err (!%p9899_p7)
}
  0x11   :  { %s9976_s25 = smov 192   ;;  %s9977_s26 = smov 12  }
  0x12   :  { %37 = dma.hbm_to_vmem [thread:$0]  %s10214_s2, 73728, %s32_s16, [#allocation6], %s9976_s25, %s9976_s25, %s9977_s26  }
  0x13   :  { %s9978_s29 = smov [#allocation2]   ;;  %s9903_s7 = scalar_lea.hbm %s10213_s1, 32768 }
  0x14   :  { %s19_s30 = sshll.u32 %s9978_s29, 4  ;;  %p9904_p8 = scmp.ne.s32.totalorder %s10213_s1, %s9903_s7  ;;  %s20_s30 = int_to_ptr.vmem [resolvable:$true] %s19_s30 }
  0x15   :  { %p9907_p9 = scmp.lt.u32.totalorder %s9903_s7, %s10213_s1 }
  0x17   :  { %p9909_p10 = pnand %p9907_p9, %p9904_p8 }
  0x19   :  { %9912 = shalt.err (!%p9909_p10)
}
  0x1a   :  { %s9913_s12 = scalar_lea.vmem %s20_s30, 32768  ;;  %p9918_p12 = scmp.lt.s32.totalorder %s20_s30, %s20_s30 }
  0x1b   :  { %p9914_p11 = scmp.ne.s32.totalorder %s20_s30, %s9913_s12  ;;  %p9919_p13 = scmp.lt.s32.totalorder %s9913_s12, %s9913_s12 }
  0x1d   :  { %p9920_p0 = por %p9919_p13, %p9918_p12 }
  0x1f   :  { %p9921_p1 = pnand %p9920_p0, %p9914_p11 }
  0x21   :  { %9924 = shalt.err (!%p9921_p1)
}
  0x22   :  { %s9979_s2 = smov 256   ;;  %s9980_s13 = smov 16  }
  0x23   :  { %25 = dma.hbm_to_vmem [thread:$0]  %s10213_s1, 32768, %s20_s30, [#allocation3], %s9979_s2, %s9979_s2, %s9980_s13  }
  0x24   :  { %s9981_s16 = smov [#allocation7]   ;;  %s9925_s20 = scalar_lea.hbm %s10215_s3, 1024 }
  0x25   :  { %s43_s17 = sshll.u32 %s9981_s16, 4  ;;  %p9926_p2 = scmp.ne.s32.totalorder %s10215_s3, %s9925_s20  ;;  %s44_s17 = int_to_ptr.vmem [resolvable:$true] %s43_s17 }
  0x26   :  { %p9929_p3 = scmp.lt.u32.totalorder %s9925_s20, %s10215_s3 }
  0x28   :  { %p9931_p4 = pnand %p9929_p3, %p9926_p2 }
  0x2a   :  { %9934 = shalt.err (!%p9931_p4)
}
  0x2b   :  { %s9935_s25 = scalar_lea.vmem %s44_s17, 1024  ;;  %p9940_p6 = scmp.lt.s32.totalorder %s44_s17, %s44_s17 }
  0x2c   :  { %p9936_p5 = scmp.ne.s32.totalorder %s44_s17, %s9935_s25  ;;  %p9941_p7 = scmp.lt.s32.totalorder %s9935_s25, %s9935_s25 }
  0x2e   :  { %p9942_p8 = por %p9941_p7, %p9940_p6 }
  0x30   :  { %p9943_p9 = pnand %p9942_p8, %p9936_p5 }
  0x32   :  { %9946 = shalt.err (!%p9943_p9)
}
  0x33   :  { %s9982_s1 = smov 512   ;;  %s9983_s26 = smov 32  }
  0x34   :  { %49 = dma.hbm_to_vmem [thread:$0]  %s10215_s3, 1024, %s44_s17, [#allocation6], %s9982_s1, %s9982_s1, %s9983_s26  }
  0x35   :  { %9969 = dma.done.wait [#allocation3], 32768  }
  0x36   :  { %9970 = vsyncadd [#allocation3], 4294934528 }
  0x37   :  { %9971 = dma.done.wait [#allocation6], 74752  }
  0x38   :  { %9972 = vsyncadd [#allocation6], 4294892544  ;;  %v8669_v0 = vld [vmem:[#allocation2 + $0x4] ss:$16 sps:$4 sm:$0xff]   ;;  %v8671_v1 = vld [vmem:[#allocation2 + $0xc] ss:$16 sps:$4 sm:$0xff]  }
  0x39   :  { %866 = vmatprep.subr.bf16.mxu0 %v8669_v0  ;;  %v8673_v2 = vld [vmem:[#allocation2] ss:$16 sps:$4 sm:$0xff]   ;;  %v8674_v3 = vld [vmem:[#allocation2 + $0x8] ss:$16 sps:$4 sm:$0xff]   ;;  %948 = vmatprep.subr.bf16.mxu1 %v8671_v1  ;;  %v8675_v4 = vld [vmem:[#allocation2 + $0x24] ss:$16 sps:$4 sm:$0xff]  }
  0x3a   :  { %867 = vmatpush1.bf16.msra.mxu0 %v8673_v2  ;;  %949 = vmatpush1.bf16.msra.mxu1 %v8674_v3  ;;  %v8677_v5 = vld [vmem:[#allocation2 + $0x2c] ss:$16 sps:$4 sm:$0xff]   ;;  %v8679_v6 = vld [vmem:[#allocation2 + $0x20] ss:$16 sps:$4 sm:$0xff]   ;;  %v8680_v7 = vld [vmem:[#allocation2 + $0x28] ss:$16 sps:$4 sm:$0xff]  }
  0x3b   :  { %868 = vmatprep.subr.bf16.mxu0 %v8675_v4  ;;  %950 = vmatprep.subr.bf16.mxu1 %v8677_v5  ;;  %v8681_v8 = vld [vmem:[#allocation2 + $0x44] ss:$16 sps:$4 sm:$0xff]   ;;  %v8683_v9 = vld [vmem:[#allocation2 + $0x4c] ss:$16 sps:$4 sm:$0xff]   ;;  %v8685_v10 = vld [vmem:[#allocation2 + $0x40] ss:$16 sps:$4 sm:$0xff]  }
  0x3c   :  { %v8686_v11 = vld [vmem:[#allocation2 + $0x48] ss:$16 sps:$4 sm:$0xff]   ;;  %v8687_v12 = vld [vmem:[#allocation2 + $0x64] ss:$16 sps:$4 sm:$0xff]   ;;  %v8689_v13 = vld [vmem:[#allocation2 + $0x6c] ss:$16 sps:$4 sm:$0xff]  }
  0x3d   :  { %v8691_v14 = vld [vmem:[#allocation2 + $0x60] ss:$16 sps:$4 sm:$0xff]   ;;  %v8692_v15 = vld [vmem:[#allocation2 + $0x68] ss:$16 sps:$4 sm:$0xff]   ;;  %v8693_v16 = vld [vmem:[#allocation2 + $0x84] ss:$16 sps:$4 sm:$0xff]  }
  0x3e   :  { %869 = vmatpush1.bf16.msra.mxu0 %v8679_v6  ;;  %951 = vmatpush1.bf16.msra.mxu1 %v8680_v7  ;;  %v8695_v17 = vld [vmem:[#allocation2 + $0x8c] ss:$16 sps:$4 sm:$0xff]   ;;  %v8697_v18 = vld [vmem:[#allocation2 + $0x80] ss:$16 sps:$4 sm:$0xff]   ;;  %v8698_v19 = vld [vmem:[#allocation2 + $0x88] ss:$16 sps:$4 sm:$0xff]  }
  0x3f   :  { %870 = vmatprep.subr.bf16.mxu0 %v8681_v8  ;;  %952 = vmatprep.subr.bf16.mxu1 %v8683_v9  ;;  %v8699_v20 = vld [vmem:[#allocation2 + $0xa4] ss:$16 sps:$4 sm:$0xff]   ;;  %v8701_v21 = vld [vmem:[#allocation2 + $0xac] ss:$16 sps:$4 sm:$0xff]   ;;  %v8703_v22 = vld [vmem:[#allocation2 + $0xa0] ss:$16 sps:$4 sm:$0xff]  }
  0x40   :  { %v8704_v23 = vld [vmem:[#allocation2 + $0xa8] ss:$16 sps:$4 sm:$0xff]   ;;  %v8705_v24 = vld [vmem:[#allocation2 + $0xc4] ss:$16 sps:$4 sm:$0xff]   ;;  %v8707_v25 = vld [vmem:[#allocation2 + $0xcc] ss:$16 sps:$4 sm:$0xff]  }
  0x41   :  { %v8709_v26 = vld [vmem:[#allocation2 + $0xc0] ss:$16 sps:$4 sm:$0xff]   ;;  %v8710_v27 = vld [vmem:[#allocation2 + $0xc8] ss:$16 sps:$4 sm:$0xff]   ;;  %v8711_v28 = vld [vmem:[#allocation2 + $0xe4] ss:$16 sps:$4 sm:$0xff]  }
  0x42   :  { %871 = vmatpush1.bf16.msra.mxu0 %v8685_v10  ;;  %953 = vmatpush1.bf16.msra.mxu1 %v8686_v11  ;;  %v8713_v29 = vld [vmem:[#allocation2 + $0xec] ss:$16 sps:$4 sm:$0xff]   ;;  %v8715_v30 = vld [vmem:[#allocation2 + $0xe0] ss:$16 sps:$4 sm:$0xff]   ;;  %v8716_v31 = vld [vmem:[#allocation2 + $0xe8] ss:$16 sps:$4 sm:$0xff]  }
  0x43   :  { %872 = vmatprep.subr.bf16.mxu0 %v8687_v12  ;;  %954 = vmatprep.subr.bf16.mxu1 %v8689_v13  ;;  %v8717_v32 = vld [vmem:[#allocation2 + $0x104] ss:$16 sps:$4 sm:$0xff]   ;;  %v8719_v33 = vld [vmem:[#allocation2 + $0x10c] ss:$16 sps:$4 sm:$0xff]   ;;  %v8721_v34 = vld [vmem:[#allocation2 + $0x100] ss:$16 sps:$4 sm:$0xff]  }
  0x44   :  { %v8722_v35 = vld [vmem:[#allocation2 + $0x108] ss:$16 sps:$4 sm:$0xff]   ;;  %v8723_v36 = vld [vmem:[#allocation2 + $0x124] ss:$16 sps:$4 sm:$0xff]   ;;  %v8725_v37 = vld [vmem:[#allocation2 + $0x12c] ss:$16 sps:$4 sm:$0xff]  }
  0x45   :  { %v8727_v38 = vld [vmem:[#allocation2 + $0x120] ss:$16 sps:$4 sm:$0xff]   ;;  %v8728_v39 = vld [vmem:[#allocation2 + $0x128] ss:$16 sps:$4 sm:$0xff]   ;;  %v8729_v40 = vld [vmem:[#allocation2 + $0x144] ss:$16 sps:$4 sm:$0xff]  }
  0x46   :  { %873 = vmatpush1.bf16.msra.mxu0 %v8691_v14  ;;  %955 = vmatpush1.bf16.msra.mxu1 %v8692_v15  ;;  %v8731_v41 = vld [vmem:[#allocation2 + $0x14c] ss:$16 sps:$4 sm:$0xff]   ;;  %v8733_v42 = vld [vmem:[#allocation2 + $0x140] ss:$16 sps:$4 sm:$0xff]   ;;  %v8734_v43 = vld [vmem:[#allocation2 + $0x148] ss:$16 sps:$4 sm:$0xff]  }
  0x47   :  { %874 = vmatprep.subr.bf16.mxu0 %v8693_v16  ;;  %956 = vmatprep.subr.bf16.mxu1 %v8695_v17  ;;  %v8735_v44 = vld [vmem:[#allocation2 + $0x164] ss:$16 sps:$4 sm:$0xff]   ;;  %v8737_v45 = vld [vmem:[#allocation2 + $0x16c] ss:$16 sps:$4 sm:$0xff]   ;;  %v8739_v47 = vld [vmem:[#allocation2 + $0x160] ss:$16 sps:$4 sm:$0xff]  }
  0x48   :  { %v60_v46 = vld [vmem:[%s10212_s0] sm:$0xff]  ;;  %v8740_v49 = vld [vmem:[#allocation2 + $0x168] ss:$16 sps:$4 sm:$0xff]   ;;  %v8743_v51 = vld [vmem:[#allocation2 + $0x18c] ss:$16 sps:$4 sm:$0xff]   ;;  %vm9986_vm0 = vmmov 0  }
  0x49   :  { %v7342_v48 = vcombine.high %v60_v46, %v60_v46  ;;  %v8741_v50 = vld [vmem:[#allocation2 + $0x184] ss:$16 sps:$4 sm:$0xff]   ;;  %v8745_v52 = vld [vmem:[#allocation2 + $0x180] ss:$16 sps:$4 sm:$0xff]   ;;  %v8746_v53 = vld [vmem:[#allocation2 + $0x188] ss:$16 sps:$4 sm:$0xff]   ;;  %v7341_v4 = vcombine.low %v60_v46, %v60_v46 }
  0x4a   :  { %875 = vmatpush1.bf16.msra.mxu0 %v8697_v18  ;;  %957 = vmatpush1.bf16.msra.mxu1 %v8698_v19  ;;  %v8747_v54 = vld [vmem:[#allocation2 + $0x1a4] ss:$16 sps:$4 sm:$0xff]   ;;  %v8749_v55 = vld [vmem:[#allocation2 + $0x1ac] ss:$16 sps:$4 sm:$0xff]   ;;  %v8751_v56 = vld [vmem:[#allocation2 + $0x1a0] ss:$16 sps:$4 sm:$0xff]  }
  0x4b   :  { %876 = vmatprep.subr.bf16.mxu0 %v8699_v20  ;;  %958 = vmatprep.subr.bf16.mxu1 %v8701_v21  ;;  %v8752_v57 = vld [vmem:[#allocation2 + $0x1a8] ss:$16 sps:$4 sm:$0xff]   ;;  %v8753_v58 = vld [vmem:[#allocation2 + $0x1c4] ss:$16 sps:$4 sm:$0xff]   ;;  %v8755_v59 = vld [vmem:[#allocation2 + $0x1cc] ss:$16 sps:$4 sm:$0xff]  }
  0x4c   :  { %898 = vmatprep.mubr.bf16.mxu0 %v7342_v48  ;;  %980 = vmatprep.mubr.bf16.mxu1 %v7342_v48  ;;  %v8757_v60 = vld [vmem:[#allocation2 + $0x1c0] ss:$16 sps:$4 sm:$0xff]   ;;  %v8758_v61 = vld [vmem:[#allocation2 + $0x1c8] ss:$16 sps:$4 sm:$0xff]   ;;  %v8759_v62 = vld [vmem:[#allocation2 + $0x1e4] ss:$16 sps:$4 sm:$0xff]  }
  0x4d   :  { %v8761_v63 = vld [vmem:[#allocation2 + $0x1ec] ss:$16 sps:$4 sm:$0xff]   ;;  %v8763_v0 = vld [vmem:[#allocation2 + $0x1e0] ss:$16 sps:$4 sm:$0xff]   ;;  %v8764_v1 = vld [vmem:[#allocation2 + $0x1e8] ss:$16 sps:$4 sm:$0xff]  }
  0x4e   :  { %877 = vmatpush1.bf16.msra.mxu0 %v8703_v22  ;;  %959 = vmatpush1.bf16.msra.mxu1 %v8704_v23  ;;  %v8769_v2 = vld [vmem:[#allocation2 + $0x204] ss:$16 sps:$4 sm:$0xff]   ;;  %v8772_v3 = vld [vmem:[#allocation2 + $0x20c] ss:$16 sps:$4 sm:$0xff]   ;;  %v8767_v5 = vld [vmem:[#allocation2 + $0x200] ss:$16 sps:$4 sm:$0xff]  }
  0x4f   :  { %878 = vmatprep.subr.bf16.mxu0 %v8705_v24  ;;  %960 = vmatprep.subr.bf16.mxu1 %v8707_v25  ;;  %v8770_v6 = vld [vmem:[#allocation2 + $0x208] ss:$16 sps:$4 sm:$0xff]   ;;  %v8775_v7 = vld [vmem:[#allocation2 + $0x224] ss:$16 sps:$4 sm:$0xff]   ;;  %v8778_v8 = vld [vmem:[#allocation2 + $0x22c] ss:$16 sps:$4 sm:$0xff]  }
  0x50   :  { %v8773_v9 = vld [vmem:[#allocation2 + $0x220] ss:$16 sps:$4 sm:$0xff]   ;;  %v8776_v10 = vld [vmem:[#allocation2 + $0x228] ss:$16 sps:$4 sm:$0xff]   ;;  %v8781_v11 = vld [vmem:[#allocation2 + $0x244] ss:$16 sps:$4 sm:$0xff]  }
  0x51   :  { %v8784_v12 = vld [vmem:[#allocation2 + $0x24c] ss:$16 sps:$4 sm:$0xff]   ;;  %v8779_v13 = vld [vmem:[#allocation2 + $0x240] ss:$16 sps:$4 sm:$0xff]   ;;  %v8782_v14 = vld [vmem:[#allocation2 + $0x248] ss:$16 sps:$4 sm:$0xff]  }
  0x52   :  { %879 = vmatpush1.bf16.msra.mxu0 %v8709_v26  ;;  %961 = vmatpush1.bf16.msra.mxu1 %v8710_v27  ;;  %v8787_v15 = vld [vmem:[#allocation2 + $0x264] ss:$16 sps:$4 sm:$0xff]   ;;  %v8790_v16 = vld [vmem:[#allocation2 + $0x26c] ss:$16 sps:$4 sm:$0xff]   ;;  %v8785_v17 = vld [vmem:[#allocation2 + $0x260] ss:$16 sps:$4 sm:$0xff]  }
  0x53   :  { %880 = vmatprep.subr.bf16.mxu0 %v8711_v28  ;;  %962 = vmatprep.subr.bf16.mxu1 %v8713_v29  ;;  %v8788_v18 = vld [vmem:[#allocation2 + $0x268] ss:$16 sps:$4 sm:$0xff]   ;;  %v8793_v19 = vld [vmem:[#allocation2 + $0x284] ss:$16 sps:$4 sm:$0xff]   ;;  %v8796_v20 = vld [vmem:[#allocation2 + $0x28c] ss:$16 sps:$4 sm:$0xff]  }
  0x54   :  { %v8791_v21 = vld [vmem:[#allocation2 + $0x280] ss:$16 sps:$4 sm:$0xff]   ;;  %v8794_v22 = vld [vmem:[#allocation2 + $0x288] ss:$16 sps:$4 sm:$0xff]   ;;  %v8799_v23 = vld [vmem:[#allocation2 + $0x2a4] ss:$16 sps:$4 sm:$0xff]  }
  0x55   :  { %v8802_v24 = vld [vmem:[#allocation2 + $0x2ac] ss:$16 sps:$4 sm:$0xff]   ;;  %v8797_v25 = vld [vmem:[#allocation2 + $0x2a0] ss:$16 sps:$4 sm:$0xff]   ;;  %v8800_v26 = vld [vmem:[#allocation2 + $0x2a8] ss:$16 sps:$4 sm:$0xff]  }
  0x56   :  { %881 = vmatpush1.bf16.msra.mxu0 %v8715_v30  ;;  %963 = vmatpush1.bf16.msra.mxu1 %v8716_v31  ;;  %v8805_v27 = vld [vmem:[#allocation2 + $0x2c4] ss:$16 sps:$4 sm:$0xff]   ;;  %v8808_v28 = vld [vmem:[#allocation2 + $0x2cc] ss:$16 sps:$4 sm:$0xff]   ;;  %v8803_v31 = vld [vmem:[#allocation2 + $0x2c0] ss:$16 sps:$4 sm:$0xff]  }
  0x57   :  { %882 = vmatprep.subr.bf16.mxu0 %v8717_v32  ;;  %964 = vmatprep.subr.bf16.mxu1 %v8719_v33  ;;  %v10055_v29 = vld [vmem:[%s10212_s0 + $0x8] sm:$0xff]  ;;  %v8811_v33 = vld [vmem:[#allocation2 + $0x2e4] ss:$16 sps:$4 sm:$0xff]   ;;  %s9987_s0 = smov [#allocation8]  }
  0x58   :  { %v7344_v30 = vcombine.high %v10055_v29, %v10055_v29  ;;  %v8806_v32 = vld [vmem:[#allocation2 + $0x2c8] ss:$16 sps:$4 sm:$0xff]   ;;  %v8832_v46 = vld [vmem:[#allocation2 + $0x34c] ss:$16 sps:$4 sm:$0xff]   ;;  %s7331_s6 = sshll.u32 %s9987_s0, 4  ;;  %s7332_s6 = int_to_ptr.vmem [resolvable:$true] %s7331_s6 }
  0x59   :  { %v8830_v48 = vld [vmem:[#allocation2 + $0x348] ss:$16 sps:$4 sm:$0xff]   ;;  %s9947_s7 = scalar_lea.vmem %s7332_s6, 384  ;;  %p9952_p11 = scmp.lt.s32.totalorder %s7332_s6, %s7332_s6 }
  0x5a   :  { %883 = vmatpush1.bf16.msra.mxu0 %v8721_v34  ;;  %965 = vmatpush1.bf16.msra.mxu1 %v8722_v35  ;;  %v8814_v34 = vld [vmem:[#allocation2 + $0x2ec] ss:$16 sps:$4 sm:$0xff]   ;;  %v8809_v35 = vld [vmem:[#allocation2 + $0x2e0] ss:$16 sps:$4 sm:$0xff]   ;;  %p9948_p10 = scmp.ne.s32.totalorder %s7332_s6, %s9947_s7  ;;  %p9953_p12 = scmp.lt.s32.totalorder %s9947_s7, %s9947_s7 }
  0x5b   :  { %884 = vmatprep.subr.bf16.mxu0 %v8723_v36  ;;  %966 = vmatprep.subr.bf16.mxu1 %v8725_v37  ;;  %v8812_v36 = vld [vmem:[#allocation2 + $0x2e8] ss:$16 sps:$4 sm:$0xff]   ;;  %v8817_v37 = vld [vmem:[#allocation2 + $0x304] ss:$16 sps:$4 sm:$0xff]  }
  0x5c   :  { %p9954_p13 = por %p9953_p12, %p9952_p11 }
  0x5e   :  { %885 = vmatpush1.bf16.msra.mxu0 %v8727_v38  ;;  %967 = vmatpush1.bf16.msra.mxu1 %v8728_v39  ;;  %v8820_v38 = vld [vmem:[#allocation2 + $0x30c] ss:$16 sps:$4 sm:$0xff]   ;;  %v8815_v39 = vld [vmem:[#allocation2 + $0x300] ss:$16 sps:$4 sm:$0xff]   ;;  %p9955_p0 = pnand %p9954_p13, %p9948_p10 }
  0x5f   :  { %886 = vmatprep.subr.bf16.mxu0 %v8729_v40  ;;  %968 = vmatprep.subr.bf16.mxu1 %v8731_v41  ;;  %v8818_v40 = vld [vmem:[#allocation2 + $0x308] ss:$16 sps:$4 sm:$0xff]   ;;  %v8823_v41 = vld [vmem:[#allocation2 + $0x324] ss:$16 sps:$4 sm:$0xff]  }
  0x62   :  { %887 = vmatpush1.bf16.msra.mxu0 %v8733_v42  ;;  %969 = vmatpush1.bf16.msra.mxu1 %v8734_v43  ;;  %v8826_v42 = vld [vmem:[#allocation2 + $0x32c] ss:$16 sps:$4 sm:$0xff]   ;;  %v8821_v43 = vld [vmem:[#allocation2 + $0x320] ss:$16 sps:$4 sm:$0xff]  }
  0x63   :  { %888 = vmatprep.subr.bf16.mxu0 %v8735_v44  ;;  %970 = vmatprep.subr.bf16.mxu1 %v8737_v45  ;;  %v8824_v44 = vld [vmem:[#allocation2 + $0x328] ss:$16 sps:$4 sm:$0xff]   ;;  %v8829_v45 = vld [vmem:[#allocation2 + $0x344] ss:$16 sps:$4 sm:$0xff]  }
  0x66   :  { %889 = vmatpush1.bf16.msra.mxu0 %v8739_v47  ;;  %971 = vmatpush1.bf16.msra.mxu1 %v8740_v49  ;;  %v8827_v47 = vld [vmem:[#allocation2 + $0x340] ss:$16 sps:$4 sm:$0xff]   ;;  %v8835_v49 = vld [vmem:[#allocation2 + $0x364] ss:$16 sps:$4 sm:$0xff]  }
  0x67   :  { %890 = vmatprep.subr.bf16.mxu0 %v8741_v50  ;;  %972 = vmatprep.subr.bf16.mxu1 %v8743_v51  ;;  %v8838_v50 = vld [vmem:[#allocation2 + $0x36c] ss:$16 sps:$4 sm:$0xff]   ;;  %v8833_v51 = vld [vmem:[#allocation2 + $0x360] ss:$16 sps:$4 sm:$0xff]  }
  0x6a   :  { %891 = vmatpush1.bf16.msra.mxu0 %v8745_v52  ;;  %973 = vmatpush1.bf16.msra.mxu1 %v8746_v53  ;;  %v8836_v52 = vld [vmem:[#allocation2 + $0x368] ss:$16 sps:$4 sm:$0xff]   ;;  %v8841_v53 = vld [vmem:[#allocation2 + $0x384] ss:$16 sps:$4 sm:$0xff]  }
  0x6b   :  { %892 = vmatprep.subr.bf16.mxu0 %v8747_v54  ;;  %974 = vmatprep.subr.bf16.mxu1 %v8749_v55  ;;  %v8844_v54 = vld [vmem:[#allocation2 + $0x38c] ss:$16 sps:$4 sm:$0xff]   ;;  %v8839_v55 = vld [vmem:[#allocation2 + $0x380] ss:$16 sps:$4 sm:$0xff]  }
  0x6e   :  { %893 = vmatpush1.bf16.msra.mxu0 %v8751_v56  ;;  %975 = vmatpush1.bf16.msra.mxu1 %v8752_v57  ;;  %v8842_v56 = vld [vmem:[#allocation2 + $0x388] ss:$16 sps:$4 sm:$0xff]   ;;  %v8847_v57 = vld [vmem:[#allocation2 + $0x3a4] ss:$16 sps:$4 sm:$0xff]  }
  0x6f   :  { %894 = vmatprep.subr.bf16.mxu0 %v8753_v58  ;;  %976 = vmatprep.subr.bf16.mxu1 %v8755_v59  ;;  %v8850_v58 = vld [vmem:[#allocation2 + $0x3ac] ss:$16 sps:$4 sm:$0xff]   ;;  %v8845_v59 = vld [vmem:[#allocation2 + $0x3a0] ss:$16 sps:$4 sm:$0xff]  }
  0x72   :  { %895 = vmatpush1.bf16.msra.mxu0 %v8757_v60  ;;  %977 = vmatpush1.bf16.msra.mxu1 %v8758_v61  ;;  %v8848_v60 = vld [vmem:[#allocation2 + $0x3a8] ss:$16 sps:$4 sm:$0xff]   ;;  %v8853_v61 = vld [vmem:[#allocation2 + $0x3c4] ss:$16 sps:$4 sm:$0xff]  }
  0x73   :  { %896 = vmatprep.subr.bf16.mxu0 %v8759_v62  ;;  %978 = vmatprep.subr.bf16.mxu1 %v8761_v63  ;;  %v8856_v62 = vld [vmem:[#allocation2 + $0x3cc] ss:$16 sps:$4 sm:$0xff]   ;;  %v8851_v63 = vld [vmem:[#allocation2 + $0x3c0] ss:$16 sps:$4 sm:$0xff]  }
  0x76   :  { %897 = vmatpush1.bf16.msra.mxu0 %v8763_v0  ;;  %979 = vmatpush1.bf16.msra.mxu1 %v8764_v1  ;;  %v8854_v0 = vld [vmem:[#allocation2 + $0x3c8] ss:$16 sps:$4 sm:$0xff]   ;;  %v8859_v1 = vld [vmem:[#allocation2 + $0x3e4] ss:$16 sps:$4 sm:$0xff]  }
  0x77   :  { %907 = vmatprep.subr.bf16.mxu0 %v8769_v2  ;;  %989 = vmatprep.subr.bf16.mxu1 %v8772_v3  ;;  %v8862_v2 = vld [vmem:[#allocation2 + $0x3ec] ss:$16 sps:$4 sm:$0xff]   ;;  %v8857_v3 = vld [vmem:[#allocation2 + $0x3e0] ss:$16 sps:$4 sm:$0xff]  }
  0x79   :  { %899 = vmatmul.mubr.bf16.vlgmr.msra.gmra.mrb[0].mxu0 %v7341_v4  ;;  %981 = vmatmul.mubr.bf16.vlgmr.msra.gmra.mrb[0].mxu1 %v7341_v4  ;;  %v8860_v4 = vld [vmem:[#allocation2 + $0x3e8] ss:$16 sps:$4 sm:$0xff]  }
  0x7a   :  { %908 = vmatpush1.bf16.msra.mxu0 %v8767_v5  ;;  %990 = vmatpush1.bf16.msra.mxu1 %v8770_v6  ;;  %v8867_v5 = vld [vmem:[#allocation2 + $0x404] ss:$16 sps:$4 sm:$0xff]   ;;  %v8870_v6 = vld [vmem:[#allocation2 + $0x40c] ss:$16 sps:$4 sm:$0xff]  }
  0x7b   :  { %909 = vmatprep.subr.bf16.mxu0 %v8775_v7  ;;  %991 = vmatprep.subr.bf16.mxu1 %v8778_v8  ;;  %v8865_v7 = vld [vmem:[#allocation2 + $0x400] ss:$16 sps:$4 sm:$0xff]   ;;  %v8868_v8 = vld [vmem:[#allocation2 + $0x408] ss:$16 sps:$4 sm:$0xff]  }
  0x7c   :  { %939 = vmatprep.mubr.bf16.mxu0 %v7344_v30  ;;  %1021 = vmatprep.mubr.bf16.mxu1 %v7344_v30  ;;  %v8903_v30 = vld [vmem:[#allocation2 + $0x4c4] ss:$16 sps:$4 sm:$0xff]  }
  0x7e   :  { %910 = vmatpush1.bf16.msra.mxu0 %v8773_v9  ;;  %992 = vmatpush1.bf16.msra.mxu1 %v8776_v10  ;;  %v7343_v9 = vcombine.low %v10055_v29, %v10055_v29  ;;  %v8873_v10 = vld [vmem:[#allocation2 + $0x424] ss:$16 sps:$4 sm:$0xff]   ;;  %v8898_v29 = vld [vmem:[#allocation2 + $0x4a8] ss:$16 sps:$4 sm:$0xff]  }
  0x7f   :  { %911 = vmatprep.subr.bf16.mxu0 %v8781_v11  ;;  %993 = vmatprep.subr.bf16.mxu1 %v8784_v12  ;;  %v8876_v11 = vld [vmem:[#allocation2 + $0x42c] ss:$16 sps:$4 sm:$0xff]   ;;  %v8871_v12 = vld [vmem:[#allocation2 + $0x420] ss:$16 sps:$4 sm:$0xff]  }
  0x82   :  { %912 = vmatpush1.bf16.msra.mxu0 %v8779_v13  ;;  %994 = vmatpush1.bf16.msra.mxu1 %v8782_v14  ;;  %v8874_v13 = vld [vmem:[#allocation2 + $0x428] ss:$16 sps:$4 sm:$0xff]   ;;  %v8879_v14 = vld [vmem:[#allocation2 + $0x444] ss:$16 sps:$4 sm:$0xff]  }
  0x83   :  { %913 = vmatprep.subr.bf16.mxu0 %v8787_v15  ;;  %995 = vmatprep.subr.bf16.mxu1 %v8790_v16  ;;  %v8882_v15 = vld [vmem:[#allocation2 + $0x44c] ss:$16 sps:$4 sm:$0xff]   ;;  %v8877_v16 = vld [vmem:[#allocation2 + $0x440] ss:$16 sps:$4 sm:$0xff]  }
  0x86   :  { %914 = vmatpush1.bf16.msra.mxu0 %v8785_v17  ;;  %996 = vmatpush1.bf16.msra.mxu1 %v8788_v18  ;;  %v8880_v17 = vld [vmem:[#allocation2 + $0x448] ss:$16 sps:$4 sm:$0xff]   ;;  %v8885_v18 = vld [vmem:[#allocation2 + $0x464] ss:$16 sps:$4 sm:$0xff]  }
  0x87   :  { %915 = vmatprep.subr.bf16.mxu0 %v8793_v19  ;;  %997 = vmatprep.subr.bf16.mxu1 %v8796_v20  ;;  %v8888_v19 = vld [vmem:[#allocation2 + $0x46c] ss:$16 sps:$4 sm:$0xff]   ;;  %v8883_v20 = vld [vmem:[#allocation2 + $0x460] ss:$16 sps:$4 sm:$0xff]  }
  0x8a   :  { %916 = vmatpush1.bf16.msra.mxu0 %v8791_v21  ;;  %998 = vmatpush1.bf16.msra.mxu1 %v8794_v22  ;;  %v8886_v21 = vld [vmem:[#allocation2 + $0x468] ss:$16 sps:$4 sm:$0xff]   ;;  %v8891_v22 = vld [vmem:[#allocation2 + $0x484] ss:$16 sps:$4 sm:$0xff]  }
  0x8b   :  { %917 = vmatprep.subr.bf16.mxu0 %v8799_v23  ;;  %999 = vmatprep.subr.bf16.mxu1 %v8802_v24  ;;  %v8894_v23 = vld [vmem:[#allocation2 + $0x48c] ss:$16 sps:$4 sm:$0xff]   ;;  %v8889_v24 = vld [vmem:[#allocation2 + $0x480] ss:$16 sps:$4 sm:$0xff]  }
  0x8e   :  { %918 = vmatpush1.bf16.msra.mxu0 %v8797_v25  ;;  %1000 = vmatpush1.bf16.msra.mxu1 %v8800_v26  ;;  %v8892_v25 = vld [vmem:[#allocation2 + $0x488] ss:$16 sps:$4 sm:$0xff]   ;;  %v8897_v26 = vld [vmem:[#allocation2 + $0x4a4] ss:$16 sps:$4 sm:$0xff]  }
  0x8f   :  { %919 = vmatprep.subr.bf16.mxu0 %v8805_v27  ;;  %1001 = vmatprep.subr.bf16.mxu1 %v8808_v28  ;;  %v8900_v27 = vld [vmem:[#allocation2 + $0x4ac] ss:$16 sps:$4 sm:$0xff]   ;;  %v8895_v28 = vld [vmem:[#allocation2 + $0x4a0] ss:$16 sps:$4 sm:$0xff]  }
  0x92   :  { %920 = vmatpush1.bf16.msra.mxu0 %v8803_v31  ;;  %1002 = vmatpush1.bf16.msra.mxu1 %v8806_v32  ;;  %v8906_v31 = vld [vmem:[#allocation2 + $0x4cc] ss:$16 sps:$4 sm:$0xff]   ;;  %v8901_v32 = vld [vmem:[#allocation2 + $0x4c0] ss:$16 sps:$4 sm:$0xff]  }
  0x93   :  { %921 = vmatprep.subr.bf16.mxu0 %v8811_v33  ;;  %1003 = vmatprep.subr.bf16.mxu1 %v8814_v34  ;;  %v8904_v33 = vld [vmem:[#allocation2 + $0x4c8] ss:$16 sps:$4 sm:$0xff]   ;;  %v8909_v34 = vld [vmem:[#allocation2 + $0x4e4] ss:$16 sps:$4 sm:$0xff]  }
  0x96   :  { %922 = vmatpush1.bf16.msra.mxu0 %v8809_v35  ;;  %1004 = vmatpush1.bf16.msra.mxu1 %v8812_v36  ;;  %v8912_v35 = vld [vmem:[#allocation2 + $0x4ec] ss:$16 sps:$4 sm:$0xff]   ;;  %v8907_v36 = vld [vmem:[#allocation2 + $0x4e0] ss:$16 sps:$4 sm:$0xff]  }
  0x97   :  { %923 = vmatprep.subr.bf16.mxu0 %v8817_v37  ;;  %1005 = vmatprep.subr.bf16.mxu1 %v8820_v38  ;;  %v8910_v37 = vld [vmem:[#allocation2 + $0x4e8] ss:$16 sps:$4 sm:$0xff]   ;;  %v8915_v38 = vld [vmem:[#allocation2 + $0x504] ss:$16 sps:$4 sm:$0xff]  }
  0x9a   :  { %924 = vmatpush1.bf16.msra.mxu0 %v8815_v39  ;;  %1006 = vmatpush1.bf16.msra.mxu1 %v8818_v40  ;;  %v8918_v39 = vld [vmem:[#allocation2 + $0x50c] ss:$16 sps:$4 sm:$0xff]   ;;  %v8913_v40 = vld [vmem:[#allocation2 + $0x500] ss:$16 sps:$4 sm:$0xff]  }
  0x9b   :  { %925 = vmatprep.subr.bf16.mxu0 %v8823_v41  ;;  %1007 = vmatprep.subr.bf16.mxu1 %v8826_v42  ;;  %v8916_v41 = vld [vmem:[#allocation2 + $0x508] ss:$16 sps:$4 sm:$0xff]   ;;  %v8921_v42 = vld [vmem:[#allocation2 + $0x524] ss:$16 sps:$4 sm:$0xff]  }
  0x9e   :  { %926 = vmatpush1.bf16.msra.mxu0 %v8821_v43  ;;  %1008 = vmatpush1.bf16.msra.mxu1 %v8824_v44  ;;  %v8924_v43 = vld [vmem:[#allocation2 + $0x52c] ss:$16 sps:$4 sm:$0xff]   ;;  %v8919_v44 = vld [vmem:[#allocation2 + $0x520] ss:$16 sps:$4 sm:$0xff]  }
  0x9f   :  { %927 = vmatprep.subr.bf16.mxu0 %v8829_v45  ;;  %1009 = vmatprep.subr.bf16.mxu1 %v8832_v46  ;;  %v8922_v45 = vld [vmem:[#allocation2 + $0x528] ss:$16 sps:$4 sm:$0xff]   ;;  %v8927_v46 = vld [vmem:[#allocation2 + $0x544] ss:$16 sps:$4 sm:$0xff]  }
  0xa2   :  { %928 = vmatpush1.bf16.msra.mxu0 %v8827_v47  ;;  %1010 = vmatpush1.bf16.msra.mxu1 %v8830_v48  ;;  %v8930_v47 = vld [vmem:[#allocation2 + $0x54c] ss:$16 sps:$4 sm:$0xff]   ;;  %v8925_v48 = vld [vmem:[#allocation2 + $0x540] ss:$16 sps:$4 sm:$0xff]  }
  0xa3   :  { %929 = vmatprep.subr.bf16.mxu0 %v8835_v49  ;;  %1011 = vmatprep.subr.bf16.mxu1 %v8838_v50  ;;  %v8928_v49 = vld [vmem:[#allocation2 + $0x548] ss:$16 sps:$4 sm:$0xff]   ;;  %v8933_v50 = vld [vmem:[#allocation2 + $0x564] ss:$16 sps:$4 sm:$0xff]  }
  0xa6   :  { %930 = vmatpush1.bf16.msra.mxu0 %v8833_v51  ;;  %1012 = vmatpush1.bf16.msra.mxu1 %v8836_v52  ;;  %v8936_v51 = vld [vmem:[#allocation2 + $0x56c] ss:$16 sps:$4 sm:$0xff]   ;;  %v8931_v52 = vld [vmem:[#allocation2 + $0x560] ss:$16 sps:$4 sm:$0xff]  }
  0xa7   :  { %931 = vmatprep.subr.bf16.mxu0 %v8841_v53  ;;  %1013 = vmatprep.subr.bf16.mxu1 %v8844_v54  ;;  %v8934_v53 = vld [vmem:[#allocation2 + $0x568] ss:$16 sps:$4 sm:$0xff]   ;;  %v8939_v54 = vld [vmem:[#allocation2 + $0x584] ss:$16 sps:$4 sm:$0xff]  }
  0xaa   :  { %932 = vmatpush1.bf16.msra.mxu0 %v8839_v55  ;;  %1014 = vmatpush1.bf16.msra.mxu1 %v8842_v56  ;;  %v8942_v55 = vld [vmem:[#allocation2 + $0x58c] ss:$16 sps:$4 sm:$0xff]   ;;  %v8937_v56 = vld [vmem:[#allocation2 + $0x580] ss:$16 sps:$4 sm:$0xff]  }
  0xab   :  { %933 = vmatprep.subr.bf16.mxu0 %v8847_v57  ;;  %1015 = vmatprep.subr.bf16.mxu1 %v8850_v58  ;;  %v8940_v57 = vld [vmem:[#allocation2 + $0x588] ss:$16 sps:$4 sm:$0xff]   ;;  %v8945_v58 = vld [vmem:[#allocation2 + $0x5a4] ss:$16 sps:$4 sm:$0xff]  }
  0xae   :  { %934 = vmatpush1.bf16.msra.mxu0 %v8845_v59  ;;  %1016 = vmatpush1.bf16.msra.mxu1 %v8848_v60  ;;  %v8948_v59 = vld [vmem:[#allocation2 + $0x5ac] ss:$16 sps:$4 sm:$0xff]   ;;  %v8943_v60 = vld [vmem:[#allocation2 + $0x5a0] ss:$16 sps:$4 sm:$0xff]  }
  0xaf   :  { %935 = vmatprep.subr.bf16.mxu0 %v8853_v61  ;;  %1017 = vmatprep.subr.bf16.mxu1 %v8856_v62  ;;  %v8946_v61 = vld [vmem:[#allocation2 + $0x5a8] ss:$16 sps:$4 sm:$0xff]   ;;  %v8951_v62 = vld [vmem:[#allocation2 + $0x5c4] ss:$16 sps:$4 sm:$0xff]  }
  0xb2   :  { %936 = vmatpush1.bf16.msra.mxu0 %v8851_v63  ;;  %1018 = vmatpush1.bf16.msra.mxu1 %v8854_v0  ;;  %v8954_v63 = vld [vmem:[#allocation2 + $0x5cc] ss:$16 sps:$4 sm:$0xff]   ;;  %v8949_v0 = vld [vmem:[#allocation2 + $0x5c0] ss:$16 sps:$4 sm:$0xff]  }
  0xb3   :  { %937 = vmatprep.subr.bf16.mxu0 %v8859_v1  ;;  %1019 = vmatprep.subr.bf16.mxu1 %v8862_v2  ;;  %v8952_v1 = vld [vmem:[#allocation2 + $0x5c8] ss:$16 sps:$4 sm:$0xff]   ;;  %v8957_v2 = vld [vmem:[#allocation2 + $0x5e4] ss:$16 sps:$4 sm:$0xff]  }
  0xb6   :  { %938 = vmatpush1.bf16.msra.mxu0 %v8857_v3  ;;  %1020 = vmatpush1.bf16.msra.mxu1 %v8860_v4  ;;  %v8960_v3 = vld [vmem:[#allocation2 + $0x5ec] ss:$16 sps:$4 sm:$0xff]   ;;  %v8955_v4 = vld [vmem:[#allocation2 + $0x5e0] ss:$16 sps:$4 sm:$0xff]  }
  0xb7   :  { %1825 = vmatprep.subr.bf16.mxu0 %v8867_v5  ;;  %1907 = vmatprep.subr.bf16.mxu1 %v8870_v6  ;;  %v8958_v5 = vld [vmem:[#allocation2 + $0x5e8] ss:$16 sps:$4 sm:$0xff]   ;;  %v8963_v6 = vld [vmem:[#allocation2 + $0x604] ss:$16 sps:$4 sm:$0xff]  }
  0xb9   :  { %940 = vmatmul.mubr.bf16.vlgmr.msra.gmra.mrb[0].mxu0 %v7343_v9  ;;  %1022 = vmatmul.mubr.bf16.vlgmr.msra.gmra.mrb[0].mxu1 %v7343_v9 }
  0xba   :  { %1826 = vmatpush1.bf16.msra.mxu0 %v8865_v7  ;;  %1908 = vmatpush1.bf16.msra.mxu1 %v8868_v8  ;;  %v8966_v7 = vld [vmem:[#allocation2 + $0x60c] ss:$16 sps:$4 sm:$0xff]   ;;  %v192_v8 = vlaneseq }
  0xbb   :  { %1827 = vmatprep.subr.bf16.mxu0 %v8873_v10  ;;  %1909 = vmatprep.subr.bf16.mxu1 %v8876_v11  ;;  %v10066_v11 = vld [vmem:[#allocation7] ss:$8 sm:$0xf] }
  0xbc   :  { %v10061_v9 = vshrl.u32 %v192_v8, 7  ;;  %v9023_v8 = vld [vmem:[#allocation2 + $0x744] ss:$16 sps:$4 sm:$0xff]  }
  0xbe   :  { %1828 = vmatpush1.bf16.msra.mxu0 %v8871_v12  ;;  %1910 = vmatpush1.bf16.msra.mxu1 %v8874_v13  ;;  %v10064_v10 = vsub.s32 0, %v10061_v9  ;;  %v10069_v12 = vsub.s32 1, %v10061_v9  ;;  %v206_v13 = vsub.s32 3, %v10061_v9 }
  0xbf   :  { %1829 = vmatprep.subr.bf16.mxu0 %v8879_v14  ;;  %1911 = vmatprep.subr.bf16.mxu1 %v8882_v15 }
  0xc0   :  { %v195_v14 = vrot.slane %v10066_v11, %v10064_v10  ;;  %v199_v15 = vrot.slane %v10066_v11, %v10069_v12 }
  0xc2   :  { %1830 = vmatpush1.bf16.msra.mxu0 %v8877_v16  ;;  %1912 = vmatpush1.bf16.msra.mxu1 %v8880_v17  ;;  %v207_v16 = vrot.slane %v10066_v11, %v206_v13  ;;  %v9026_v13 = vld [vmem:[#allocation2 + $0x74c] ss:$16 sps:$4 sm:$0xff]  }
  0xc3   :  { %1831 = vmatprep.subr.bf16.mxu0 %v8885_v18  ;;  %1913 = vmatprep.subr.bf16.mxu1 %v8888_v19 }
  0xc6   :  { %1832 = vmatpush1.bf16.msra.mxu0 %v8883_v20  ;;  %1914 = vmatpush1.bf16.msra.mxu1 %v8886_v21 }
  0xc7   :  { %1833 = vmatprep.subr.bf16.mxu0 %v8891_v22  ;;  %1915 = vmatprep.subr.bf16.mxu1 %v8894_v23 }
  0xca   :  { %1834 = vmatpush1.bf16.msra.mxu0 %v8889_v24  ;;  %1916 = vmatpush1.bf16.msra.mxu1 %v8892_v25 }
  0xcb   :  { %1835 = vmatprep.subr.bf16.mxu0 %v8897_v26  ;;  %1917 = vmatprep.subr.bf16.mxu1 %v8900_v27 }
  0xce   :  { %1836 = vmatpush1.bf16.msra.mxu0 %v8895_v28  ;;  %1918 = vmatpush1.bf16.msra.mxu1 %v8898_v29  ;;  %v8961_v29 = vld [vmem:[#allocation2 + $0x600] ss:$16 sps:$4 sm:$0xff]  }
  0xcf   :  { %1837 = vmatprep.subr.bf16.mxu0 %v8903_v30  ;;  %1919 = vmatprep.subr.bf16.mxu1 %v8906_v31  ;;  %v8964_v30 = vld [vmem:[#allocation2 + $0x608] ss:$16 sps:$4 sm:$0xff]  }
  0xd2   :  { %1838 = vmatpush1.bf16.msra.mxu0 %v8901_v32  ;;  %1920 = vmatpush1.bf16.msra.mxu1 %v8904_v33 }
  0xd3   :  { %1839 = vmatprep.subr.bf16.mxu0 %v8909_v34  ;;  %1921 = vmatprep.subr.bf16.mxu1 %v8912_v35  ;;  %v8969_v34 = vld [vmem:[#allocation2 + $0x624] ss:$16 sps:$4 sm:$0xff]   ;;  %v8972_v35 = vld [vmem:[#allocation2 + $0x62c] ss:$16 sps:$4 sm:$0xff]  }
  0xd6   :  { %1840 = vmatpush1.bf16.msra.mxu0 %v8907_v36  ;;  %1922 = vmatpush1.bf16.msra.mxu1 %v8910_v37  ;;  %v8967_v37 = vld [vmem:[#allocation2 + $0x620] ss:$16 sps:$4 sm:$0xff]  }
  0xd7   :  { %1841 = vmatprep.subr.bf16.mxu0 %v8915_v38  ;;  %1923 = vmatprep.subr.bf16.mxu1 %v8918_v39  ;;  %v8970_v38 = vld [vmem:[#allocation2 + $0x628] ss:$16 sps:$4 sm:$0xff]  }
  0xda   :  { %1842 = vmatpush1.bf16.msra.mxu0 %v8913_v40  ;;  %1924 = vmatpush1.bf16.msra.mxu1 %v8916_v41  ;;  %v8975_v40 = vld [vmem:[#allocation2 + $0x644] ss:$16 sps:$4 sm:$0xff]   ;;  %v8978_v41 = vld [vmem:[#allocation2 + $0x64c] ss:$16 sps:$4 sm:$0xff]  }
  0xdb   :  { %1843 = vmatprep.subr.bf16.mxu0 %v8921_v42  ;;  %1925 = vmatprep.subr.bf16.mxu1 %v8924_v43  ;;  %v8973_v42 = vld [vmem:[#allocation2 + $0x640] ss:$16 sps:$4 sm:$0xff]   ;;  %v8976_v43 = vld [vmem:[#allocation2 + $0x648] ss:$16 sps:$4 sm:$0xff]  }
  0xde   :  { %1844 = vmatpush1.bf16.msra.mxu0 %v8919_v44  ;;  %1926 = vmatpush1.bf16.msra.mxu1 %v8922_v45  ;;  %v8981_v44 = vld [vmem:[#allocation2 + $0x664] ss:$16 sps:$4 sm:$0xff]   ;;  %v8984_v45 = vld [vmem:[#allocation2 + $0x66c] ss:$16 sps:$4 sm:$0xff]  }
  0xdf   :  { %1845 = vmatprep.subr.bf16.mxu0 %v8927_v46  ;;  %1927 = vmatprep.subr.bf16.mxu1 %v8930_v47  ;;  %v8979_v46 = vld [vmem:[#allocation2 + $0x660] ss:$16 sps:$4 sm:$0xff]   ;;  %v8982_v47 = vld [vmem:[#allocation2 + $0x668] ss:$16 sps:$4 sm:$0xff]  }
  0xe2   :  { %1846 = vmatpush1.bf16.msra.mxu0 %v8925_v48  ;;  %1928 = vmatpush1.bf16.msra.mxu1 %v8928_v49  ;;  %v8987_v48 = vld [vmem:[#allocation2 + $0x684] ss:$16 sps:$4 sm:$0xff]   ;;  %v8990_v49 = vld [vmem:[#allocation2 + $0x68c] ss:$16 sps:$4 sm:$0xff]  }
  0xe3   :  { %1847 = vmatprep.subr.bf16.mxu0 %v8933_v50  ;;  %1929 = vmatprep.subr.bf16.mxu1 %v8936_v51  ;;  %v8985_v50 = vld [vmem:[#allocation2 + $0x680] ss:$16 sps:$4 sm:$0xff]   ;;  %v8988_v51 = vld [vmem:[#allocation2 + $0x688] ss:$16 sps:$4 sm:$0xff]  }
  0xe6   :  { %1848 = vmatpush1.bf16.msra.mxu0 %v8931_v52  ;;  %1930 = vmatpush1.bf16.msra.mxu1 %v8934_v53  ;;  %v8993_v52 = vld [vmem:[#allocation2 + $0x6a4] ss:$16 sps:$4 sm:$0xff]   ;;  %v8996_v53 = vld [vmem:[#allocation2 + $0x6ac] ss:$16 sps:$4 sm:$0xff]  }
  0xe7   :  { %1849 = vmatprep.subr.bf16.mxu0 %v8939_v54  ;;  %1931 = vmatprep.subr.bf16.mxu1 %v8942_v55  ;;  %v8991_v54 = vld [vmem:[#allocation2 + $0x6a0] ss:$16 sps:$4 sm:$0xff]   ;;  %v8994_v55 = vld [vmem:[#allocation2 + $0x6a8] ss:$16 sps:$4 sm:$0xff]  }
  0xea   :  { %1850 = vmatpush1.bf16.msra.mxu0 %v8937_v56  ;;  %1932 = vmatpush1.bf16.msra.mxu1 %v8940_v57  ;;  %v8999_v56 = vld [vmem:[#allocation2 + $0x6c4] ss:$16 sps:$4 sm:$0xff]   ;;  %v9002_v57 = vld [vmem:[#allocation2 + $0x6cc] ss:$16 sps:$4 sm:$0xff]  }
  0xeb   :  { %1851 = vmatprep.subr.bf16.mxu0 %v8945_v58  ;;  %1933 = vmatprep.subr.bf16.mxu1 %v8948_v59  ;;  %v8997_v58 = vld [vmem:[#allocation2 + $0x6c0] ss:$16 sps:$4 sm:$0xff]   ;;  %v9000_v59 = vld [vmem:[#allocation2 + $0x6c8] ss:$16 sps:$4 sm:$0xff]  }
  0xee   :  { %1852 = vmatpush1.bf16.msra.mxu0 %v8943_v60  ;;  %1934 = vmatpush1.bf16.msra.mxu1 %v8946_v61  ;;  %v9005_v60 = vld [vmem:[#allocation2 + $0x6e4] ss:$16 sps:$4 sm:$0xff]   ;;  %v9008_v61 = vld [vmem:[#allocation2 + $0x6ec] ss:$16 sps:$4 sm:$0xff]  }
  0xef   :  { %1853 = vmatprep.subr.bf16.mxu0 %v8951_v62  ;;  %1935 = vmatprep.subr.bf16.mxu1 %v8954_v63  ;;  %v9003_v62 = vld [vmem:[#allocation2 + $0x6e0] ss:$16 sps:$4 sm:$0xff]   ;;  %v9006_v63 = vld [vmem:[#allocation2 + $0x6e8] ss:$16 sps:$4 sm:$0xff]  }
  0xf2   :  { %1854 = vmatpush1.bf16.msra.mxu0 %v8949_v0  ;;  %1936 = vmatpush1.bf16.msra.mxu1 %v8952_v1  ;;  %v9011_v0 = vld [vmem:[#allocation2 + $0x704] ss:$16 sps:$4 sm:$0xff]   ;;  %v9014_v1 = vld [vmem:[#allocation2 + $0x70c] ss:$16 sps:$4 sm:$0xff]  }
  0xf3   :  { %1855 = vmatprep.subr.bf16.mxu0 %v8957_v2  ;;  %1937 = vmatprep.subr.bf16.mxu1 %v8960_v3  ;;  %v9009_v2 = vld [vmem:[#allocation2 + $0x700] ss:$16 sps:$4 sm:$0xff]   ;;  %v9012_v3 = vld [vmem:[#allocation2 + $0x708] ss:$16 sps:$4 sm:$0xff]  }
  0xf6   :  { %1856 = vmatpush1.bf16.msra.mxu0 %v8955_v4  ;;  %1938 = vmatpush1.bf16.msra.mxu1 %v8958_v5  ;;  %v9017_v4 = vld [vmem:[#allocation2 + $0x724] ss:$16 sps:$4 sm:$0xff]   ;;  %v9020_v5 = vld [vmem:[#allocation2 + $0x72c] ss:$16 sps:$4 sm:$0xff]  }
  0xf7   :  { %1866 = vmatprep.subr.bf16.mxu0 %v8963_v6  ;;  %1947 = vmatprep.subr.bf16.mxu1 %v8966_v7  ;;  %v9015_v6 = vld [vmem:[#allocation2 + $0x720] ss:$16 sps:$4 sm:$0xff]   ;;  %v9018_v7 = vld [vmem:[#allocation2 + $0x728] ss:$16 sps:$4 sm:$0xff]  }
 0x18c   :  { %v941_v17 = vpop.f32.mrb[0].mxu0  ;;  %v10077_v18 = vpop.f32.mrb[0].mxu1 }
 0x18d   :  { %v8585_v19 = vadd.f32 %v941_v17, %v195_v14  ;;  %v943_v20 = vpop.f32.mrb[1].mxu0  ;;  %v1025_v21 = vpop.f32.mrb[1].mxu1  ;;  %v9021_v14 = vld [vmem:[#allocation2 + $0x740] ss:$16 sps:$4 sm:$0xff]   ;;  %v9032_v17 = vld [vmem:[#allocation2 + $0x76c] ss:$16 sps:$4 sm:$0xff]  }
 0x18e   :  { %v8586_v22 = vadd.f32 %v943_v20, %v199_v15  ;;  %v8588_v23 = vadd.f32 %v1025_v21, %v207_v16  ;;  %v945_v24 = vpop.f32.mrb[2].mxu0  ;;  %v1027_v25 = vpop.f32.mrb[2].mxu1  ;;  %v9024_v15 = vld [vmem:[#allocation2 + $0x748] ss:$16 sps:$4 sm:$0xff]   ;;  %v9029_v16 = vld [vmem:[#allocation2 + $0x764] ss:$16 sps:$4 sm:$0xff]  }
 0x18f   :  { %v946_v26 = vpop.f32.mrb[3].mxu0  ;;  %v1028_v27 = vpop.f32.mrb[3].mxu1  ;;  %9825 = vtanh.f32 %v8585_v19  ;;  %v10080_v19 = vsub.s32 2, %v10061_v9  ;;  %v9027_v20 = vld [vmem:[#allocation2 + $0x760] ss:$16 sps:$4 sm:$0xff]  }
 0x190   :  { %9827 = vtanh.f32 %v8586_v22  ;;  %v9030_v21 = vld [vmem:[#allocation2 + $0x768] ss:$16 sps:$4 sm:$0xff]   ;;  %v9035_v22 = vld [vmem:[#allocation2 + $0x784] ss:$16 sps:$4 sm:$0xff]   ;;  %v9033_v25 = vld [vmem:[#allocation2 + $0x780] ss:$16 sps:$4 sm:$0xff]  }
 0x191   :  { %9829 = vtanh.f32 %v8588_v23  ;;  %v9038_v23 = vld [vmem:[#allocation2 + $0x78c] ss:$16 sps:$4 sm:$0xff]   ;;  %v203_v24 = vrot.slane %v10066_v11, %v10080_v19  ;;  %v9036_v26 = vld [vmem:[#allocation2 + $0x788] ss:$16 sps:$4 sm:$0xff]   ;;  %v9041_v27 = vld [vmem:[#allocation2 + $0x7a4] ss:$16 sps:$4 sm:$0xff]  }
 0x192   :  { %v9044_v9 = vld [vmem:[#allocation2 + $0x7ac] ss:$16 sps:$4 sm:$0xff]   ;;  %v9045_v11 = vld [vmem:[#allocation2 + $0x7c0] ss:$16 sps:$4 sm:$0xff]  }
 0x199   :  { %v9826_v28 = vpop.eup %9825 }
 0x19a   :  { %v9828_v31 = vpop.eup %9827  ;;  %v1034_v36 = vpack.c.bf16 %v9826_v28, %v9826_v28  ;;  %v8587_v28 = vadd.f32 %v10077_v18, %v203_v24  ;;  %v9051_v18 = vld [vmem:[#allocation2 + $0x7e0] ss:$16 sps:$4 sm:$0xff]   ;;  %v9115_v24 = vld [vmem:[#allocation5 + $0x98] ss:$12 sps:$4 sm:$0xff]  }
 0x19b   :  { %v9830_v32 = vpop.eup %9829  ;;  %v1035_v33 = vpack.c.bf16 %v9828_v31, %v9828_v31  ;;  %v9047_v31 = vld [vmem:[#allocation2 + $0x7c4] ss:$16 sps:$4 sm:$0xff]  }
 0x19c   :  { %v1037_v39 = vpack.c.bf16 %v9830_v32, %v9830_v32  ;;  %v9050_v32 = vld [vmem:[#allocation2 + $0x7cc] ss:$16 sps:$4 sm:$0xff]   ;;  %9831 = vtanh.f32 %v8587_v28  ;;  %v9123_v28 = vld [vmem:[#allocation5 + $0x184] ss:$12 sps:$4 sm:$0xff]  }
 0x19d   :  { %1857 = vmatprep.mubr.bf16.mxu0 %v1035_v33  ;;  %1939 = vmatprep.mubr.bf16.mxu1 %v1035_v33  ;;  %v9048_v33 = vld [vmem:[#allocation2 + $0x7c8] ss:$16 sps:$4 sm:$0xff]  }
 0x19e   :  { %1858 = vmatmul.mubr.bf16.vlgmr.msra.gmra.mrb[4].mxu0 %v1034_v36  ;;  %1940 = vmatmul.mubr.bf16.vlgmr.msra.gmra.mrb[4].mxu1 %v1034_v36  ;;  %v9054_v36 = vld [vmem:[#allocation2 + $0x7e8] ss:$16 sps:$4 sm:$0xff]  }
 0x19f   :  { %1867 = vmatpush1.bf16.msra.mxu0 %v8961_v29  ;;  %1948 = vmatpush1.bf16.msra.mxu1 %v8964_v30  ;;  %v9039_v29 = vld [vmem:[#allocation2 + $0x7a0] ss:$16 sps:$4 sm:$0xff]   ;;  %v9042_v30 = vld [vmem:[#allocation2 + $0x7a8] ss:$16 sps:$4 sm:$0xff]  }
 0x1a0   :  { %1898 = vmatprep.mubr.bf16.mxu0 %v1037_v39  ;;  %1979 = vmatprep.mubr.bf16.mxu1 %v1037_v39 }
 0x1a1   :  { %1868 = vmatprep.subr.bf16.mxu0 %v8969_v34  ;;  %1949 = vmatprep.subr.bf16.mxu1 %v8972_v35  ;;  %v9053_v34 = vld [vmem:[#allocation2 + $0x7e4] ss:$16 sps:$4 sm:$0xff]   ;;  %v9056_v35 = vld [vmem:[#allocation2 + $0x7ec] ss:$16 sps:$4 sm:$0xff]  }
 0x1a3   :  { %1869 = vmatpush1.bf16.msra.mxu0 %v8967_v37  ;;  %1950 = vmatpush1.bf16.msra.mxu1 %v8970_v38  ;;  %v9059_v37 = vld [vmem:[#allocation5 + $0x4] ss:$12 sps:$4 sm:$0xff]   ;;  %v9084_v38 = vld [vmem:[#allocation5 + $0xc8] ss:$12 sps:$4 sm:$0xff]  }
 0x1a4   :  { %1870 = vmatprep.subr.bf16.mxu0 %v8975_v40  ;;  %1951 = vmatprep.subr.bf16.mxu1 %v8978_v41  ;;  %v9057_v40 = vld [vmem:[#allocation5] ss:$12 sps:$4 sm:$0xff]   ;;  %v9085_v41 = vld [vmem:[#allocation5 + $0x8] ss:$12 sps:$4 sm:$0xff]  }
 0x1a6   :  { %v9832_v39 = vpop.eup %9831 }
 0x1a7   :  { %1871 = vmatpush1.bf16.msra.mxu0 %v8973_v42  ;;  %1952 = vmatpush1.bf16.msra.mxu1 %v8976_v43  ;;  %v9062_v42 = vld [vmem:[#allocation5 + $0x1c] ss:$12 sps:$4 sm:$0xff]   ;;  %v9089_v43 = vld [vmem:[#allocation5 + $0xe0] ss:$12 sps:$4 sm:$0xff]  }
 0x1a8   :  { %1872 = vmatprep.subr.bf16.mxu0 %v8981_v44  ;;  %1953 = vmatprep.subr.bf16.mxu1 %v8984_v45  ;;  %v1036_v44 = vpack.c.bf16 %v9832_v39, %v9832_v39  ;;  %v9060_v45 = vld [vmem:[#allocation5 + $0x18] ss:$12 sps:$4 sm:$0xff]  }
 0x1ab   :  { %1873 = vmatpush1.bf16.msra.mxu0 %v8979_v46  ;;  %1954 = vmatpush1.bf16.msra.mxu1 %v8982_v47  ;;  %v9090_v46 = vld [vmem:[#allocation5 + $0x20] ss:$12 sps:$4 sm:$0xff]  }
 0x1ac   :  { %1874 = vmatprep.subr.bf16.mxu0 %v8987_v48  ;;  %1955 = vmatprep.subr.bf16.mxu1 %v8990_v49  ;;  %v9065_v47 = vld [vmem:[#allocation5 + $0x34] ss:$12 sps:$4 sm:$0xff]   ;;  %v9094_v48 = vld [vmem:[#allocation5 + $0xf8] ss:$12 sps:$4 sm:$0xff]   ;;  %v9063_v49 = vld [vmem:[#allocation5 + $0x30] ss:$12 sps:$4 sm:$0xff]  }
 0x1af   :  { %1875 = vmatpush1.bf16.msra.mxu0 %v8985_v50  ;;  %1956 = vmatpush1.bf16.msra.mxu1 %v8988_v51  ;;  %v9095_v50 = vld [vmem:[#allocation5 + $0x38] ss:$12 sps:$4 sm:$0xff]  }
 0x1b0   :  { %1876 = vmatprep.subr.bf16.mxu0 %v8993_v52  ;;  %1957 = vmatprep.subr.bf16.mxu1 %v8996_v53  ;;  %v9068_v51 = vld [vmem:[#allocation5 + $0x4c] ss:$12 sps:$4 sm:$0xff]   ;;  %v9099_v52 = vld [vmem:[#allocation5 + $0x110] ss:$12 sps:$4 sm:$0xff]   ;;  %v9066_v53 = vld [vmem:[#allocation5 + $0x48] ss:$12 sps:$4 sm:$0xff]  }
 0x1b3   :  { %1877 = vmatpush1.bf16.msra.mxu0 %v8991_v54  ;;  %1958 = vmatpush1.bf16.msra.mxu1 %v8994_v55  ;;  %v9100_v54 = vld [vmem:[#allocation5 + $0x50] ss:$12 sps:$4 sm:$0xff]  }
 0x1b4   :  { %1878 = vmatprep.subr.bf16.mxu0 %v8999_v56  ;;  %1959 = vmatprep.subr.bf16.mxu1 %v9002_v57  ;;  %v9071_v55 = vld [vmem:[#allocation5 + $0x64] ss:$12 sps:$4 sm:$0xff]   ;;  %v9069_v56 = vld [vmem:[#allocation5 + $0x60] ss:$12 sps:$4 sm:$0xff]   ;;  %v9074_v57 = vld [vmem:[#allocation5 + $0x7c] ss:$12 sps:$4 sm:$0xff]  }
 0x1b7   :  { %1879 = vmatpush1.bf16.msra.mxu0 %v8997_v58  ;;  %1960 = vmatpush1.bf16.msra.mxu1 %v9000_v59  ;;  %v9072_v58 = vld [vmem:[#allocation5 + $0x78] ss:$12 sps:$4 sm:$0xff]   ;;  %v9077_v59 = vld [vmem:[#allocation5 + $0x94] ss:$12 sps:$4 sm:$0xff]  }
 0x1b8   :  { %1880 = vmatprep.subr.bf16.mxu0 %v9005_v60  ;;  %1961 = vmatprep.subr.bf16.mxu1 %v9008_v61  ;;  %v9075_v60 = vld [vmem:[#allocation5 + $0x90] ss:$12 sps:$4 sm:$0xff]   ;;  %v9080_v61 = vld [vmem:[#allocation5 + $0xac] ss:$12 sps:$4 sm:$0xff]  }
 0x1bb   :  { %1881 = vmatpush1.bf16.msra.mxu0 %v9003_v62  ;;  %1962 = vmatpush1.bf16.msra.mxu1 %v9006_v63  ;;  %v9078_v62 = vld [vmem:[#allocation5 + $0xa8] ss:$12 sps:$4 sm:$0xff]   ;;  %v9083_v63 = vld [vmem:[#allocation5 + $0xc4] ss:$12 sps:$4 sm:$0xff]  }
 0x1bc   :  { %1882 = vmatprep.subr.bf16.mxu0 %v9011_v0  ;;  %1963 = vmatprep.subr.bf16.mxu1 %v9014_v1  ;;  %v9081_v0 = vld [vmem:[#allocation5 + $0xc0] ss:$12 sps:$4 sm:$0xff]   ;;  %v9088_v1 = vld [vmem:[#allocation5 + $0xdc] ss:$12 sps:$4 sm:$0xff]  }
 0x1bf   :  { %1883 = vmatpush1.bf16.msra.mxu0 %v9009_v2  ;;  %1964 = vmatpush1.bf16.msra.mxu1 %v9012_v3  ;;  %v9086_v2 = vld [vmem:[#allocation5 + $0xd8] ss:$12 sps:$4 sm:$0xff]   ;;  %v9093_v3 = vld [vmem:[#allocation5 + $0xf4] ss:$12 sps:$4 sm:$0xff]  }
 0x1c0   :  { %1884 = vmatprep.subr.bf16.mxu0 %v9017_v4  ;;  %1965 = vmatprep.subr.bf16.mxu1 %v9020_v5  ;;  %v9091_v4 = vld [vmem:[#allocation5 + $0xf0] ss:$12 sps:$4 sm:$0xff]   ;;  %v9098_v5 = vld [vmem:[#allocation5 + $0x10c] ss:$12 sps:$4 sm:$0xff]  }
 0x1c3   :  { %1885 = vmatpush1.bf16.msra.mxu0 %v9015_v6  ;;  %1966 = vmatpush1.bf16.msra.mxu1 %v9018_v7  ;;  %v9096_v6 = vld [vmem:[#allocation5 + $0x108] ss:$12 sps:$4 sm:$0xff]   ;;  %v9103_v7 = vld [vmem:[#allocation5 + $0x124] ss:$12 sps:$4 sm:$0xff]  }
 0x1c4   :  { %1886 = vmatprep.subr.bf16.mxu0 %v9023_v8  ;;  %1967 = vmatprep.subr.bf16.mxu1 %v9026_v13  ;;  %v9104_v8 = vld [vmem:[#allocation5 + $0x128] ss:$12 sps:$4 sm:$0xff]   ;;  %v9101_v13 = vld [vmem:[#allocation5 + $0x120] ss:$12 sps:$4 sm:$0xff]  }
 0x1c7   :  { %1887 = vmatpush1.bf16.msra.mxu0 %v9021_v14  ;;  %1968 = vmatpush1.bf16.msra.mxu1 %v9024_v15  ;;  %v9105_v14 = vld [vmem:[#allocation5 + $0x68] ss:$12 sps:$4 sm:$0xff]  }
 0x1c8   :  { %1888 = vmatprep.subr.bf16.mxu0 %v9029_v16  ;;  %1969 = vmatprep.subr.bf16.mxu1 %v9032_v17  ;;  %v9108_v15 = vld [vmem:[#allocation5 + $0x13c] ss:$12 sps:$4 sm:$0xff]   ;;  %v9109_v16 = vld [vmem:[#allocation5 + $0x140] ss:$12 sps:$4 sm:$0xff]   ;;  %v9106_v17 = vld [vmem:[#allocation5 + $0x138] ss:$12 sps:$4 sm:$0xff]  }
 0x1cb   :  { %1889 = vmatpush1.bf16.msra.mxu0 %v9027_v20  ;;  %1970 = vmatpush1.bf16.msra.mxu1 %v9030_v21  ;;  %v9110_v20 = vld [vmem:[#allocation5 + $0x80] ss:$12 sps:$4 sm:$0xff]  }
 0x1cc   :  { %1890 = vmatprep.subr.bf16.mxu0 %v9035_v22  ;;  %1971 = vmatprep.subr.bf16.mxu1 %v9038_v23  ;;  %v9113_v21 = vld [vmem:[#allocation5 + $0x154] ss:$12 sps:$4 sm:$0xff]   ;;  %v9114_v22 = vld [vmem:[#allocation5 + $0x158] ss:$12 sps:$4 sm:$0xff]   ;;  %v9111_v23 = vld [vmem:[#allocation5 + $0x150] ss:$12 sps:$4 sm:$0xff]  }
 0x1cf   :  { %1891 = vmatpush1.bf16.msra.mxu0 %v9033_v25  ;;  %1972 = vmatpush1.bf16.msra.mxu1 %v9036_v26  ;;  %v9118_v25 = vld [vmem:[#allocation5 + $0x16c] ss:$12 sps:$4 sm:$0xff]   ;;  %v9119_v26 = vld [vmem:[#allocation5 + $0x170] ss:$12 sps:$4 sm:$0xff]  }
 0x1d0   :  { %1892 = vmatprep.subr.bf16.mxu0 %v9041_v27  ;;  %1973 = vmatprep.subr.bf16.mxu1 %v9044_v9  ;;  %v9116_v27 = vld [vmem:[#allocation5 + $0x168] ss:$12 sps:$4 sm:$0xff]   ;;  %v9120_v9 = vld [vmem:[#allocation5 + $0xb0] ss:$12 sps:$4 sm:$0xff]  }
 0x1d3   :  { %1893 = vmatpush1.bf16.msra.mxu0 %v9039_v29  ;;  %1974 = vmatpush1.bf16.msra.mxu1 %v9042_v30  ;;  %v9984_v29 = vmov 0.0   ;;  %v1168_v30 = vld [vmem:[#allocation7 + $0x1] ss:$8 sm:$0xf] }
 0x1d4   :  { %1894 = vmatprep.subr.bf16.mxu0 %v9047_v31  ;;  %1975 = vmatprep.subr.bf16.mxu1 %v9050_v32  ;;  %v1173_v31 = vrot.slane %v1168_v30, %v10064_v10  ;;  %v1177_v32 = vrot.slane %v1168_v30, %v10069_v12 }
 0x1d7   :  { %1895 = vmatpush1.bf16.msra.mxu0 %v9045_v11  ;;  %1976 = vmatpush1.bf16.msra.mxu1 %v9048_v33 }
 0x1d8   :  { %1896 = vmatprep.subr.bf16.mxu0 %v9053_v34  ;;  %1977 = vmatprep.subr.bf16.mxu1 %v9056_v35 }
 0x1db   :  { %1897 = vmatpush1.bf16.msra.mxu0 %v9051_v18  ;;  %1978 = vmatpush1.bf16.msra.mxu1 %v9054_v36 }
 0x1dc   :  { %2491 = vmatprep.subr.bf16.mxu0 %v9059_v37  ;;  %8177 = vmatprep.subr.bf16.mxu1 %v9084_v38 }
 0x1de   :  { %1899 = vmatmul.mubr.bf16.vlgmr.msra.gmra.mrb[4].mxu0 %v1036_v44  ;;  %1980 = vmatmul.mubr.bf16.vlgmr.msra.gmra.mrb[4].mxu1 %v1036_v44  ;;  %v9121_v44 = vld [vmem:[#allocation5 + $0x180] ss:$12 sps:$4 sm:$0xff]  }
 0x1df   :  { %2492 = vmatpush1.bf16.msra.mxu0 %v9057_v40  ;;  %8178 = vmatpush3.bf16.msra.mxu1 %v9085_v41 }
 0x1e0   :  { %2493 = vmatprep.subr.bf16.mxu0 %v9062_v42  ;;  %8179 = vmatprep.subr.bf16.mxu1 %v9089_v43 }
 0x1e3   :  { %2494 = vmatpush1.bf16.msra.mxu0 %v9060_v45  ;;  %8180 = vmatpush3.bf16.msra.mxu1 %v9090_v46  ;;  %v9124_v45 = vld [vmem:[#allocation5 + $0x188] ss:$12 sps:$4 sm:$0xff]  }
 0x1e4   :  { %2495 = vmatprep.subr.bf16.mxu0 %v9065_v47  ;;  %8181 = vmatprep.subr.bf16.mxu1 %v9094_v48  ;;  %v9127_v47 = vld [vmem:[#allocation5 + $0x19c] ss:$12 sps:$4 sm:$0xff]   ;;  %v9125_v48 = vld [vmem:[#allocation5 + $0x198] ss:$12 sps:$4 sm:$0xff]  }
 0x1e7   :  { %2496 = vmatpush1.bf16.msra.mxu0 %v9063_v49  ;;  %8182 = vmatpush3.bf16.msra.mxu1 %v9095_v50  ;;  %v9128_v49 = vld [vmem:[#allocation5 + $0x1a0] ss:$12 sps:$4 sm:$0xff]  }
 0x1e8   :  { %2497 = vmatprep.subr.bf16.mxu0 %v9068_v51  ;;  %8183 = vmatprep.subr.bf16.mxu1 %v9099_v52  ;;  %v9131_v50 = vld [vmem:[#allocation5 + $0x1b4] ss:$12 sps:$4 sm:$0xff]   ;;  %v9985_v51 = vmov 0   ;;  %v9129_v52 = vld [vmem:[#allocation5 + $0x1b0] ss:$12 sps:$4 sm:$0xff]  }
 0x1eb   :  { %2498 = vmatpush1.bf16.msra.mxu0 %v9066_v53  ;;  %8184 = vmatpush3.bf16.msra.mxu1 %v9100_v54  ;;  %v9132_v53 = vld [vmem:[#allocation5 + $0x1b8] ss:$12 sps:$4 sm:$0xff]  }
 0x1ec   :  { %2499 = vmatprep.subr.bf16.mxu0 %v9071_v55  ;;  %8185 = vmatprep.subr.bf16.mxu1 %v9104_v8  ;;  %v9135_v54 = vld [vmem:[#allocation5 + $0x1cc] ss:$12 sps:$4 sm:$0xff]   ;;  %v1181_v55 = vrot.slane %v1168_v30, %v10080_v19  ;;  %v9181_v30 = vld [vmem:[#allocation5 + $0x248] ss:$12 sps:$4 sm:$0xff]  }
 0x1ef   :  { %2500 = vmatpush1.bf16.msra.mxu0 %v9069_v56  ;;  %8186 = vmatpush3.bf16.msra.mxu1 %v9105_v14  ;;  %v9133_v56 = vld [vmem:[#allocation5 + $0x1c8] ss:$12 sps:$4 sm:$0xff]  }
 0x1f0   :  { %2501 = vmatprep.subr.bf16.mxu0 %v9074_v57  ;;  %8187 = vmatprep.subr.bf16.mxu1 %v9109_v16  ;;  %v9136_v57 = vld [vmem:[#allocation5 + $0x1d0] ss:$12 sps:$4 sm:$0xff]   ;;  %v9156_v16 = vld [vmem:[#allocation5 + $0x258] ss:$12 sps:$4 sm:$0xff]  }
 0x1f3   :  { %2502 = vmatpush1.bf16.msra.mxu0 %v9072_v58  ;;  %8188 = vmatpush3.bf16.msra.mxu1 %v9110_v20  ;;  %v9139_v58 = vld [vmem:[#allocation5 + $0x1e4] ss:$12 sps:$4 sm:$0xff]  }
 0x1f4   :  { %2503 = vmatprep.subr.bf16.mxu0 %v9077_v59  ;;  %8189 = vmatprep.subr.bf16.mxu1 %v9114_v22  ;;  %v9159_v20 = vld [vmem:[#allocation5 + $0x270] ss:$12 sps:$4 sm:$0xff]   ;;  %v9162_v22 = vld [vmem:[#allocation5 + $0x288] ss:$12 sps:$4 sm:$0xff]  }
 0x1f7   :  { %2504 = vmatpush1.bf16.msra.mxu0 %v9075_v60  ;;  %8190 = vmatpush3.bf16.msra.mxu1 %v9115_v24  ;;  %v9137_v60 = vld [vmem:[#allocation5 + $0x1e0] ss:$12 sps:$4 sm:$0xff]  }
 0x1f8   :  { %2505 = vmatprep.subr.bf16.mxu0 %v9080_v61  ;;  %8191 = vmatprep.subr.bf16.mxu1 %v9119_v26  ;;  %v9140_v61 = vld [vmem:[#allocation5 + $0x1e8] ss:$12 sps:$4 sm:$0xff]   ;;  %v9165_v24 = vld [vmem:[#allocation5 + $0x2a0] ss:$12 sps:$4 sm:$0xff]  }
 0x1f9   :  { %v9170_v26 = vld [vmem:[#allocation5 + $0x2bc] ss:$12 sps:$4 sm:$0xff]  }
 0x1fb   :  { %2506 = vmatpush1.bf16.msra.mxu0 %v9078_v62  ;;  %8192 = vmatpush3.bf16.msra.mxu1 %v9120_v9  ;;  %v9143_v62 = vld [vmem:[#allocation5 + $0x1fc] ss:$12 sps:$4 sm:$0xff]  }
 0x1fc   :  { %2507 = vmatprep.subr.bf16.mxu0 %v9083_v63  ;;  %8425 = vmatprep.subr.bf16.mxu1 %v9984_v29  ;;  %v9141_v63 = vld [vmem:[#allocation5 + $0x1f8] ss:$12 sps:$4 sm:$0xff]   ;;  %v9180_v9 = vld [vmem:[#allocation5 + $0x308] ss:$12 sps:$4 sm:$0xff]  }
 0x1ff   :  { %2508 = vmatpush1.bf16.msra.mxu0 %v9081_v0  ;;  %v9144_v0 = vld [vmem:[#allocation5 + $0x200] ss:$12 sps:$4 sm:$0xff]  }
 0x200   :  { %2509 = vmatprep.subr.bf16.mxu0 %v9088_v1  ;;  %v9147_v1 = vld [vmem:[#allocation5 + $0x214] ss:$12 sps:$4 sm:$0xff]  }
 0x203   :  { %2510 = vmatpush1.bf16.msra.mxu0 %v9086_v2  ;;  %v9145_v2 = vld [vmem:[#allocation5 + $0x210] ss:$12 sps:$4 sm:$0xff]  }
 0x204   :  { %2511 = vmatprep.subr.bf16.mxu0 %v9093_v3  ;;  %v9148_v3 = vld [vmem:[#allocation5 + $0x218] ss:$12 sps:$4 sm:$0xff]  }
 0x207   :  { %2512 = vmatpush1.bf16.msra.mxu0 %v9091_v4  ;;  %v9151_v4 = vld [vmem:[#allocation5 + $0x22c] ss:$12 sps:$4 sm:$0xff]  }
 0x208   :  { %2513 = vmatprep.subr.bf16.mxu0 %v9098_v5  ;;  %v9149_v5 = vld [vmem:[#allocation5 + $0x228] ss:$12 sps:$4 sm:$0xff]  }
 0x20b   :  { %2514 = vmatpush1.bf16.msra.mxu0 %v9096_v6  ;;  %v9152_v6 = vld [vmem:[#allocation5 + $0x230] ss:$12 sps:$4 sm:$0xff]  }
 0x20c   :  { %2515 = vmatprep.subr.bf16.mxu0 %v9103_v7  ;;  %v9155_v7 = vld [vmem:[#allocation5 + $0x244] ss:$12 sps:$4 sm:$0xff]  }
 0x20f   :  { %2516 = vmatpush1.bf16.msra.mxu0 %v9101_v13  ;;  %v9153_v13 = vld [vmem:[#allocation5 + $0x240] ss:$12 sps:$4 sm:$0xff]  }
 0x210   :  { %2517 = vmatprep.subr.bf16.mxu0 %v9108_v15  ;;  %v9158_v15 = vld [vmem:[#allocation5 + $0x25c] ss:$12 sps:$4 sm:$0xff]  }
 0x213   :  { %2518 = vmatpush1.bf16.msra.mxu0 %v9106_v17  ;;  %v9161_v17 = vld [vmem:[#allocation5 + $0x274] ss:$12 sps:$4 sm:$0xff]  }
 0x214   :  { %2519 = vmatprep.subr.bf16.mxu0 %v9113_v21  ;;  %v9164_v21 = vld [vmem:[#allocation5 + $0x28c] ss:$12 sps:$4 sm:$0xff]  }
 0x217   :  { %2520 = vmatpush1.bf16.msra.mxu0 %v9111_v23  ;;  %v9167_v23 = vld [vmem:[#allocation5 + $0x2a4] ss:$12 sps:$4 sm:$0xff]  }
 0x218   :  { %2521 = vmatprep.subr.bf16.mxu0 %v9118_v25  ;;  %v9168_v25 = vld [vmem:[#allocation5 + $0x2b8] ss:$12 sps:$4 sm:$0xff]  }
 0x21b   :  { %2522 = vmatpush1.bf16.msra.mxu0 %v9116_v27  ;;  %v9173_v27 = vld [vmem:[#allocation5 + $0x2d4] ss:$12 sps:$4 sm:$0xff]  }
 0x21c   :  { %2532 = vmatprep.subr.bf16.mxu0 %v9123_v28  ;;  %v9171_v28 = vld [vmem:[#allocation5 + $0x2d0] ss:$12 sps:$4 sm:$0xff]  }
 0x2b1   :  { %v1900_v11 = vpop.f32.mrb[4].mxu0  ;;  %v1981_v33 = vpop.f32.mrb[4].mxu1 }
 0x2b2   :  { %v8589_v34 = vadd.f32 %v1900_v11, %v1173_v31  ;;  %v1902_v35 = vpop.f32.mrb[5].mxu0  ;;  %v1983_v18 = vpop.f32.mrb[5].mxu1  ;;  %v8591_v59 = vadd.f32 %v1981_v33, %v1181_v55  ;;  %v9176_v31 = vld [vmem:[#allocation5 + $0x2ec] ss:$12 sps:$4 sm:$0xff]  }
 0x2b3   :  { %v8590_v36 = vadd.f32 %v1902_v35, %v1177_v32  ;;  %v1904_v37 = vpop.f32.mrb[6].mxu0  ;;  %v1984_v38 = vpop.f32.mrb[6].mxu1  ;;  %v9185_v32 = vld [vmem:[#allocation5 + $0x320] ss:$12 sps:$4 sm:$0xff]   ;;  %v9190_v33 = vld [vmem:[#allocation5 + $0x338] ss:$12 sps:$4 sm:$0xff]  }
 0x2b4   :  { %v1905_v39 = vpop.f32.mrb[7].mxu0  ;;  %v1985_v40 = vpop.f32.mrb[7].mxu1  ;;  %9833 = vtanh.f32 %v8589_v34  ;;  %v9186_v11 = vld [vmem:[#allocation5 + $0x260] ss:$12 sps:$4 sm:$0xff]   ;;  %v9174_v34 = vld [vmem:[#allocation5 + $0x2e8] ss:$12 sps:$4 sm:$0xff]  }
 0x2b5   :  { %9835 = vtanh.f32 %v8590_v36  ;;  %v9179_v35 = vld [vmem:[#allocation5 + $0x304] ss:$12 sps:$4 sm:$0xff]   ;;  %v9177_v37 = vld [vmem:[#allocation5 + $0x300] ss:$12 sps:$4 sm:$0xff]   ;;  %v9184_v38 = vld [vmem:[#allocation5 + $0x31c] ss:$12 sps:$4 sm:$0xff]  }
 0x2b6   :  { %9837 = vtanh.f32 %v8591_v59  ;;  %v9191_v18 = vld [vmem:[#allocation5 + $0x278] ss:$12 sps:$4 sm:$0xff]   ;;  %v9195_v36 = vld [vmem:[#allocation5 + $0x350] ss:$12 sps:$4 sm:$0xff]  }
 0x2b7   :  { %v9196_v39 = vld [vmem:[#allocation5 + $0x290] ss:$12 sps:$4 sm:$0xff]   ;;  %v9182_v40 = vld [vmem:[#allocation5 + $0x318] ss:$12 sps:$4 sm:$0xff]  }
 0x2b8   :  { %v9210_v55 = vld [vmem:[#allocation5 + $0x398] ss:$12 sps:$4 sm:$0xff]   ;;  %v9215_v59 = vld [vmem:[#allocation5 + $0x3b0] ss:$12 sps:$4 sm:$0xff]  }
 0x2be   :  { %v9834_v41 = vpop.eup %9833 }
 0x2bf   :  { %v9836_v42 = vpop.eup %9835  ;;  %v1990_v46 = vpack.c.bf16 %v9834_v41, %v9834_v41  ;;  %v9189_v41 = vld [vmem:[#allocation5 + $0x334] ss:$12 sps:$4 sm:$0xff]  }
 0x2c0   :  { %v1991_v43 = vpack.c.bf16 %v9836_v42, %v9836_v42  ;;  %v9838_v8 = vpop.eup %9837  ;;  %v9187_v42 = vld [vmem:[#allocation5 + $0x330] ss:$12 sps:$4 sm:$0xff]  }
 0x2c1   :  { %v1992_v14 = vpack.c.bf16 %v9838_v8, %v9838_v8 }
 0x2c2   :  { %2523 = vmatprep.mubr.bf16.mxu0 %v1991_v43  ;;  %2605 = vmatprep.mubr.bf16.mxu1 %v1991_v43  ;;  %v9194_v43 = vld [vmem:[#allocation5 + $0x34c] ss:$12 sps:$4 sm:$0xff]  }
 0x2c3   :  { %2524 = vmatmul.mubr.bf16.vlgmr.msra.gmra.mrb[8].mxu0 %v1990_v46  ;;  %2606 = vmatmul.mubr.bf16.vlgmr.msra.gmra.mrb[8].mxu1 %v1990_v46  ;;  %v9200_v46 = vld [vmem:[#allocation5 + $0x368] ss:$12 sps:$4 sm:$0xff]  }
 0x2c4   :  { %2533 = vmatpush1.bf16.msra.mxu0 %v9121_v44  ;;  %8426 = vmatpush3.bf16.msra.mxu1 %v9124_v45  ;;  %v9192_v44 = vld [vmem:[#allocation5 + $0x348] ss:$12 sps:$4 sm:$0xff]   ;;  %v9199_v45 = vld [vmem:[#allocation5 + $0x364] ss:$12 sps:$4 sm:$0xff]  }
 0x2c5   :  { %2534 = vmatprep.subr.bf16.mxu0 %v9127_v47  ;;  %8427 = vmatprep.subr.bf16.mxu1 %v9984_v29  ;;  %v9197_v47 = vld [vmem:[#allocation5 + $0x360] ss:$12 sps:$4 sm:$0xff]  }
 0x2c6   :  { %2564 = vmatprep.mubr.bf16.mxu0 %v9985_v51  ;;  %8441 = vmatprep.mubr.msk.bf16.mxu1 %vm9986_vm0, %v9984_v29 }
 0x2c8   :  { %2535 = vmatpush1.bf16.msra.mxu0 %v9125_v48  ;;  %8428 = vmatpush3.bf16.msra.mxu1 %v9128_v49  ;;  %v9201_v48 = vld [vmem:[#allocation5 + $0x2a8] ss:$12 sps:$4 sm:$0xff]  }
 0x2c9   :  { %2536 = vmatprep.subr.bf16.mxu0 %v9131_v50  ;;  %8429 = vmatprep.subr.bf16.mxu1 %v9984_v29  ;;  %v9204_v49 = vld [vmem:[#allocation5 + $0x37c] ss:$12 sps:$4 sm:$0xff]   ;;  %v9205_v50 = vld [vmem:[#allocation5 + $0x380] ss:$12 sps:$4 sm:$0xff]  }
 0x2cc   :  { %2537 = vmatpush1.bf16.msra.mxu0 %v9129_v52  ;;  %8430 = vmatpush3.bf16.msra.mxu1 %v9132_v53  ;;  %v9202_v52 = vld [vmem:[#allocation5 + $0x378] ss:$12 sps:$4 sm:$0xff]   ;;  %v9206_v53 = vld [vmem:[#allocation5 + $0x2c0] ss:$12 sps:$4 sm:$0xff]  }
 0x2cd   :  { %2538 = vmatprep.subr.bf16.mxu0 %v9135_v54  ;;  %8431 = vmatprep.subr.bf16.mxu1 %v9984_v29  ;;  %v9209_v54 = vld [vmem:[#allocation5 + $0x394] ss:$12 sps:$4 sm:$0xff]  }
 0x2d0   :  { %2539 = vmatpush1.bf16.msra.mxu0 %v9133_v56  ;;  %8432 = vmatpush3.bf16.msra.mxu1 %v9136_v57  ;;  %v9207_v56 = vld [vmem:[#allocation5 + $0x390] ss:$12 sps:$4 sm:$0xff]   ;;  %v9211_v57 = vld [vmem:[#allocation5 + $0x2d8] ss:$12 sps:$4 sm:$0xff]  }
 0x2d1   :  { %2540 = vmatprep.subr.bf16.mxu0 %v9139_v58  ;;  %8433 = vmatprep.subr.bf16.mxu1 %v9984_v29  ;;  %v9214_v58 = vld [vmem:[#allocation5 + $0x3ac] ss:$12 sps:$4 sm:$0xff]  }
 0x2d4   :  { %2541 = vmatpush1.bf16.msra.mxu0 %v9137_v60  ;;  %8434 = vmatpush3.bf16.msra.mxu1 %v9140_v61  ;;  %v9212_v60 = vld [vmem:[#allocation5 + $0x3a8] ss:$12 sps:$4 sm:$0xff]   ;;  %v9216_v61 = vld [vmem:[#allocation5 + $0x2f0] ss:$12 sps:$4 sm:$0xff]  }
 0x2d5   :  { %2542 = vmatprep.subr.bf16.mxu0 %v9143_v62  ;;  %8435 = vmatprep.subr.bf16.mxu1 %v9984_v29  ;;  %v9219_v62 = vld [vmem:[#allocation5 + $0x3c4] ss:$12 sps:$4 sm:$0xff]  }
 0x2d8   :  { %2543 = vmatpush1.bf16.msra.mxu0 %v9141_v63  ;;  %8436 = vmatpush3.bf16.msra.mxu1 %v9144_v0 }
 0x2d9   :  { %2544 = vmatprep.subr.bf16.mxu0 %v9147_v1  ;;  %8437 = vmatprep.subr.bf16.mxu1 %v9984_v29 }
 0x2dc   :  { %2545 = vmatpush1.bf16.msra.mxu0 %v9145_v2  ;;  %8438 = vmatpush3.bf16.msra.mxu1 %v9148_v3 }
 0x2dd   :  { %2546 = vmatprep.subr.bf16.mxu0 %v9151_v4  ;;  %8439 = vmatprep.subr.bf16.mxu1 %v9984_v29  ;;  %v2090_v4 = vld [vmem:[#allocation7 + $0x2] ss:$8 sm:$0x7] }
 0x2e0   :  { %2547 = vmatpush1.bf16.msra.mxu0 %v9149_v5  ;;  %8440 = vmatpush3.bf16.msra.mxu1 %v9152_v6  ;;  %v2103_v5 = vrot.slane %v2090_v4, %v10080_v19  ;;  %v2095_v6 = vrot.slane %v2090_v4, %v10064_v10 }
 0x2e1   :  { %3158 = vmatprep.subr.bf16.mxu1 %v9155_v7  ;;  %8208 = vmatprep.subr.bf16.mxu0 %v9180_v9  ;;  %v2099_v7 = vrot.slane %v2090_v4, %v10069_v12  ;;  %v9267_v4 = vld [vmem:[#allocation5 + $0x510] ss:$12 sps:$4 sm:$0xff]  }
 0x2e3   :  { %2565 = vmatmul.mubr.bf16.vlgmr.msra.gmra.mrb[8].mxu0 %v1992_v14  ;;  %8442 = vmatmul.mubr.bf16.vlgmr.msra.gmra.mrb[12].mxu1 %v1992_v14 }
 0x2e4   :  { %3159 = vmatpush1.bf16.msra.mxu1 %v9153_v13  ;;  %8209 = vmatpush3.bf16.msra.mxu0 %v9181_v30  ;;  %v9220_v30 = vld [vmem:[#allocation5 + $0x3c8] ss:$12 sps:$4 sm:$0xff]  }
 0x2e5   :  { %3160 = vmatprep.subr.bf16.mxu1 %v9158_v15  ;;  %8210 = vmatprep.subr.bf16.mxu0 %v9185_v32  ;;  %v9223_v32 = vld [vmem:[#allocation5 + $0x3dc] ss:$12 sps:$4 sm:$0xff]  }
 0x2e8   :  { %3161 = vmatpush1.bf16.msra.mxu1 %v9156_v16  ;;  %8211 = vmatpush3.bf16.msra.mxu0 %v9186_v11  ;;  %v9221_v11 = vld [vmem:[#allocation5 + $0x3d8] ss:$12 sps:$4 sm:$0xff]  }
 0x2e9   :  { %3162 = vmatprep.subr.bf16.mxu1 %v9161_v17  ;;  %8212 = vmatprep.subr.bf16.mxu0 %v9190_v33  ;;  %v9224_v33 = vld [vmem:[#allocation5 + $0x3e0] ss:$12 sps:$4 sm:$0xff]  }
 0x2ec   :  { %3163 = vmatpush1.bf16.msra.mxu1 %v9159_v20  ;;  %8213 = vmatpush3.bf16.msra.mxu0 %v9191_v18  ;;  %v9228_v18 = vld [vmem:[#allocation5 + $0x3f8] ss:$12 sps:$4 sm:$0xff]  }
 0x2ed   :  { %3164 = vmatprep.subr.bf16.mxu1 %v9164_v21  ;;  %8214 = vmatprep.subr.bf16.mxu0 %v9195_v36  ;;  %v9231_v36 = vld [vmem:[#allocation5 + $0x40c] ss:$12 sps:$4 sm:$0xff]  }
 0x2f0   :  { %3165 = vmatpush1.bf16.msra.mxu1 %v9162_v22  ;;  %8215 = vmatpush3.bf16.msra.mxu0 %v9196_v39  ;;  %v9235_v39 = vld [vmem:[#allocation5 + $0x424] ss:$12 sps:$4 sm:$0xff]  }
 0x2f1   :  { %3166 = vmatprep.subr.bf16.mxu1 %v9167_v23  ;;  %8216 = vmatprep.subr.bf16.mxu0 %v9200_v46  ;;  %v9241_v46 = vld [vmem:[#allocation5 + $0x450] ss:$12 sps:$4 sm:$0xff]  }
 0x2f4   :  { %3167 = vmatpush1.bf16.msra.mxu1 %v9165_v24  ;;  %8217 = vmatpush3.bf16.msra.mxu0 %v9201_v48  ;;  %v9247_v48 = vld [vmem:[#allocation5 + $0x46c] ss:$12 sps:$4 sm:$0xff]  }
 0x2f5   :  { %3168 = vmatprep.subr.bf16.mxu1 %v9170_v26  ;;  %8218 = vmatprep.subr.bf16.mxu0 %v9205_v50  ;;  %v9248_v50 = vld [vmem:[#allocation5 + $0x470] ss:$12 sps:$4 sm:$0xff]  }
 0x2f8   :  { %3169 = vmatpush1.bf16.msra.mxu1 %v9168_v25  ;;  %8219 = vmatpush3.bf16.msra.mxu0 %v9206_v53 }
 0x2f9   :  { %3170 = vmatprep.subr.bf16.mxu1 %v9173_v27  ;;  %8220 = vmatprep.subr.bf16.mxu0 %v9210_v55 }
 0x2fc   :  { %3171 = vmatpush1.bf16.msra.mxu1 %v9171_v28  ;;  %8221 = vmatpush3.bf16.msra.mxu0 %v9211_v57  ;;  %v9217_v28 = vld [vmem:[#allocation5 + $0x3c0] ss:$12 sps:$4 sm:$0xff]   ;;  %v9252_v57 = vld [vmem:[#allocation5 + $0x498] ss:$12 sps:$4 sm:$0xff]  }
 0x2fd   :  { %3172 = vmatprep.subr.bf16.mxu1 %v9176_v31  ;;  %8222 = vmatprep.subr.bf16.mxu0 %v9215_v59  ;;  %v9255_v59 = vld [vmem:[#allocation5 + $0x4b0] ss:$12 sps:$4 sm:$0xff]  }
 0x300   :  { %3173 = vmatpush1.bf16.msra.mxu1 %v9174_v34  ;;  %8223 = vmatpush3.bf16.msra.mxu0 %v9216_v61  ;;  %v9227_v34 = vld [vmem:[#allocation5 + $0x3f4] ss:$12 sps:$4 sm:$0xff]  }
 0x301   :  { %3174 = vmatprep.subr.bf16.mxu1 %v9179_v35  ;;  %8445 = vmatprep.subr.bf16.mxu0 %v9984_v29  ;;  %v9225_v35 = vld [vmem:[#allocation5 + $0x3f0] ss:$12 sps:$4 sm:$0xff]   ;;  %v9258_v61 = vld [vmem:[#allocation5 + $0x4c8] ss:$12 sps:$4 sm:$0xff]  }
 0x304   :  { %3175 = vmatpush1.bf16.msra.mxu1 %v9177_v37  ;;  %v9229_v37 = vld [vmem:[#allocation5 + $0x408] ss:$12 sps:$4 sm:$0xff]  }
 0x305   :  { %3176 = vmatprep.subr.bf16.mxu1 %v9184_v38  ;;  %v9232_v38 = vld [vmem:[#allocation5 + $0x410] ss:$12 sps:$4 sm:$0xff]  }
 0x308   :  { %3177 = vmatpush1.bf16.msra.mxu1 %v9182_v40  ;;  %v9233_v40 = vld [vmem:[#allocation5 + $0x420] ss:$12 sps:$4 sm:$0xff]  }
 0x309   :  { %3178 = vmatprep.subr.bf16.mxu1 %v9189_v41  ;;  %v9236_v41 = vld [vmem:[#allocation5 + $0x428] ss:$12 sps:$4 sm:$0xff]  }
 0x30c   :  { %3179 = vmatpush1.bf16.msra.mxu1 %v9187_v42  ;;  %v9239_v42 = vld [vmem:[#allocation5 + $0x43c] ss:$12 sps:$4 sm:$0xff]  }
 0x30d   :  { %3180 = vmatprep.subr.bf16.mxu1 %v9194_v43  ;;  %v9237_v43 = vld [vmem:[#allocation5 + $0x438] ss:$12 sps:$4 sm:$0xff]  }
 0x310   :  { %3181 = vmatpush1.bf16.msra.mxu1 %v9192_v44  ;;  %v9240_v44 = vld [vmem:[#allocation5 + $0x440] ss:$12 sps:$4 sm:$0xff]  }
 0x311   :  { %3182 = vmatprep.subr.bf16.mxu1 %v9199_v45  ;;  %v9243_v45 = vld [vmem:[#allocation5 + $0x454] ss:$12 sps:$4 sm:$0xff]  }
 0x314   :  { %3183 = vmatpush1.bf16.msra.mxu1 %v9197_v47  ;;  %v9244_v47 = vld [vmem:[#allocation5 + $0x458] ss:$12 sps:$4 sm:$0xff]  }
 0x315   :  { %3184 = vmatprep.subr.bf16.mxu1 %v9204_v49  ;;  %v9245_v49 = vld [vmem:[#allocation5 + $0x468] ss:$12 sps:$4 sm:$0xff]  }
 0x318   :  { %3185 = vmatpush1.bf16.msra.mxu1 %v9202_v52  ;;  %v9251_v52 = vld [vmem:[#allocation5 + $0x484] ss:$12 sps:$4 sm:$0xff]  }
 0x319   :  { %3186 = vmatprep.subr.bf16.mxu1 %v9209_v54  ;;  %v9249_v54 = vld [vmem:[#allocation5 + $0x480] ss:$12 sps:$4 sm:$0xff]  }
 0x31c   :  { %3187 = vmatpush1.bf16.msra.mxu1 %v9207_v56  ;;  %v9254_v56 = vld [vmem:[#allocation5 + $0x49c] ss:$12 sps:$4 sm:$0xff]  }
 0x31d   :  { %3188 = vmatprep.subr.bf16.mxu1 %v9214_v58  ;;  %v9257_v58 = vld [vmem:[#allocation5 + $0x4b4] ss:$12 sps:$4 sm:$0xff]  }
 0x320   :  { %3189 = vmatpush1.bf16.msra.mxu1 %v9212_v60  ;;  %v9260_v60 = vld [vmem:[#allocation5 + $0x4cc] ss:$12 sps:$4 sm:$0xff]  }
 0x321   :  { %3199 = vmatprep.subr.bf16.mxu1 %v9219_v62  ;;  %v9263_v62 = vld [vmem:[#allocation5 + $0x4e4] ss:$12 sps:$4 sm:$0xff]  }
 0x396   :  { %v8193_v63 = vpop.f32.mrb[8].mxu1 }
 0x397   :  { %v8194_v0 = vpop.f32.mrb[9].mxu1 }
 0x398   :  { %v8195_v1 = vadd.f32 %v8194_v0, %v8193_v63  ;;  %v8196_v2 = vpop.f32.mrb[10].mxu1  ;;  %v9261_v63 = vld [vmem:[#allocation5 + $0x4e0] ss:$12 sps:$4 sm:$0xff]   ;;  %v9264_v0 = vld [vmem:[#allocation5 + $0x4f8] ss:$12 sps:$4 sm:$0xff]  }
 0x399   :  { %v8197_v3 = vpop.f32.mrb[11].mxu1  ;;  %v9269_v2 = vld [vmem:[#allocation5 + $0x514] ss:$12 sps:$4 sm:$0xff]  }
 0x39a   :  { %v2608_v8 = vadd.f32 %v8195_v1, %v2103_v5  ;;  %v9266_v1 = vld [vmem:[#allocation5 + $0x4fc] ss:$12 sps:$4 sm:$0xff]  }
 0x39b   :  { %v9276_v3 = vld [vmem:[#allocation5 + $0x548] ss:$12 sps:$4 sm:$0xff]  }
 0x39c   :  { %v9277_v5 = vld [vmem:[#allocation5 + $0x488] ss:$12 sps:$4 sm:$0xff]  }
 0x3b6   :  { %v2566_v13 = vpop.f32.mrb[8].mxu0  ;;  %v2647_v14 = vpop.f32.mrb[12].mxu1 }
 0x3b7   :  { %v8592_v15 = vadd.f32 %v2566_v13, %v2095_v6  ;;  %v2648_v16 = vadd.f32 %v2647_v14, %v2608_v8  ;;  %v2568_v17 = vpop.f32.mrb[9].mxu0  ;;  %v8443_v20 = vpop.f32.mrb[13].mxu1  ;;  %v9272_v6 = vld [vmem:[#allocation5 + $0x52c] ss:$12 sps:$4 sm:$0xff]   ;;  %v9270_v14 = vld [vmem:[#allocation5 + $0x528] ss:$12 sps:$4 sm:$0xff]  }
 0x3b8   :  { %v8593_v21 = vadd.f32 %v2568_v17, %v2099_v7  ;;  %v2570_v22 = vpop.f32.mrb[10].mxu0  ;;  %v2650_v23 = vpop.f32.mrb[14].mxu1  ;;  %v9281_v7 = vld [vmem:[#allocation5 + $0x560] ss:$12 sps:$4 sm:$0xff]   ;;  %v9286_v13 = vld [vmem:[#allocation5 + $0x578] ss:$12 sps:$4 sm:$0xff]  }
 0x3b9   :  { %v2571_v24 = vpop.f32.mrb[11].mxu0  ;;  %v8444_v25 = vpop.f32.mrb[15].mxu1  ;;  %9839 = vtanh.f32 %v8592_v15  ;;  %v9282_v8 = vld [vmem:[#allocation5 + $0x4a0] ss:$12 sps:$4 sm:$0xff]   ;;  %v9275_v15 = vld [vmem:[#allocation5 + $0x544] ss:$12 sps:$4 sm:$0xff]  }
 0x3ba   :  { %9841 = vtanh.f32 %v8593_v21  ;;  %v9291_v17 = vld [vmem:[#allocation5 + $0x590] ss:$12 sps:$4 sm:$0xff]   ;;  %v9273_v20 = vld [vmem:[#allocation5 + $0x540] ss:$12 sps:$4 sm:$0xff]   ;;  %v9278_v23 = vld [vmem:[#allocation5 + $0x558] ss:$12 sps:$4 sm:$0xff]  }
 0x3bb   :  { %9843 = vtanh.f32 %v2648_v16  ;;  %v9287_v16 = vld [vmem:[#allocation5 + $0x4b8] ss:$12 sps:$4 sm:$0xff]   ;;  %v9280_v21 = vld [vmem:[#allocation5 + $0x55c] ss:$12 sps:$4 sm:$0xff]   ;;  %v9285_v24 = vld [vmem:[#allocation5 + $0x574] ss:$12 sps:$4 sm:$0xff]  }
 0x3bc   :  { %v9292_v22 = vld [vmem:[#allocation5 + $0x4d0] ss:$12 sps:$4 sm:$0xff]  }
 0x3bd   :  { %v9283_v25 = vld [vmem:[#allocation5 + $0x570] ss:$12 sps:$4 sm:$0xff]  }
 0x3c3   :  { %v9840_v26 = vpop.eup %9839 }
 0x3c4   :  { %v9842_v27 = vpop.eup %9841  ;;  %v2656_v31 = vpack.c.bf16 %v9840_v26, %v9840_v26  ;;  %v9290_v26 = vld [vmem:[#allocation5 + $0x58c] ss:$12 sps:$4 sm:$0xff]  }
 0x3c5   :  { %v2657_v9 = vpack.c.bf16 %v9842_v27, %v9842_v27  ;;  %v9844_v53 = vpop.eup %9843  ;;  %v9288_v27 = vld [vmem:[#allocation5 + $0x588] ss:$12 sps:$4 sm:$0xff]  }
 0x3c6   :  { %v2658_v55 = vpack.c.bf16 %v9844_v53, %v9844_v53 }
 0x3c7   :  { %3190 = vmatprep.mubr.bf16.mxu1 %v2657_v9  ;;  %3272 = vmatprep.mubr.bf16.mxu0 %v2657_v9  ;;  %v9295_v9 = vld [vmem:[#allocation5 + $0x5a4] ss:$12 sps:$4 sm:$0xff]  }
 0x3c8   :  { %3191 = vmatmul.mubr.bf16.vlgmr.msra.gmra.mrb[16].mxu1 %v2656_v31  ;;  %3273 = vmatmul.mubr.bf16.vlgmr.msra.gmra.mrb[12].mxu0 %v2656_v31  ;;  %v9297_v31 = vld [vmem:[#allocation5 + $0x4e8] ss:$12 sps:$4 sm:$0xff]  }
 0x3c9   :  { %3200 = vmatpush1.bf16.msra.mxu1 %v9217_v28  ;;  %8446 = vmatpush3.bf16.msra.mxu0 %v9220_v30  ;;  %v9296_v28 = vld [vmem:[#allocation5 + $0x5a8] ss:$12 sps:$4 sm:$0xff]   ;;  %v9293_v30 = vld [vmem:[#allocation5 + $0x5a0] ss:$12 sps:$4 sm:$0xff]  }
 0x3ca   :  { %3201 = vmatprep.subr.bf16.mxu1 %v9223_v32  ;;  %8447 = vmatprep.subr.bf16.mxu0 %v9984_v29  ;;  %v9300_v32 = vld [vmem:[#allocation5 + $0x5bc] ss:$12 sps:$4 sm:$0xff]  }
 0x3cb   :  { %3231 = vmatprep.mubr.bf16.mxu1 %v9985_v51  ;;  %8461 = vmatprep.mubr.msk.bf16.mxu0 %vm9986_vm0, %v9984_v29 }
 0x3cd   :  { %3202 = vmatpush1.bf16.msra.mxu1 %v9221_v11  ;;  %8448 = vmatpush3.bf16.msra.mxu0 %v9224_v33  ;;  %v9301_v11 = vld [vmem:[#allocation5 + $0x5c0] ss:$12 sps:$4 sm:$0xff]   ;;  %v9298_v33 = vld [vmem:[#allocation5 + $0x5b8] ss:$12 sps:$4 sm:$0xff]  }
 0x3ce   :  { %3203 = vmatprep.subr.bf16.mxu1 %v9227_v34  ;;  %8449 = vmatprep.subr.bf16.mxu0 %v9984_v29  ;;  %v9302_v34 = vld [vmem:[#allocation5 + $0x500] ss:$12 sps:$4 sm:$0xff]  }
 0x3d1   :  { %3204 = vmatpush1.bf16.msra.mxu1 %v9225_v35  ;;  %8450 = vmatpush3.bf16.msra.mxu0 %v9228_v18  ;;  %v9305_v35 = vld [vmem:[#allocation5 + $0x5d4] ss:$12 sps:$4 sm:$0xff]   ;;  %v9306_v18 = vld [vmem:[#allocation5 + $0x5d8] ss:$12 sps:$4 sm:$0xff]  }
 0x3d2   :  { %3205 = vmatprep.subr.bf16.mxu1 %v9231_v36  ;;  %8451 = vmatprep.subr.bf16.mxu0 %v9984_v29  ;;  %v9303_v36 = vld [vmem:[#allocation5 + $0x5d0] ss:$12 sps:$4 sm:$0xff]  }
 0x3d5   :  { %3206 = vmatpush1.bf16.msra.mxu1 %v9229_v37  ;;  %8452 = vmatpush3.bf16.msra.mxu0 %v9232_v38  ;;  %v9307_v37 = vld [vmem:[#allocation5 + $0x518] ss:$12 sps:$4 sm:$0xff]  }
 0x3d6   :  { %3207 = vmatprep.subr.bf16.mxu1 %v9235_v39  ;;  %8453 = vmatprep.subr.bf16.mxu0 %v9984_v29  ;;  %v9310_v38 = vld [vmem:[#allocation5 + $0x5ec] ss:$12 sps:$4 sm:$0xff]   ;;  %v9311_v39 = vld [vmem:[#allocation5 + $0x5f0] ss:$12 sps:$4 sm:$0xff]  }
 0x3d9   :  { %3208 = vmatpush1.bf16.msra.mxu1 %v9233_v40  ;;  %8454 = vmatpush3.bf16.msra.mxu0 %v9236_v41  ;;  %v9308_v40 = vld [vmem:[#allocation5 + $0x5e8] ss:$12 sps:$4 sm:$0xff]   ;;  %v9312_v41 = vld [vmem:[#allocation5 + $0x530] ss:$12 sps:$4 sm:$0xff]  }
 0x3da   :  { %3209 = vmatprep.subr.bf16.mxu1 %v9239_v42  ;;  %8455 = vmatprep.subr.bf16.mxu0 %v9984_v29  ;;  %v9315_v42 = vld [vmem:[#allocation5 + $0x604] ss:$12 sps:$4 sm:$0xff]  }
 0x3dd   :  { %3210 = vmatpush1.bf16.msra.mxu1 %v9237_v43  ;;  %8456 = vmatpush3.bf16.msra.mxu0 %v9240_v44 }
 0x3de   :  { %3211 = vmatprep.subr.bf16.mxu1 %v9243_v45  ;;  %8457 = vmatprep.subr.bf16.mxu0 %v9984_v29 }
 0x3e1   :  { %3212 = vmatpush1.bf16.msra.mxu1 %v9241_v46  ;;  %8458 = vmatpush3.bf16.msra.mxu0 %v9244_v47 }
 0x3e2   :  { %3213 = vmatprep.subr.bf16.mxu1 %v9247_v48  ;;  %8459 = vmatprep.subr.bf16.mxu0 %v9984_v29  ;;  %v2757_v48 = vld [vmem:[#allocation7 + $0x3] ss:$8 sm:$0x7] }
 0x3e5   :  { %3214 = vmatpush1.bf16.msra.mxu1 %v9245_v49  ;;  %8460 = vmatpush3.bf16.msra.mxu0 %v9248_v50  ;;  %v2770_v49 = vrot.slane %v2757_v48, %v10080_v19  ;;  %v2762_v50 = vrot.slane %v2757_v48, %v10064_v10 }
 0x3e6   :  { %3825 = vmatprep.subr.bf16.mxu0 %v9251_v52  ;;  %8239 = vmatprep.subr.bf16.mxu1 %v9276_v3  ;;  %v2766_v52 = vrot.slane %v2757_v48, %v10069_v12  ;;  %v9363_v48 = vld [vmem:[#allocation5 + $0x750] ss:$12 sps:$4 sm:$0xff]  }
 0x3e8   :  { %3232 = vmatmul.mubr.bf16.vlgmr.msra.gmra.mrb[16].mxu1 %v2658_v55  ;;  %8462 = vmatmul.mubr.bf16.vlgmr.msra.gmra.mrb[16].mxu0 %v2658_v55 }
 0x3e9   :  { %3826 = vmatpush1.bf16.msra.mxu0 %v9249_v54  ;;  %8240 = vmatpush3.bf16.msra.mxu1 %v9277_v5  ;;  %v9316_v5 = vld [vmem:[#allocation5 + $0x608] ss:$12 sps:$4 sm:$0xff]  }
 0x3ea   :  { %3827 = vmatprep.subr.bf16.mxu0 %v9254_v56  ;;  %8241 = vmatprep.subr.bf16.mxu1 %v9281_v7  ;;  %v9319_v7 = vld [vmem:[#allocation5 + $0x61c] ss:$12 sps:$4 sm:$0xff]  }
 0x3ed   :  { %3828 = vmatpush1.bf16.msra.mxu0 %v9252_v57  ;;  %8242 = vmatpush3.bf16.msra.mxu1 %v9282_v8  ;;  %v9317_v8 = vld [vmem:[#allocation5 + $0x618] ss:$12 sps:$4 sm:$0xff]  }
 0x3ee   :  { %3829 = vmatprep.subr.bf16.mxu0 %v9257_v58  ;;  %8243 = vmatprep.subr.bf16.mxu1 %v9286_v13  ;;  %v9320_v13 = vld [vmem:[#allocation5 + $0x620] ss:$12 sps:$4 sm:$0xff]  }
 0x3f1   :  { %3830 = vmatpush1.bf16.msra.mxu0 %v9255_v59  ;;  %8244 = vmatpush3.bf16.msra.mxu1 %v9287_v16  ;;  %v9324_v16 = vld [vmem:[#allocation5 + $0x638] ss:$12 sps:$4 sm:$0xff]  }
 0x3f2   :  { %3831 = vmatprep.subr.bf16.mxu0 %v9260_v60  ;;  %8245 = vmatprep.subr.bf16.mxu1 %v9291_v17  ;;  %v9327_v17 = vld [vmem:[#allocation5 + $0x64c] ss:$12 sps:$4 sm:$0xff]  }
 0x3f5   :  { %3832 = vmatpush1.bf16.msra.mxu0 %v9258_v61  ;;  %8246 = vmatpush3.bf16.msra.mxu1 %v9292_v22  ;;  %v9331_v22 = vld [vmem:[#allocation5 + $0x664] ss:$12 sps:$4 sm:$0xff]  }
 0x3f6   :  { %3833 = vmatprep.subr.bf16.mxu0 %v9263_v62  ;;  %8247 = vmatprep.subr.bf16.mxu1 %v9296_v28  ;;  %v9337_v28 = vld [vmem:[#allocation5 + $0x690] ss:$12 sps:$4 sm:$0xff]  }
 0x3f9   :  { %3834 = vmatpush1.bf16.msra.mxu0 %v9261_v63  ;;  %8248 = vmatpush3.bf16.msra.mxu1 %v9297_v31  ;;  %v9343_v31 = vld [vmem:[#allocation5 + $0x6ac] ss:$12 sps:$4 sm:$0xff]  }
 0x3fa   :  { %3835 = vmatprep.subr.bf16.mxu0 %v9266_v1  ;;  %8249 = vmatprep.subr.bf16.mxu1 %v9301_v11  ;;  %v9344_v11 = vld [vmem:[#allocation5 + $0x6b0] ss:$12 sps:$4 sm:$0xff]  }
 0x3fd   :  { %3836 = vmatpush1.bf16.msra.mxu0 %v9264_v0  ;;  %8250 = vmatpush3.bf16.msra.mxu1 %v9302_v34 }
 0x3fe   :  { %3837 = vmatprep.subr.bf16.mxu0 %v9269_v2  ;;  %8251 = vmatprep.subr.bf16.mxu1 %v9306_v18 }
 0x401   :  { %3838 = vmatpush1.bf16.msra.mxu0 %v9267_v4  ;;  %8252 = vmatpush3.bf16.msra.mxu1 %v9307_v37  ;;  %v9313_v4 = vld [vmem:[#allocation5 + $0x600] ss:$12 sps:$4 sm:$0xff]   ;;  %v9348_v37 = vld [vmem:[#allocation5 + $0x6d8] ss:$12 sps:$4 sm:$0xff]  }
 0x402   :  { %3839 = vmatprep.subr.bf16.mxu0 %v9272_v6  ;;  %8253 = vmatprep.subr.bf16.mxu1 %v9311_v39  ;;  %v9351_v39 = vld [vmem:[#allocation5 + $0x6f0] ss:$12 sps:$4 sm:$0xff]  }
 0x405   :  { %3840 = vmatpush1.bf16.msra.mxu0 %v9270_v14  ;;  %8254 = vmatpush3.bf16.msra.mxu1 %v9312_v41  ;;  %v9323_v14 = vld [vmem:[#allocation5 + $0x634] ss:$12 sps:$4 sm:$0xff]  }
 0x406   :  { %3841 = vmatprep.subr.bf16.mxu0 %v9275_v15  ;;  %8465 = vmatprep.subr.bf16.mxu1 %v9984_v29  ;;  %v9321_v15 = vld [vmem:[#allocation5 + $0x630] ss:$12 sps:$4 sm:$0xff]   ;;  %v9354_v41 = vld [vmem:[#allocation5 + $0x708] ss:$12 sps:$4 sm:$0xff]  }
 0x409   :  { %3842 = vmatpush1.bf16.msra.mxu0 %v9273_v20  ;;  %v9325_v20 = vld [vmem:[#allocation5 + $0x648] ss:$12 sps:$4 sm:$0xff]  }
 0x40a   :  { %3843 = vmatprep.subr.bf16.mxu0 %v9280_v21  ;;  %v9328_v21 = vld [vmem:[#allocation5 + $0x650] ss:$12 sps:$4 sm:$0xff]  }
 0x40d   :  { %3844 = vmatpush1.bf16.msra.mxu0 %v9278_v23  ;;  %v9329_v23 = vld [vmem:[#allocation5 + $0x660] ss:$12 sps:$4 sm:$0xff]  }
 0x40e   :  { %3845 = vmatprep.subr.bf16.mxu0 %v9285_v24  ;;  %v9332_v24 = vld [vmem:[#allocation5 + $0x668] ss:$12 sps:$4 sm:$0xff]  }
 0x411   :  { %3846 = vmatpush1.bf16.msra.mxu0 %v9283_v25  ;;  %v9335_v25 = vld [vmem:[#allocation5 + $0x67c] ss:$12 sps:$4 sm:$0xff]  }
 0x412   :  { %3847 = vmatprep.subr.bf16.mxu0 %v9290_v26  ;;  %v9333_v26 = vld [vmem:[#allocation5 + $0x678] ss:$12 sps:$4 sm:$0xff]  }
 0x415   :  { %3848 = vmatpush1.bf16.msra.mxu0 %v9288_v27  ;;  %v9336_v27 = vld [vmem:[#allocation5 + $0x680] ss:$12 sps:$4 sm:$0xff]  }
 0x416   :  { %3849 = vmatprep.subr.bf16.mxu0 %v9295_v9  ;;  %v9339_v9 = vld [vmem:[#allocation5 + $0x694] ss:$12 sps:$4 sm:$0xff]  }
 0x419   :  { %3850 = vmatpush1.bf16.msra.mxu0 %v9293_v30  ;;  %v9340_v30 = vld [vmem:[#allocation5 + $0x698] ss:$12 sps:$4 sm:$0xff]  }
 0x41a   :  { %3851 = vmatprep.subr.bf16.mxu0 %v9300_v32  ;;  %v9341_v32 = vld [vmem:[#allocation5 + $0x6a8] ss:$12 sps:$4 sm:$0xff]  }
 0x41d   :  { %3852 = vmatpush1.bf16.msra.mxu0 %v9298_v33  ;;  %v9347_v33 = vld [vmem:[#allocation5 + $0x6c4] ss:$12 sps:$4 sm:$0xff]  }
 0x41e   :  { %3853 = vmatprep.subr.bf16.mxu0 %v9305_v35  ;;  %v9345_v35 = vld [vmem:[#allocation5 + $0x6c0] ss:$12 sps:$4 sm:$0xff]  }
 0x421   :  { %3854 = vmatpush1.bf16.msra.mxu0 %v9303_v36  ;;  %v9350_v36 = vld [vmem:[#allocation5 + $0x6dc] ss:$12 sps:$4 sm:$0xff]  }
 0x422   :  { %3855 = vmatprep.subr.bf16.mxu0 %v9310_v38  ;;  %v9353_v38 = vld [vmem:[#allocation5 + $0x6f4] ss:$12 sps:$4 sm:$0xff]  }
 0x425   :  { %3856 = vmatpush1.bf16.msra.mxu0 %v9308_v40  ;;  %v9356_v40 = vld [vmem:[#allocation5 + $0x70c] ss:$12 sps:$4 sm:$0xff]  }
 0x426   :  { %3866 = vmatprep.subr.bf16.mxu0 %v9315_v42  ;;  %v9359_v42 = vld [vmem:[#allocation5 + $0x724] ss:$12 sps:$4 sm:$0xff]  }
 0x49b   :  { %v8224_v43 = vpop.f32.mrb[12].mxu0 }
 0x49c   :  { %v8225_v44 = vpop.f32.mrb[13].mxu0 }
 0x49d   :  { %v8226_v45 = vadd.f32 %v8225_v44, %v8224_v43  ;;  %v8227_v46 = vpop.f32.mrb[14].mxu0  ;;  %v9357_v43 = vld [vmem:[#allocation5 + $0x720] ss:$12 sps:$4 sm:$0xff]   ;;  %v9360_v44 = vld [vmem:[#allocation5 + $0x738] ss:$12 sps:$4 sm:$0xff]  }
 0x49e   :  { %v8228_v47 = vpop.f32.mrb[15].mxu0  ;;  %v9365_v46 = vld [vmem:[#allocation5 + $0x754] ss:$12 sps:$4 sm:$0xff]  }
 0x49f   :  { %v3275_v53 = vadd.f32 %v8226_v45, %v2770_v49  ;;  %v9362_v45 = vld [vmem:[#allocation5 + $0x73c] ss:$12 sps:$4 sm:$0xff]  }
 0x4a0   :  { %v9372_v47 = vld [vmem:[#allocation5 + $0x788] ss:$12 sps:$4 sm:$0xff]  }
 0x4a1   :  { %v9373_v49 = vld [vmem:[#allocation5 + $0x6c8] ss:$12 sps:$4 sm:$0xff]  }
 0x4bb   :  { %v3233_v54 = vpop.f32.mrb[16].mxu1  ;;  %v3314_v55 = vpop.f32.mrb[16].mxu0 }
 0x4bc   :  { %v8594_v56 = vadd.f32 %v3233_v54, %v2762_v50  ;;  %v3315_v57 = vadd.f32 %v3314_v55, %v3275_v53  ;;  %v3235_v58 = vpop.f32.mrb[17].mxu1  ;;  %v8463_v59 = vpop.f32.mrb[17].mxu0  ;;  %v9368_v50 = vld [vmem:[#allocation5 + $0x76c] ss:$12 sps:$4 sm:$0xff]   ;;  %v9366_v55 = vld [vmem:[#allocation5 + $0x768] ss:$12 sps:$4 sm:$0xff]  }
 0x4bd   :  { %v8595_v60 = vadd.f32 %v3235_v58, %v2766_v52  ;;  %v3237_v61 = vpop.f32.mrb[18].mxu1  ;;  %v3317_v62 = vpop.f32.mrb[18].mxu0  ;;  %v9377_v52 = vld [vmem:[#allocation5 + $0x7a0] ss:$12 sps:$4 sm:$0xff]   ;;  %v9382_v54 = vld [vmem:[#allocation5 + $0x7b8] ss:$12 sps:$4 sm:$0xff]  }
 0x4be   :  { %v3238_v63 = vpop.f32.mrb[19].mxu1  ;;  %v8464_v0 = vpop.f32.mrb[19].mxu0  ;;  %9845 = vtanh.f32 %v8594_v56  ;;  %v9378_v53 = vld [vmem:[#allocation5 + $0x6e0] ss:$12 sps:$4 sm:$0xff]   ;;  %v9371_v56 = vld [vmem:[#allocation5 + $0x784] ss:$12 sps:$4 sm:$0xff]  }
 0x4bf   :  { %9847 = vtanh.f32 %v8595_v60  ;;  %v9387_v58 = vld [vmem:[#allocation5 + $0x7d0] ss:$12 sps:$4 sm:$0xff]   ;;  %v9369_v59 = vld [vmem:[#allocation5 + $0x780] ss:$12 sps:$4 sm:$0xff]   ;;  %v9374_v62 = vld [vmem:[#allocation5 + $0x798] ss:$12 sps:$4 sm:$0xff]  }
 0x4c0   :  { %9849 = vtanh.f32 %v3315_v57  ;;  %v9383_v57 = vld [vmem:[#allocation5 + $0x6f8] ss:$12 sps:$4 sm:$0xff]   ;;  %v9376_v60 = vld [vmem:[#allocation5 + $0x79c] ss:$12 sps:$4 sm:$0xff]   ;;  %v9381_v63 = vld [vmem:[#allocation5 + $0x7b4] ss:$12 sps:$4 sm:$0xff]  }
 0x4c1   :  { %v9388_v61 = vld [vmem:[#allocation5 + $0x710] ss:$12 sps:$4 sm:$0xff]  }
 0x4c2   :  { %v9379_v0 = vld [vmem:[#allocation5 + $0x7b0] ss:$12 sps:$4 sm:$0xff]  }
 0x4c8   :  { %v9846_v1 = vpop.eup %9845 }
 0x4c9   :  { %v9848_v2 = vpop.eup %9847  ;;  %v3323_v6 = vpack.c.bf16 %v9846_v1, %v9846_v1  ;;  %v9386_v1 = vld [vmem:[#allocation5 + $0x7cc] ss:$12 sps:$4 sm:$0xff]  }
 0x4ca   :  { %v3324_v3 = vpack.c.bf16 %v9848_v2, %v9848_v2  ;;  %v9850_v34 = vpop.eup %9849  ;;  %v9384_v2 = vld [vmem:[#allocation5 + $0x7c8] ss:$12 sps:$4 sm:$0xff]  }
 0x4cb   :  { %v3325_v18 = vpack.c.bf16 %v9850_v34, %v9850_v34 }
 0x4cc   :  { %3857 = vmatprep.mubr.bf16.mxu0 %v3324_v3  ;;  %3939 = vmatprep.mubr.bf16.mxu1 %v3324_v3  ;;  %v9391_v3 = vld [vmem:[#allocation5 + $0x7e4] ss:$12 sps:$4 sm:$0xff]  }
 0x4cd   :  { %3858 = vmatmul.mubr.bf16.vlgmr.msra.gmra.mrb[20].mxu0 %v3323_v6  ;;  %3940 = vmatmul.mubr.bf16.vlgmr.msra.gmra.mrb[20].mxu1 %v3323_v6  ;;  %v9393_v6 = vld [vmem:[#allocation5 + $0x728] ss:$12 sps:$4 sm:$0xff]  }
 0x4ce   :  { %3867 = vmatpush1.bf16.msra.mxu0 %v9313_v4  ;;  %8466 = vmatpush3.bf16.msra.mxu1 %v9316_v5  ;;  %v9392_v4 = vld [vmem:[#allocation5 + $0x7e8] ss:$12 sps:$4 sm:$0xff]   ;;  %v9389_v5 = vld [vmem:[#allocation5 + $0x7e0] ss:$12 sps:$4 sm:$0xff]  }
 0x4cf   :  { %3868 = vmatprep.subr.bf16.mxu0 %v9319_v7  ;;  %8467 = vmatprep.subr.bf16.mxu1 %v9984_v29  ;;  %v9396_v7 = vld [vmem:[#allocation5 + $0x7fc] ss:$12 sps:$4 sm:$0xff]  }
 0x4d0   :  { %3898 = vmatprep.mubr.bf16.mxu0 %v9985_v51  ;;  %8481 = vmatprep.mubr.msk.bf16.mxu1 %vm9986_vm0, %v9984_v29 }
 0x4d2   :  { %3869 = vmatpush1.bf16.msra.mxu0 %v9317_v8  ;;  %8468 = vmatpush3.bf16.msra.mxu1 %v9320_v13  ;;  %v9397_v8 = vld [vmem:[#allocation5 + $0x800] ss:$12 sps:$4 sm:$0xff]   ;;  %v9394_v13 = vld [vmem:[#allocation5 + $0x7f8] ss:$12 sps:$4 sm:$0xff]  }
 0x4d3   :  { %3870 = vmatprep.subr.bf16.mxu0 %v9323_v14  ;;  %8469 = vmatprep.subr.bf16.mxu1 %v9984_v29  ;;  %v9398_v14 = vld [vmem:[#allocation5 + $0x740] ss:$12 sps:$4 sm:$0xff]  }
 0x4d6   :  { %3871 = vmatpush1.bf16.msra.mxu0 %v9321_v15  ;;  %8470 = vmatpush3.bf16.msra.mxu1 %v9324_v16  ;;  %v9401_v15 = vld [vmem:[#allocation5 + $0x814] ss:$12 sps:$4 sm:$0xff]   ;;  %v9402_v16 = vld [vmem:[#allocation5 + $0x818] ss:$12 sps:$4 sm:$0xff]  }
 0x4d7   :  { %3872 = vmatprep.subr.bf16.mxu0 %v9327_v17  ;;  %8471 = vmatprep.subr.bf16.mxu1 %v9984_v29  ;;  %v9399_v17 = vld [vmem:[#allocation5 + $0x810] ss:$12 sps:$4 sm:$0xff]  }
 0x4da   :  { %3873 = vmatpush1.bf16.msra.mxu0 %v9325_v20  ;;  %8472 = vmatpush3.bf16.msra.mxu1 %v9328_v21  ;;  %v9403_v20 = vld [vmem:[#allocation5 + $0x758] ss:$12 sps:$4 sm:$0xff]  }
 0x4db   :  { %3874 = vmatprep.subr.bf16.mxu0 %v9331_v22  ;;  %8473 = vmatprep.subr.bf16.mxu1 %v9984_v29  ;;  %v9406_v21 = vld [vmem:[#allocation5 + $0x82c] ss:$12 sps:$4 sm:$0xff]   ;;  %v9407_v22 = vld [vmem:[#allocation5 + $0x830] ss:$12 sps:$4 sm:$0xff]  }
 0x4de   :  { %3875 = vmatpush1.bf16.msra.mxu0 %v9329_v23  ;;  %8474 = vmatpush3.bf16.msra.mxu1 %v9332_v24  ;;  %v9404_v23 = vld [vmem:[#allocation5 + $0x828] ss:$12 sps:$4 sm:$0xff]   ;;  %v9408_v24 = vld [vmem:[#allocation5 + $0x770] ss:$12 sps:$4 sm:$0xff]  }
 0x4df   :  { %3876 = vmatprep.subr.bf16.mxu0 %v9335_v25  ;;  %8475 = vmatprep.subr.bf16.mxu1 %v9984_v29  ;;  %v9411_v25 = vld [vmem:[#allocation5 + $0x844] ss:$12 sps:$4 sm:$0xff]  }
 0x4e2   :  { %3877 = vmatpush1.bf16.msra.mxu0 %v9333_v26  ;;  %8476 = vmatpush3.bf16.msra.mxu1 %v9336_v27 }
 0x4e3   :  { %3878 = vmatprep.subr.bf16.mxu0 %v9339_v9  ;;  %8477 = vmatprep.subr.bf16.mxu1 %v9984_v29 }
 0x4e6   :  { %3879 = vmatpush1.bf16.msra.mxu0 %v9337_v28  ;;  %8478 = vmatpush3.bf16.msra.mxu1 %v9340_v30 }
 0x4e7   :  { %3880 = vmatprep.subr.bf16.mxu0 %v9343_v31  ;;  %8479 = vmatprep.subr.bf16.mxu1 %v9984_v29  ;;  %v3424_v31 = vld [vmem:[#allocation7 + $0x4] ss:$8 sm:$0x7] }
 0x4ea   :  { %3881 = vmatpush1.bf16.msra.mxu0 %v9341_v32  ;;  %8480 = vmatpush3.bf16.msra.mxu1 %v9344_v11  ;;  %v3437_v32 = vrot.slane %v3424_v31, %v10080_v19  ;;  %v3429_v11 = vrot.slane %v3424_v31, %v10064_v10 }
 0x4eb   :  { %4492 = vmatprep.subr.bf16.mxu1 %v9347_v33  ;;  %8270 = vmatprep.subr.bf16.mxu0 %v9372_v47  ;;  %v3433_v33 = vrot.slane %v3424_v31, %v10069_v12  ;;  %v9459_v31 = vld [vmem:[#allocation5 + $0x990] ss:$12 sps:$4 sm:$0xff]  }
 0x4ed   :  { %3899 = vmatmul.mubr.bf16.vlgmr.msra.gmra.mrb[20].mxu0 %v3325_v18  ;;  %8482 = vmatmul.mubr.bf16.vlgmr.msra.gmra.mrb[24].mxu1 %v3325_v18 }
 0x4ee   :  { %4493 = vmatpush1.bf16.msra.mxu1 %v9345_v35  ;;  %8271 = vmatpush3.bf16.msra.mxu0 %v9373_v49  ;;  %v9412_v49 = vld [vmem:[#allocation5 + $0x848] ss:$12 sps:$4 sm:$0xff]  }
 0x4ef   :  { %4494 = vmatprep.subr.bf16.mxu1 %v9350_v36  ;;  %8272 = vmatprep.subr.bf16.mxu0 %v9377_v52  ;;  %v9415_v52 = vld [vmem:[#allocation5 + $0x85c] ss:$12 sps:$4 sm:$0xff]  }
 0x4f2   :  { %4495 = vmatpush1.bf16.msra.mxu1 %v9348_v37  ;;  %8273 = vmatpush3.bf16.msra.mxu0 %v9378_v53  ;;  %v9413_v53 = vld [vmem:[#allocation5 + $0x858] ss:$12 sps:$4 sm:$0xff]  }
 0x4f3   :  { %4496 = vmatprep.subr.bf16.mxu1 %v9353_v38  ;;  %8274 = vmatprep.subr.bf16.mxu0 %v9382_v54  ;;  %v9416_v54 = vld [vmem:[#allocation5 + $0x860] ss:$12 sps:$4 sm:$0xff]  }
 0x4f6   :  { %4497 = vmatpush1.bf16.msra.mxu1 %v9351_v39  ;;  %8275 = vmatpush3.bf16.msra.mxu0 %v9383_v57  ;;  %v9420_v57 = vld [vmem:[#allocation5 + $0x878] ss:$12 sps:$4 sm:$0xff]  }
 0x4f7   :  { %4498 = vmatprep.subr.bf16.mxu1 %v9356_v40  ;;  %8276 = vmatprep.subr.bf16.mxu0 %v9387_v58  ;;  %v9423_v58 = vld [vmem:[#allocation5 + $0x88c] ss:$12 sps:$4 sm:$0xff]  }
 0x4fa   :  { %4499 = vmatpush1.bf16.msra.mxu1 %v9354_v41  ;;  %8277 = vmatpush3.bf16.msra.mxu0 %v9388_v61  ;;  %v9427_v61 = vld [vmem:[#allocation5 + $0x8a4] ss:$12 sps:$4 sm:$0xff]  }
 0x4fb   :  { %4500 = vmatprep.subr.bf16.mxu1 %v9359_v42  ;;  %8278 = vmatprep.subr.bf16.mxu0 %v9392_v4  ;;  %v9433_v4 = vld [vmem:[#allocation5 + $0x8d0] ss:$12 sps:$4 sm:$0xff]  }
 0x4fe   :  { %4501 = vmatpush1.bf16.msra.mxu1 %v9357_v43  ;;  %8279 = vmatpush3.bf16.msra.mxu0 %v9393_v6  ;;  %v9439_v6 = vld [vmem:[#allocation5 + $0x8ec] ss:$12 sps:$4 sm:$0xff]  }
 0x4ff   :  { %4502 = vmatprep.subr.bf16.mxu1 %v9362_v45  ;;  %8280 = vmatprep.subr.bf16.mxu0 %v9397_v8  ;;  %v9440_v8 = vld [vmem:[#allocation5 + $0x8f0] ss:$12 sps:$4 sm:$0xff]  }
 0x502   :  { %4503 = vmatpush1.bf16.msra.mxu1 %v9360_v44  ;;  %8281 = vmatpush3.bf16.msra.mxu0 %v9398_v14 }
 0x503   :  { %4504 = vmatprep.subr.bf16.mxu1 %v9365_v46  ;;  %8282 = vmatprep.subr.bf16.mxu0 %v9402_v16 }
 0x506   :  { %4505 = vmatpush1.bf16.msra.mxu1 %v9363_v48  ;;  %8283 = vmatpush3.bf16.msra.mxu0 %v9403_v20  ;;  %v9409_v48 = vld [vmem:[#allocation5 + $0x840] ss:$12 sps:$4 sm:$0xff]   ;;  %v9444_v20 = vld [vmem:[#allocation5 + $0x918] ss:$12 sps:$4 sm:$0xff]  }
 0x507   :  { %4506 = vmatprep.subr.bf16.mxu1 %v9368_v50  ;;  %8284 = vmatprep.subr.bf16.mxu0 %v9407_v22  ;;  %v9447_v22 = vld [vmem:[#allocation5 + $0x930] ss:$12 sps:$4 sm:$0xff]  }
 0x50a   :  { %4507 = vmatpush1.bf16.msra.mxu1 %v9366_v55  ;;  %8285 = vmatpush3.bf16.msra.mxu0 %v9408_v24  ;;  %v9419_v55 = vld [vmem:[#allocation5 + $0x874] ss:$12 sps:$4 sm:$0xff]  }
 0x50b   :  { %4508 = vmatprep.subr.bf16.mxu1 %v9371_v56  ;;  %8485 = vmatprep.subr.bf16.mxu0 %v9984_v29  ;;  %v9417_v56 = vld [vmem:[#allocation5 + $0x870] ss:$12 sps:$4 sm:$0xff]   ;;  %v9450_v24 = vld [vmem:[#allocation5 + $0x948] ss:$12 sps:$4 sm:$0xff]  }
 0x50e   :  { %4509 = vmatpush1.bf16.msra.mxu1 %v9369_v59  ;;  %v9421_v59 = vld [vmem:[#allocation5 + $0x888] ss:$12 sps:$4 sm:$0xff]  }
 0x50f   :  { %4510 = vmatprep.subr.bf16.mxu1 %v9376_v60  ;;  %v9424_v60 = vld [vmem:[#allocation5 + $0x890] ss:$12 sps:$4 sm:$0xff]  }
 0x512   :  { %4511 = vmatpush1.bf16.msra.mxu1 %v9374_v62  ;;  %v9425_v62 = vld [vmem:[#allocation5 + $0x8a0] ss:$12 sps:$4 sm:$0xff]  }
 0x513   :  { %4512 = vmatprep.subr.bf16.mxu1 %v9381_v63  ;;  %v9428_v63 = vld [vmem:[#allocation5 + $0x8a8] ss:$12 sps:$4 sm:$0xff]  }
 0x516   :  { %4513 = vmatpush1.bf16.msra.mxu1 %v9379_v0  ;;  %v9431_v0 = vld [vmem:[#allocation5 + $0x8bc] ss:$12 sps:$4 sm:$0xff]  }
 0x517   :  { %4514 = vmatprep.subr.bf16.mxu1 %v9386_v1  ;;  %v9429_v1 = vld [vmem:[#allocation5 + $0x8b8] ss:$12 sps:$4 sm:$0xff]  }
 0x51a   :  { %4515 = vmatpush1.bf16.msra.mxu1 %v9384_v2  ;;  %v9432_v2 = vld [vmem:[#allocation5 + $0x8c0] ss:$12 sps:$4 sm:$0xff]  }
 0x51b   :  { %4516 = vmatprep.subr.bf16.mxu1 %v9391_v3  ;;  %v9435_v3 = vld [vmem:[#allocation5 + $0x8d4] ss:$12 sps:$4 sm:$0xff]  }
 0x51e   :  { %4517 = vmatpush1.bf16.msra.mxu1 %v9389_v5  ;;  %v9436_v5 = vld [vmem:[#allocation5 + $0x8d8] ss:$12 sps:$4 sm:$0xff]  }
 0x51f   :  { %4518 = vmatprep.subr.bf16.mxu1 %v9396_v7  ;;  %v9437_v7 = vld [vmem:[#allocation5 + $0x8e8] ss:$12 sps:$4 sm:$0xff]  }
 0x522   :  { %4519 = vmatpush1.bf16.msra.mxu1 %v9394_v13  ;;  %v9443_v13 = vld [vmem:[#allocation5 + $0x904] ss:$12 sps:$4 sm:$0xff]  }
 0x523   :  { %4520 = vmatprep.subr.bf16.mxu1 %v9401_v15  ;;  %v9441_v15 = vld [vmem:[#allocation5 + $0x900] ss:$12 sps:$4 sm:$0xff]  }
 0x526   :  { %4521 = vmatpush1.bf16.msra.mxu1 %v9399_v17  ;;  %v9446_v17 = vld [vmem:[#allocation5 + $0x91c] ss:$12 sps:$4 sm:$0xff]  }
 0x527   :  { %4522 = vmatprep.subr.bf16.mxu1 %v9406_v21  ;;  %v9449_v21 = vld [vmem:[#allocation5 + $0x934] ss:$12 sps:$4 sm:$0xff]  }
 0x52a   :  { %4523 = vmatpush1.bf16.msra.mxu1 %v9404_v23  ;;  %v9452_v23 = vld [vmem:[#allocation5 + $0x94c] ss:$12 sps:$4 sm:$0xff]  }
 0x52b   :  { %4533 = vmatprep.subr.bf16.mxu1 %v9411_v25  ;;  %v9455_v25 = vld [vmem:[#allocation5 + $0x964] ss:$12 sps:$4 sm:$0xff]  }
 0x5a0   :  { %v8255_v26 = vpop.f32.mrb[20].mxu1 }
 0x5a1   :  { %v8256_v27 = vpop.f32.mrb[21].mxu1 }
 0x5a2   :  { %v8257_v9 = vadd.f32 %v8256_v27, %v8255_v26  ;;  %v8258_v28 = vpop.f32.mrb[22].mxu1  ;;  %v9453_v26 = vld [vmem:[#allocation5 + $0x960] ss:$12 sps:$4 sm:$0xff]   ;;  %v9456_v27 = vld [vmem:[#allocation5 + $0x978] ss:$12 sps:$4 sm:$0xff]  }
 0x5a3   :  { %v8259_v30 = vpop.f32.mrb[23].mxu1  ;;  %v9461_v28 = vld [vmem:[#allocation5 + $0x994] ss:$12 sps:$4 sm:$0xff]  }
 0x5a4   :  { %v3942_v34 = vadd.f32 %v8257_v9, %v3437_v32  ;;  %v9458_v9 = vld [vmem:[#allocation5 + $0x97c] ss:$12 sps:$4 sm:$0xff]  }
 0x5a5   :  { %v9468_v30 = vld [vmem:[#allocation5 + $0x9c8] ss:$12 sps:$4 sm:$0xff]  }
 0x5a6   :  { %v9469_v32 = vld [vmem:[#allocation5 + $0x908] ss:$12 sps:$4 sm:$0xff]  }
 0x5c0   :  { %v3900_v35 = vpop.f32.mrb[20].mxu0  ;;  %v3981_v18 = vpop.f32.mrb[24].mxu1 }
 0x5c1   :  { %v8596_v36 = vadd.f32 %v3900_v35, %v3429_v11  ;;  %v3982_v37 = vadd.f32 %v3981_v18, %v3942_v34  ;;  %v3902_v38 = vpop.f32.mrb[21].mxu0  ;;  %v8483_v39 = vpop.f32.mrb[25].mxu1  ;;  %v9464_v11 = vld [vmem:[#allocation5 + $0x9ac] ss:$12 sps:$4 sm:$0xff]   ;;  %v9462_v18 = vld [vmem:[#allocation5 + $0x9a8] ss:$12 sps:$4 sm:$0xff]  }
 0x5c2   :  { %v8597_v40 = vadd.f32 %v3902_v38, %v3433_v33  ;;  %v3904_v41 = vpop.f32.mrb[22].mxu0  ;;  %v3984_v42 = vpop.f32.mrb[26].mxu1  ;;  %v9473_v33 = vld [vmem:[#allocation5 + $0x9e0] ss:$12 sps:$4 sm:$0xff]   ;;  %v9478_v35 = vld [vmem:[#allocation5 + $0x9f8] ss:$12 sps:$4 sm:$0xff]  }
 0x5c3   :  { %v3905_v43 = vpop.f32.mrb[23].mxu0  ;;  %v8484_v44 = vpop.f32.mrb[27].mxu1  ;;  %9851 = vtanh.f32 %v8596_v36  ;;  %v9474_v34 = vld [vmem:[#allocation5 + $0x920] ss:$12 sps:$4 sm:$0xff]   ;;  %v9467_v36 = vld [vmem:[#allocation5 + $0x9c4] ss:$12 sps:$4 sm:$0xff]  }
 0x5c4   :  { %9853 = vtanh.f32 %v8597_v40  ;;  %v9483_v38 = vld [vmem:[#allocation5 + $0xa10] ss:$12 sps:$4 sm:$0xff]   ;;  %v9465_v39 = vld [vmem:[#allocation5 + $0x9c0] ss:$12 sps:$4 sm:$0xff]   ;;  %v9470_v42 = vld [vmem:[#allocation5 + $0x9d8] ss:$12 sps:$4 sm:$0xff]  }
 0x5c5   :  { %9855 = vtanh.f32 %v3982_v37  ;;  %v9479_v37 = vld [vmem:[#allocation5 + $0x938] ss:$12 sps:$4 sm:$0xff]   ;;  %v9472_v40 = vld [vmem:[#allocation5 + $0x9dc] ss:$12 sps:$4 sm:$0xff]   ;;  %v9477_v43 = vld [vmem:[#allocation5 + $0x9f4] ss:$12 sps:$4 sm:$0xff]  }
 0x5c6   :  { %v9484_v41 = vld [vmem:[#allocation5 + $0x950] ss:$12 sps:$4 sm:$0xff]  }
 0x5c7   :  { %v9475_v44 = vld [vmem:[#allocation5 + $0x9f0] ss:$12 sps:$4 sm:$0xff]  }
 0x5cd   :  { %v9852_v45 = vpop.eup %9851 }
 0x5ce   :  { %v9854_v46 = vpop.eup %9853  ;;  %v3990_v50 = vpack.c.bf16 %v9852_v45, %v9852_v45  ;;  %v9482_v45 = vld [vmem:[#allocation5 + $0xa0c] ss:$12 sps:$4 sm:$0xff]  }
 0x5cf   :  { %v3991_v47 = vpack.c.bf16 %v9854_v46, %v9854_v46  ;;  %v9856_v14 = vpop.eup %9855  ;;  %v9480_v46 = vld [vmem:[#allocation5 + $0xa08] ss:$12 sps:$4 sm:$0xff]  }
 0x5d0   :  { %v3992_v16 = vpack.c.bf16 %v9856_v14, %v9856_v14 }
 0x5d1   :  { %4524 = vmatprep.mubr.bf16.mxu1 %v3991_v47  ;;  %4606 = vmatprep.mubr.bf16.mxu0 %v3991_v47  ;;  %v9487_v47 = vld [vmem:[#allocation5 + $0xa24] ss:$12 sps:$4 sm:$0xff]  }
 0x5d2   :  { %4525 = vmatmul.mubr.bf16.vlgmr.msra.gmra.mrb[28].mxu1 %v3990_v50  ;;  %4607 = vmatmul.mubr.bf16.vlgmr.msra.gmra.mrb[24].mxu0 %v3990_v50  ;;  %v9489_v50 = vld [vmem:[#allocation5 + $0x968] ss:$12 sps:$4 sm:$0xff]  }
 0x5d3   :  { %4534 = vmatpush1.bf16.msra.mxu1 %v9409_v48  ;;  %8486 = vmatpush3.bf16.msra.mxu0 %v9412_v49  ;;  %v9488_v48 = vld [vmem:[#allocation5 + $0xa28] ss:$12 sps:$4 sm:$0xff]   ;;  %v9485_v49 = vld [vmem:[#allocation5 + $0xa20] ss:$12 sps:$4 sm:$0xff]  }
 0x5d4   :  { %4535 = vmatprep.subr.bf16.mxu1 %v9415_v52  ;;  %8487 = vmatprep.subr.bf16.mxu0 %v9984_v29  ;;  %v9492_v52 = vld [vmem:[#allocation5 + $0xa3c] ss:$12 sps:$4 sm:$0xff]  }
 0x5d5   :  { %4565 = vmatprep.mubr.bf16.mxu1 %v9985_v51  ;;  %8501 = vmatprep.mubr.msk.bf16.mxu0 %vm9986_vm0, %v9984_v29 }
 0x5d7   :  { %4536 = vmatpush1.bf16.msra.mxu1 %v9413_v53  ;;  %8488 = vmatpush3.bf16.msra.mxu0 %v9416_v54  ;;  %v9493_v53 = vld [vmem:[#allocation5 + $0xa40] ss:$12 sps:$4 sm:$0xff]   ;;  %v9490_v54 = vld [vmem:[#allocation5 + $0xa38] ss:$12 sps:$4 sm:$0xff]  }
 0x5d8   :  { %4537 = vmatprep.subr.bf16.mxu1 %v9419_v55  ;;  %8489 = vmatprep.subr.bf16.mxu0 %v9984_v29  ;;  %v9494_v55 = vld [vmem:[#allocation5 + $0x980] ss:$12 sps:$4 sm:$0xff]  }
 0x5db   :  { %4538 = vmatpush1.bf16.msra.mxu1 %v9417_v56  ;;  %8490 = vmatpush3.bf16.msra.mxu0 %v9420_v57  ;;  %v9497_v56 = vld [vmem:[#allocation5 + $0xa54] ss:$12 sps:$4 sm:$0xff]   ;;  %v9498_v57 = vld [vmem:[#allocation5 + $0xa58] ss:$12 sps:$4 sm:$0xff]  }
 0x5dc   :  { %4539 = vmatprep.subr.bf16.mxu1 %v9423_v58  ;;  %8491 = vmatprep.subr.bf16.mxu0 %v9984_v29  ;;  %v9495_v58 = vld [vmem:[#allocation5 + $0xa50] ss:$12 sps:$4 sm:$0xff]  }
 0x5df   :  { %4540 = vmatpush1.bf16.msra.mxu1 %v9421_v59  ;;  %8492 = vmatpush3.bf16.msra.mxu0 %v9424_v60  ;;  %v9499_v59 = vld [vmem:[#allocation5 + $0x998] ss:$12 sps:$4 sm:$0xff]  }
 0x5e0   :  { %4541 = vmatprep.subr.bf16.mxu1 %v9427_v61  ;;  %8493 = vmatprep.subr.bf16.mxu0 %v9984_v29  ;;  %v9502_v60 = vld [vmem:[#allocation5 + $0xa6c] ss:$12 sps:$4 sm:$0xff]   ;;  %v9503_v61 = vld [vmem:[#allocation5 + $0xa70] ss:$12 sps:$4 sm:$0xff]  }
 0x5e3   :  { %4542 = vmatpush1.bf16.msra.mxu1 %v9425_v62  ;;  %8494 = vmatpush3.bf16.msra.mxu0 %v9428_v63  ;;  %v9500_v62 = vld [vmem:[#allocation5 + $0xa68] ss:$12 sps:$4 sm:$0xff]   ;;  %v9504_v63 = vld [vmem:[#allocation5 + $0x9b0] ss:$12 sps:$4 sm:$0xff]  }
 0x5e4   :  { %4543 = vmatprep.subr.bf16.mxu1 %v9431_v0  ;;  %8495 = vmatprep.subr.bf16.mxu0 %v9984_v29  ;;  %v9507_v0 = vld [vmem:[#allocation5 + $0xa84] ss:$12 sps:$4 sm:$0xff]  }
 0x5e7   :  { %4544 = vmatpush1.bf16.msra.mxu1 %v9429_v1  ;;  %8496 = vmatpush3.bf16.msra.mxu0 %v9432_v2 }
 0x5e8   :  { %4545 = vmatprep.subr.bf16.mxu1 %v9435_v3  ;;  %8497 = vmatprep.subr.bf16.mxu0 %v9984_v29 }
 0x5eb   :  { %4546 = vmatpush1.bf16.msra.mxu1 %v9433_v4  ;;  %8498 = vmatpush3.bf16.msra.mxu0 %v9436_v5 }
 0x5ec   :  { %4547 = vmatprep.subr.bf16.mxu1 %v9439_v6  ;;  %8499 = vmatprep.subr.bf16.mxu0 %v9984_v29  ;;  %v4091_v6 = vld [vmem:[#allocation7 + $0x5] ss:$8 sm:$0x7] }
 0x5ef   :  { %4548 = vmatpush1.bf16.msra.mxu1 %v9437_v7  ;;  %8500 = vmatpush3.bf16.msra.mxu0 %v9440_v8  ;;  %v4104_v7 = vrot.slane %v4091_v6, %v10080_v19  ;;  %v4096_v8 = vrot.slane %v4091_v6, %v10064_v10 }
 0x5f0   :  { %5159 = vmatprep.subr.bf16.mxu0 %v9443_v13  ;;  %8301 = vmatprep.subr.bf16.mxu1 %v9468_v30  ;;  %v4100_v13 = vrot.slane %v4091_v6, %v10069_v12  ;;  %v9555_v6 = vld [vmem:[#allocation5 + $0xbd0] ss:$12 sps:$4 sm:$0xff]  }
 0x5f2   :  { %4566 = vmatmul.mubr.bf16.vlgmr.msra.gmra.mrb[28].mxu1 %v3992_v16  ;;  %8502 = vmatmul.mubr.bf16.vlgmr.msra.gmra.mrb[28].mxu0 %v3992_v16 }
 0x5f3   :  { %5160 = vmatpush1.bf16.msra.mxu0 %v9441_v15  ;;  %8302 = vmatpush3.bf16.msra.mxu1 %v9469_v32  ;;  %v9508_v32 = vld [vmem:[#allocation5 + $0xa88] ss:$12 sps:$4 sm:$0xff]  }
 0x5f4   :  { %5161 = vmatprep.subr.bf16.mxu0 %v9446_v17  ;;  %8303 = vmatprep.subr.bf16.mxu1 %v9473_v33  ;;  %v9511_v33 = vld [vmem:[#allocation5 + $0xa9c] ss:$12 sps:$4 sm:$0xff]  }
 0x5f7   :  { %5162 = vmatpush1.bf16.msra.mxu0 %v9444_v20  ;;  %8304 = vmatpush3.bf16.msra.mxu1 %v9474_v34  ;;  %v9509_v34 = vld [vmem:[#allocation5 + $0xa98] ss:$12 sps:$4 sm:$0xff]  }
 0x5f8   :  { %5163 = vmatprep.subr.bf16.mxu0 %v9449_v21  ;;  %8305 = vmatprep.subr.bf16.mxu1 %v9478_v35  ;;  %v9512_v35 = vld [vmem:[#allocation5 + $0xaa0] ss:$12 sps:$4 sm:$0xff]  }
 0x5fb   :  { %5164 = vmatpush1.bf16.msra.mxu0 %v9447_v22  ;;  %8306 = vmatpush3.bf16.msra.mxu1 %v9479_v37  ;;  %v9516_v37 = vld [vmem:[#allocation5 + $0xab8] ss:$12 sps:$4 sm:$0xff]  }
 0x5fc   :  { %5165 = vmatprep.subr.bf16.mxu0 %v9452_v23  ;;  %8307 = vmatprep.subr.bf16.mxu1 %v9483_v38  ;;  %v9519_v38 = vld [vmem:[#allocation5 + $0xacc] ss:$12 sps:$4 sm:$0xff]  }
 0x5ff   :  { %5166 = vmatpush1.bf16.msra.mxu0 %v9450_v24  ;;  %8308 = vmatpush3.bf16.msra.mxu1 %v9484_v41  ;;  %v9523_v41 = vld [vmem:[#allocation5 + $0xae4] ss:$12 sps:$4 sm:$0xff]  }
 0x600   :  { %5167 = vmatprep.subr.bf16.mxu0 %v9455_v25  ;;  %8309 = vmatprep.subr.bf16.mxu1 %v9488_v48  ;;  %v9529_v48 = vld [vmem:[#allocation5 + $0xb10] ss:$12 sps:$4 sm:$0xff]  }
 0x603   :  { %5168 = vmatpush1.bf16.msra.mxu0 %v9453_v26  ;;  %8310 = vmatpush3.bf16.msra.mxu1 %v9489_v50  ;;  %v9535_v50 = vld [vmem:[#allocation5 + $0xb2c] ss:$12 sps:$4 sm:$0xff]  }
 0x604   :  { %5169 = vmatprep.subr.bf16.mxu0 %v9458_v9  ;;  %8311 = vmatprep.subr.bf16.mxu1 %v9493_v53  ;;  %v9536_v53 = vld [vmem:[#allocation5 + $0xb30] ss:$12 sps:$4 sm:$0xff]  }
 0x607   :  { %5170 = vmatpush1.bf16.msra.mxu0 %v9456_v27  ;;  %8312 = vmatpush3.bf16.msra.mxu1 %v9494_v55 }
 0x608   :  { %5171 = vmatprep.subr.bf16.mxu0 %v9461_v28  ;;  %8313 = vmatprep.subr.bf16.mxu1 %v9498_v57 }
 0x60b   :  { %5172 = vmatpush1.bf16.msra.mxu0 %v9459_v31  ;;  %8314 = vmatpush3.bf16.msra.mxu1 %v9499_v59  ;;  %v9505_v31 = vld [vmem:[#allocation5 + $0xa80] ss:$12 sps:$4 sm:$0xff]   ;;  %v9540_v59 = vld [vmem:[#allocation5 + $0xb58] ss:$12 sps:$4 sm:$0xff]  }
 0x60c   :  { %5173 = vmatprep.subr.bf16.mxu0 %v9464_v11  ;;  %8315 = vmatprep.subr.bf16.mxu1 %v9503_v61  ;;  %v9543_v61 = vld [vmem:[#allocation5 + $0xb70] ss:$12 sps:$4 sm:$0xff]  }
 0x60f   :  { %5174 = vmatpush1.bf16.msra.mxu0 %v9462_v18  ;;  %8316 = vmatpush3.bf16.msra.mxu1 %v9504_v63  ;;  %v9515_v18 = vld [vmem:[#allocation5 + $0xab4] ss:$12 sps:$4 sm:$0xff]  }
 0x610   :  { %5175 = vmatprep.subr.bf16.mxu0 %v9467_v36  ;;  %8505 = vmatprep.subr.bf16.mxu1 %v9984_v29  ;;  %v9513_v36 = vld [vmem:[#allocation5 + $0xab0] ss:$12 sps:$4 sm:$0xff]   ;;  %v9546_v63 = vld [vmem:[#allocation5 + $0xb88] ss:$12 sps:$4 sm:$0xff]  }
 0x613   :  { %5176 = vmatpush1.bf16.msra.mxu0 %v9465_v39  ;;  %v9517_v39 = vld [vmem:[#allocation5 + $0xac8] ss:$12 sps:$4 sm:$0xff]  }
 0x614   :  { %5177 = vmatprep.subr.bf16.mxu0 %v9472_v40  ;;  %v9520_v40 = vld [vmem:[#allocation5 + $0xad0] ss:$12 sps:$4 sm:$0xff]  }
 0x617   :  { %5178 = vmatpush1.bf16.msra.mxu0 %v9470_v42  ;;  %v9521_v42 = vld [vmem:[#allocation5 + $0xae0] ss:$12 sps:$4 sm:$0xff]  }
 0x618   :  { %5179 = vmatprep.subr.bf16.mxu0 %v9477_v43  ;;  %v9524_v43 = vld [vmem:[#allocation5 + $0xae8] ss:$12 sps:$4 sm:$0xff]  }
 0x61b   :  { %5180 = vmatpush1.bf16.msra.mxu0 %v9475_v44  ;;  %v9527_v44 = vld [vmem:[#allocation5 + $0xafc] ss:$12 sps:$4 sm:$0xff]  }
 0x61c   :  { %5181 = vmatprep.subr.bf16.mxu0 %v9482_v45  ;;  %v9525_v45 = vld [vmem:[#allocation5 + $0xaf8] ss:$12 sps:$4 sm:$0xff]  }
 0x61f   :  { %5182 = vmatpush1.bf16.msra.mxu0 %v9480_v46  ;;  %v9528_v46 = vld [vmem:[#allocation5 + $0xb00] ss:$12 sps:$4 sm:$0xff]  }
 0x620   :  { %5183 = vmatprep.subr.bf16.mxu0 %v9487_v47  ;;  %v9531_v47 = vld [vmem:[#allocation5 + $0xb14] ss:$12 sps:$4 sm:$0xff]  }
 0x623   :  { %5184 = vmatpush1.bf16.msra.mxu0 %v9485_v49  ;;  %v9532_v49 = vld [vmem:[#allocation5 + $0xb18] ss:$12 sps:$4 sm:$0xff]  }
 0x624   :  { %5185 = vmatprep.subr.bf16.mxu0 %v9492_v52  ;;  %v9533_v52 = vld [vmem:[#allocation5 + $0xb28] ss:$12 sps:$4 sm:$0xff]  }
 0x627   :  { %5186 = vmatpush1.bf16.msra.mxu0 %v9490_v54  ;;  %v9539_v54 = vld [vmem:[#allocation5 + $0xb44] ss:$12 sps:$4 sm:$0xff]  }
 0x628   :  { %5187 = vmatprep.subr.bf16.mxu0 %v9497_v56  ;;  %v9537_v56 = vld [vmem:[#allocation5 + $0xb40] ss:$12 sps:$4 sm:$0xff]  }
 0x62b   :  { %5188 = vmatpush1.bf16.msra.mxu0 %v9495_v58  ;;  %v9542_v58 = vld [vmem:[#allocation5 + $0xb5c] ss:$12 sps:$4 sm:$0xff]  }
 0x62c   :  { %5189 = vmatprep.subr.bf16.mxu0 %v9502_v60  ;;  %v9545_v60 = vld [vmem:[#allocation5 + $0xb74] ss:$12 sps:$4 sm:$0xff]  }
 0x62f   :  { %5190 = vmatpush1.bf16.msra.mxu0 %v9500_v62  ;;  %v9548_v62 = vld [vmem:[#allocation5 + $0xb8c] ss:$12 sps:$4 sm:$0xff]  }
 0x630   :  { %5200 = vmatprep.subr.bf16.mxu0 %v9507_v0  ;;  %v9551_v0 = vld [vmem:[#allocation5 + $0xba4] ss:$12 sps:$4 sm:$0xff]  }
 0x6a5   :  { %v8286_v1 = vpop.f32.mrb[24].mxu0 }
 0x6a6   :  { %v8287_v2 = vpop.f32.mrb[25].mxu0 }
 0x6a7   :  { %v8288_v3 = vadd.f32 %v8287_v2, %v8286_v1  ;;  %v8289_v4 = vpop.f32.mrb[26].mxu0  ;;  %v9549_v1 = vld [vmem:[#allocation5 + $0xba0] ss:$12 sps:$4 sm:$0xff]   ;;  %v9552_v2 = vld [vmem:[#allocation5 + $0xbb8] ss:$12 sps:$4 sm:$0xff]  }
 0x6a8   :  { %v8290_v5 = vpop.f32.mrb[27].mxu0  ;;  %v9557_v4 = vld [vmem:[#allocation5 + $0xbd4] ss:$12 sps:$4 sm:$0xff]  }
 0x6a9   :  { %v4609_v14 = vadd.f32 %v8288_v3, %v4104_v7  ;;  %v9554_v3 = vld [vmem:[#allocation5 + $0xbbc] ss:$12 sps:$4 sm:$0xff]  }
 0x6aa   :  { %v9564_v5 = vld [vmem:[#allocation5 + $0xc08] ss:$12 sps:$4 sm:$0xff]  }
 0x6ab   :  { %v9565_v7 = vld [vmem:[#allocation5 + $0xb48] ss:$12 sps:$4 sm:$0xff]  }
 0x6c5   :  { %v4567_v15 = vpop.f32.mrb[28].mxu1  ;;  %v4648_v16 = vpop.f32.mrb[28].mxu0 }
 0x6c6   :  { %v8598_v17 = vadd.f32 %v4567_v15, %v4096_v8  ;;  %v4649_v20 = vadd.f32 %v4648_v16, %v4609_v14  ;;  %v4569_v21 = vpop.f32.mrb[29].mxu1  ;;  %v8503_v22 = vpop.f32.mrb[29].mxu0  ;;  %v9560_v8 = vld [vmem:[#allocation5 + $0xbec] ss:$12 sps:$4 sm:$0xff]   ;;  %v9558_v16 = vld [vmem:[#allocation5 + $0xbe8] ss:$12 sps:$4 sm:$0xff]  }
 0x6c7   :  { %v8599_v23 = vadd.f32 %v4569_v21, %v4100_v13  ;;  %v4571_v24 = vpop.f32.mrb[30].mxu1  ;;  %v4651_v25 = vpop.f32.mrb[30].mxu0  ;;  %v9569_v13 = vld [vmem:[#allocation5 + $0xc20] ss:$12 sps:$4 sm:$0xff]   ;;  %v9574_v15 = vld [vmem:[#allocation5 + $0xc38] ss:$12 sps:$4 sm:$0xff]  }
 0x6c8   :  { %v4572_v26 = vpop.f32.mrb[31].mxu1  ;;  %v8504_v27 = vpop.f32.mrb[31].mxu0  ;;  %9857 = vtanh.f32 %v8598_v17  ;;  %v9570_v14 = vld [vmem:[#allocation5 + $0xb60] ss:$12 sps:$4 sm:$0xff]   ;;  %v9563_v17 = vld [vmem:[#allocation5 + $0xc04] ss:$12 sps:$4 sm:$0xff]  }
 0x6c9   :  { %9859 = vtanh.f32 %v8599_v23  ;;  %v9579_v21 = vld [vmem:[#allocation5 + $0xc50] ss:$12 sps:$4 sm:$0xff]   ;;  %v9561_v22 = vld [vmem:[#allocation5 + $0xc00] ss:$12 sps:$4 sm:$0xff]   ;;  %v9566_v25 = vld [vmem:[#allocation5 + $0xc18] ss:$12 sps:$4 sm:$0xff]  }
 0x6ca   :  { %9861 = vtanh.f32 %v4649_v20  ;;  %v9575_v20 = vld [vmem:[#allocation5 + $0xb78] ss:$12 sps:$4 sm:$0xff]   ;;  %v9568_v23 = vld [vmem:[#allocation5 + $0xc1c] ss:$12 sps:$4 sm:$0xff]   ;;  %v9573_v26 = vld [vmem:[#allocation5 + $0xc34] ss:$12 sps:$4 sm:$0xff]  }
 0x6cb   :  { %v9580_v24 = vld [vmem:[#allocation5 + $0xb90] ss:$12 sps:$4 sm:$0xff]  }
 0x6cc   :  { %v9571_v27 = vld [vmem:[#allocation5 + $0xc30] ss:$12 sps:$4 sm:$0xff]  }
 0x6d2   :  { %v9858_v9 = vpop.eup %9857 }
 0x6d3   :  { %v9860_v28 = vpop.eup %9859  ;;  %v4657_v11 = vpack.c.bf16 %v9858_v9, %v9858_v9  ;;  %v9578_v9 = vld [vmem:[#allocation5 + $0xc4c] ss:$12 sps:$4 sm:$0xff]  }
 0x6d4   :  { %v4658_v30 = vpack.c.bf16 %v9860_v28, %v9860_v28  ;;  %v9862_v55 = vpop.eup %9861  ;;  %v9576_v28 = vld [vmem:[#allocation5 + $0xc48] ss:$12 sps:$4 sm:$0xff]  }
 0x6d5   :  { %v4659_v57 = vpack.c.bf16 %v9862_v55, %v9862_v55 }
 0x6d6   :  { %5191 = vmatprep.mubr.bf16.mxu0 %v4658_v30  ;;  %5273 = vmatprep.mubr.bf16.mxu1 %v4658_v30  ;;  %v9583_v30 = vld [vmem:[#allocation5 + $0xc64] ss:$12 sps:$4 sm:$0xff]  }
 0x6d7   :  { %5192 = vmatmul.mubr.bf16.vlgmr.msra.gmra.mrb[32].mxu0 %v4657_v11  ;;  %5274 = vmatmul.mubr.bf16.vlgmr.msra.gmra.mrb[32].mxu1 %v4657_v11  ;;  %v9585_v11 = vld [vmem:[#allocation5 + $0xba8] ss:$12 sps:$4 sm:$0xff]  }
 0x6d8   :  { %5201 = vmatpush1.bf16.msra.mxu0 %v9505_v31  ;;  %8506 = vmatpush3.bf16.msra.mxu1 %v9508_v32  ;;  %v9584_v31 = vld [vmem:[#allocation5 + $0xc68] ss:$12 sps:$4 sm:$0xff]   ;;  %v9581_v32 = vld [vmem:[#allocation5 + $0xc60] ss:$12 sps:$4 sm:$0xff]  }
 0x6d9   :  { %5202 = vmatprep.subr.bf16.mxu0 %v9511_v33  ;;  %8507 = vmatprep.subr.bf16.mxu1 %v9984_v29  ;;  %v9588_v33 = vld [vmem:[#allocation5 + $0xc7c] ss:$12 sps:$4 sm:$0xff]  }
 0x6da   :  { %5232 = vmatprep.mubr.bf16.mxu0 %v9985_v51  ;;  %8521 = vmatprep.mubr.msk.bf16.mxu1 %vm9986_vm0, %v9984_v29 }
 0x6dc   :  { %5203 = vmatpush1.bf16.msra.mxu0 %v9509_v34  ;;  %8508 = vmatpush3.bf16.msra.mxu1 %v9512_v35  ;;  %v9589_v34 = vld [vmem:[#allocation5 + $0xc80] ss:$12 sps:$4 sm:$0xff]   ;;  %v9586_v35 = vld [vmem:[#allocation5 + $0xc78] ss:$12 sps:$4 sm:$0xff]  }
 0x6dd   :  { %5204 = vmatprep.subr.bf16.mxu0 %v9515_v18  ;;  %8509 = vmatprep.subr.bf16.mxu1 %v9984_v29  ;;  %v9590_v18 = vld [vmem:[#allocation5 + $0xbc0] ss:$12 sps:$4 sm:$0xff]  }
 0x6e0   :  { %5205 = vmatpush1.bf16.msra.mxu0 %v9513_v36  ;;  %8510 = vmatpush3.bf16.msra.mxu1 %v9516_v37  ;;  %v9593_v36 = vld [vmem:[#allocation5 + $0xc94] ss:$12 sps:$4 sm:$0xff]   ;;  %v9594_v37 = vld [vmem:[#allocation5 + $0xc98] ss:$12 sps:$4 sm:$0xff]  }
 0x6e1   :  { %5206 = vmatprep.subr.bf16.mxu0 %v9519_v38  ;;  %8511 = vmatprep.subr.bf16.mxu1 %v9984_v29  ;;  %v9591_v38 = vld [vmem:[#allocation5 + $0xc90] ss:$12 sps:$4 sm:$0xff]  }
 0x6e4   :  { %5207 = vmatpush1.bf16.msra.mxu0 %v9517_v39  ;;  %8512 = vmatpush3.bf16.msra.mxu1 %v9520_v40  ;;  %v9595_v39 = vld [vmem:[#allocation5 + $0xbd8] ss:$12 sps:$4 sm:$0xff]  }
 0x6e5   :  { %5208 = vmatprep.subr.bf16.mxu0 %v9523_v41  ;;  %8513 = vmatprep.subr.bf16.mxu1 %v9984_v29  ;;  %v9598_v40 = vld [vmem:[#allocation5 + $0xcac] ss:$12 sps:$4 sm:$0xff]   ;;  %v9599_v41 = vld [vmem:[#allocation5 + $0xcb0] ss:$12 sps:$4 sm:$0xff]  }
 0x6e8   :  { %5209 = vmatpush1.bf16.msra.mxu0 %v9521_v42  ;;  %8514 = vmatpush3.bf16.msra.mxu1 %v9524_v43  ;;  %v9596_v42 = vld [vmem:[#allocation5 + $0xca8] ss:$12 sps:$4 sm:$0xff]   ;;  %v9600_v43 = vld [vmem:[#allocation5 + $0xbf0] ss:$12 sps:$4 sm:$0xff]  }
 0x6e9   :  { %5210 = vmatprep.subr.bf16.mxu0 %v9527_v44  ;;  %8515 = vmatprep.subr.bf16.mxu1 %v9984_v29  ;;  %v9603_v44 = vld [vmem:[#allocation5 + $0xcc4] ss:$12 sps:$4 sm:$0xff]  }
 0x6ec   :  { %5211 = vmatpush1.bf16.msra.mxu0 %v9525_v45  ;;  %8516 = vmatpush3.bf16.msra.mxu1 %v9528_v46 }
 0x6ed   :  { %5212 = vmatprep.subr.bf16.mxu0 %v9531_v47  ;;  %8517 = vmatprep.subr.bf16.mxu1 %v9984_v29 }
 0x6f0   :  { %5213 = vmatpush1.bf16.msra.mxu0 %v9529_v48  ;;  %8518 = vmatpush3.bf16.msra.mxu1 %v9532_v49 }
 0x6f1   :  { %5214 = vmatprep.subr.bf16.mxu0 %v9535_v50  ;;  %8519 = vmatprep.subr.bf16.mxu1 %v9984_v29  ;;  %v4758_v50 = vld [vmem:[#allocation7 + $0x6] ss:$8 sm:$0x7] }
 0x6f4   :  { %5215 = vmatpush1.bf16.msra.mxu0 %v9533_v52  ;;  %8520 = vmatpush3.bf16.msra.mxu1 %v9536_v53  ;;  %v4771_v52 = vrot.slane %v4758_v50, %v10080_v19  ;;  %v4763_v53 = vrot.slane %v4758_v50, %v10064_v10 }
 0x6f5   :  { %5826 = vmatprep.subr.bf16.mxu1 %v9539_v54  ;;  %8332 = vmatprep.subr.bf16.mxu0 %v9564_v5  ;;  %v4767_v54 = vrot.slane %v4758_v50, %v10069_v12  ;;  %v9651_v50 = vld [vmem:[#allocation5 + $0xe10] ss:$12 sps:$4 sm:$0xff]  }
 0x6f7   :  { %5233 = vmatmul.mubr.bf16.vlgmr.msra.gmra.mrb[32].mxu0 %v4659_v57  ;;  %8522 = vmatmul.mubr.bf16.vlgmr.msra.gmra.mrb[36].mxu1 %v4659_v57 }
 0x6f8   :  { %5827 = vmatpush1.bf16.msra.mxu1 %v9537_v56  ;;  %8333 = vmatpush3.bf16.msra.mxu0 %v9565_v7  ;;  %v9604_v7 = vld [vmem:[#allocation5 + $0xcc8] ss:$12 sps:$4 sm:$0xff]  }
 0x6f9   :  { %5828 = vmatprep.subr.bf16.mxu1 %v9542_v58  ;;  %8334 = vmatprep.subr.bf16.mxu0 %v9569_v13  ;;  %v9607_v13 = vld [vmem:[#allocation5 + $0xcdc] ss:$12 sps:$4 sm:$0xff]  }
 0x6fc   :  { %5829 = vmatpush1.bf16.msra.mxu1 %v9540_v59  ;;  %8335 = vmatpush3.bf16.msra.mxu0 %v9570_v14  ;;  %v9605_v14 = vld [vmem:[#allocation5 + $0xcd8] ss:$12 sps:$4 sm:$0xff]  }
 0x6fd   :  { %5830 = vmatprep.subr.bf16.mxu1 %v9545_v60  ;;  %8336 = vmatprep.subr.bf16.mxu0 %v9574_v15  ;;  %v9608_v15 = vld [vmem:[#allocation5 + $0xce0] ss:$12 sps:$4 sm:$0xff]  }
 0x700   :  { %5831 = vmatpush1.bf16.msra.mxu1 %v9543_v61  ;;  %8337 = vmatpush3.bf16.msra.mxu0 %v9575_v20  ;;  %v9612_v20 = vld [vmem:[#allocation5 + $0xcf8] ss:$12 sps:$4 sm:$0xff]  }
 0x701   :  { %5832 = vmatprep.subr.bf16.mxu1 %v9548_v62  ;;  %8338 = vmatprep.subr.bf16.mxu0 %v9579_v21  ;;  %v9615_v21 = vld [vmem:[#allocation5 + $0xd0c] ss:$12 sps:$4 sm:$0xff]  }
 0x704   :  { %5833 = vmatpush1.bf16.msra.mxu1 %v9546_v63  ;;  %8339 = vmatpush3.bf16.msra.mxu0 %v9580_v24  ;;  %v9619_v24 = vld [vmem:[#allocation5 + $0xd24] ss:$12 sps:$4 sm:$0xff]  }
 0x705   :  { %5834 = vmatprep.subr.bf16.mxu1 %v9551_v0  ;;  %8340 = vmatprep.subr.bf16.mxu0 %v9584_v31  ;;  %v9625_v31 = vld [vmem:[#allocation5 + $0xd50] ss:$12 sps:$4 sm:$0xff]  }
 0x708   :  { %5835 = vmatpush1.bf16.msra.mxu1 %v9549_v1  ;;  %8341 = vmatpush3.bf16.msra.mxu0 %v9585_v11  ;;  %v9631_v11 = vld [vmem:[#allocation5 + $0xd6c] ss:$12 sps:$4 sm:$0xff]  }
 0x709   :  { %5836 = vmatprep.subr.bf16.mxu1 %v9554_v3  ;;  %8342 = vmatprep.subr.bf16.mxu0 %v9589_v34  ;;  %v9632_v34 = vld [vmem:[#allocation5 + $0xd70] ss:$12 sps:$4 sm:$0xff]  }
 0x70c   :  { %5837 = vmatpush1.bf16.msra.mxu1 %v9552_v2  ;;  %8343 = vmatpush3.bf16.msra.mxu0 %v9590_v18 }
 0x70d   :  { %5838 = vmatprep.subr.bf16.mxu1 %v9557_v4  ;;  %8344 = vmatprep.subr.bf16.mxu0 %v9594_v37 }
 0x710   :  { %5839 = vmatpush1.bf16.msra.mxu1 %v9555_v6  ;;  %8345 = vmatpush3.bf16.msra.mxu0 %v9595_v39  ;;  %v9601_v6 = vld [vmem:[#allocation5 + $0xcc0] ss:$12 sps:$4 sm:$0xff]   ;;  %v9636_v39 = vld [vmem:[#allocation5 + $0xd98] ss:$12 sps:$4 sm:$0xff]  }
 0x711   :  { %5840 = vmatprep.subr.bf16.mxu1 %v9560_v8  ;;  %8346 = vmatprep.subr.bf16.mxu0 %v9599_v41  ;;  %v9639_v41 = vld [vmem:[#allocation5 + $0xdb0] ss:$12 sps:$4 sm:$0xff]  }
 0x714   :  { %5841 = vmatpush1.bf16.msra.mxu1 %v9558_v16  ;;  %8347 = vmatpush3.bf16.msra.mxu0 %v9600_v43  ;;  %v9611_v16 = vld [vmem:[#allocation5 + $0xcf4] ss:$12 sps:$4 sm:$0xff]  }
 0x715   :  { %5842 = vmatprep.subr.bf16.mxu1 %v9563_v17  ;;  %8525 = vmatprep.subr.bf16.mxu0 %v9984_v29  ;;  %v9609_v17 = vld [vmem:[#allocation5 + $0xcf0] ss:$12 sps:$4 sm:$0xff]   ;;  %v9642_v43 = vld [vmem:[#allocation5 + $0xdc8] ss:$12 sps:$4 sm:$0xff]  }
 0x718   :  { %5843 = vmatpush1.bf16.msra.mxu1 %v9561_v22  ;;  %v9613_v22 = vld [vmem:[#allocation5 + $0xd08] ss:$12 sps:$4 sm:$0xff]  }
 0x719   :  { %5844 = vmatprep.subr.bf16.mxu1 %v9568_v23  ;;  %v9616_v23 = vld [vmem:[#allocation5 + $0xd10] ss:$12 sps:$4 sm:$0xff]  }
 0x71c   :  { %5845 = vmatpush1.bf16.msra.mxu1 %v9566_v25  ;;  %v9617_v25 = vld [vmem:[#allocation5 + $0xd20] ss:$12 sps:$4 sm:$0xff]  }
 0x71d   :  { %5846 = vmatprep.subr.bf16.mxu1 %v9573_v26  ;;  %v9620_v26 = vld [vmem:[#allocation5 + $0xd28] ss:$12 sps:$4 sm:$0xff]  }
 0x720   :  { %5847 = vmatpush1.bf16.msra.mxu1 %v9571_v27  ;;  %v9623_v27 = vld [vmem:[#allocation5 + $0xd3c] ss:$12 sps:$4 sm:$0xff]  }
 0x721   :  { %5848 = vmatprep.subr.bf16.mxu1 %v9578_v9  ;;  %v9621_v9 = vld [vmem:[#allocation5 + $0xd38] ss:$12 sps:$4 sm:$0xff]  }
 0x724   :  { %5849 = vmatpush1.bf16.msra.mxu1 %v9576_v28  ;;  %v9624_v28 = vld [vmem:[#allocation5 + $0xd40] ss:$12 sps:$4 sm:$0xff]  }
 0x725   :  { %5850 = vmatprep.subr.bf16.mxu1 %v9583_v30  ;;  %v9627_v30 = vld [vmem:[#allocation5 + $0xd54] ss:$12 sps:$4 sm:$0xff]  }
 0x728   :  { %5851 = vmatpush1.bf16.msra.mxu1 %v9581_v32  ;;  %v9628_v32 = vld [vmem:[#allocation5 + $0xd58] ss:$12 sps:$4 sm:$0xff]  }
 0x729   :  { %5852 = vmatprep.subr.bf16.mxu1 %v9588_v33  ;;  %v9629_v33 = vld [vmem:[#allocation5 + $0xd68] ss:$12 sps:$4 sm:$0xff]  }
 0x72c   :  { %5853 = vmatpush1.bf16.msra.mxu1 %v9586_v35  ;;  %v9635_v35 = vld [vmem:[#allocation5 + $0xd84] ss:$12 sps:$4 sm:$0xff]  }
 0x72d   :  { %5854 = vmatprep.subr.bf16.mxu1 %v9593_v36  ;;  %v9633_v36 = vld [vmem:[#allocation5 + $0xd80] ss:$12 sps:$4 sm:$0xff]  }
 0x730   :  { %5855 = vmatpush1.bf16.msra.mxu1 %v9591_v38  ;;  %v9638_v38 = vld [vmem:[#allocation5 + $0xd9c] ss:$12 sps:$4 sm:$0xff]  }
 0x731   :  { %5856 = vmatprep.subr.bf16.mxu1 %v9598_v40  ;;  %v9641_v40 = vld [vmem:[#allocation5 + $0xdb4] ss:$12 sps:$4 sm:$0xff]  }
 0x734   :  { %5857 = vmatpush1.bf16.msra.mxu1 %v9596_v42  ;;  %v9644_v42 = vld [vmem:[#allocation5 + $0xdcc] ss:$12 sps:$4 sm:$0xff]  }
 0x735   :  { %5867 = vmatprep.subr.bf16.mxu1 %v9603_v44  ;;  %v9647_v44 = vld [vmem:[#allocation5 + $0xde4] ss:$12 sps:$4 sm:$0xff]  }
 0x7aa   :  { %v8317_v45 = vpop.f32.mrb[32].mxu1 }
 0x7ab   :  { %v8318_v46 = vpop.f32.mrb[33].mxu1 }
 0x7ac   :  { %v8319_v47 = vadd.f32 %v8318_v46, %v8317_v45  ;;  %v8320_v48 = vpop.f32.mrb[34].mxu1  ;;  %v9645_v45 = vld [vmem:[#allocation5 + $0xde0] ss:$12 sps:$4 sm:$0xff]   ;;  %v9648_v46 = vld [vmem:[#allocation5 + $0xdf8] ss:$12 sps:$4 sm:$0xff]  }
 0x7ad   :  { %v8321_v49 = vpop.f32.mrb[35].mxu1  ;;  %v9653_v48 = vld [vmem:[#allocation5 + $0xe14] ss:$12 sps:$4 sm:$0xff]  }
 0x7ae   :  { %v5276_v55 = vadd.f32 %v8319_v47, %v4771_v52  ;;  %v9650_v47 = vld [vmem:[#allocation5 + $0xdfc] ss:$12 sps:$4 sm:$0xff]  }
 0x7af   :  { %v9660_v49 = vld [vmem:[#allocation5 + $0xe48] ss:$12 sps:$4 sm:$0xff]  }
 0x7b0   :  { %v9661_v52 = vld [vmem:[#allocation5 + $0xd88] ss:$12 sps:$4 sm:$0xff]  }
 0x7ca   :  { %v5234_v56 = vpop.f32.mrb[32].mxu0  ;;  %v5315_v57 = vpop.f32.mrb[36].mxu1 }
 0x7cb   :  { %v8600_v58 = vadd.f32 %v5234_v56, %v4763_v53  ;;  %v5316_v59 = vadd.f32 %v5315_v57, %v5276_v55  ;;  %v5236_v60 = vpop.f32.mrb[33].mxu0  ;;  %v8523_v61 = vpop.f32.mrb[37].mxu1  ;;  %v9656_v53 = vld [vmem:[#allocation5 + $0xe2c] ss:$12 sps:$4 sm:$0xff]   ;;  %v9654_v57 = vld [vmem:[#allocation5 + $0xe28] ss:$12 sps:$4 sm:$0xff]  }
 0x7cc   :  { %v8601_v62 = vadd.f32 %v5236_v60, %v4767_v54  ;;  %v5238_v63 = vpop.f32.mrb[34].mxu0  ;;  %v5318_v0 = vpop.f32.mrb[38].mxu1  ;;  %v9665_v54 = vld [vmem:[#allocation5 + $0xe60] ss:$12 sps:$4 sm:$0xff]   ;;  %v9670_v56 = vld [vmem:[#allocation5 + $0xe78] ss:$12 sps:$4 sm:$0xff]  }
 0x7cd   :  { %v5239_v1 = vpop.f32.mrb[35].mxu0  ;;  %v8524_v2 = vpop.f32.mrb[39].mxu1  ;;  %9863 = vtanh.f32 %v8600_v58  ;;  %v9666_v55 = vld [vmem:[#allocation5 + $0xda0] ss:$12 sps:$4 sm:$0xff]   ;;  %v9659_v58 = vld [vmem:[#allocation5 + $0xe44] ss:$12 sps:$4 sm:$0xff]  }
 0x7ce   :  { %9865 = vtanh.f32 %v8601_v62  ;;  %v9675_v60 = vld [vmem:[#allocation5 + $0xe90] ss:$12 sps:$4 sm:$0xff]   ;;  %v9657_v61 = vld [vmem:[#allocation5 + $0xe40] ss:$12 sps:$4 sm:$0xff]   ;;  %v9662_v0 = vld [vmem:[#allocation5 + $0xe58] ss:$12 sps:$4 sm:$0xff]  }
 0x7cf   :  { %9867 = vtanh.f32 %v5316_v59  ;;  %v9671_v59 = vld [vmem:[#allocation5 + $0xdb8] ss:$12 sps:$4 sm:$0xff]   ;;  %v9664_v62 = vld [vmem:[#allocation5 + $0xe5c] ss:$12 sps:$4 sm:$0xff]   ;;  %v9669_v1 = vld [vmem:[#allocation5 + $0xe74] ss:$12 sps:$4 sm:$0xff]  }
 0x7d0   :  { %v9676_v63 = vld [vmem:[#allocation5 + $0xdd0] ss:$12 sps:$4 sm:$0xff]  }
 0x7d1   :  { %v9667_v2 = vld [vmem:[#allocation5 + $0xe70] ss:$12 sps:$4 sm:$0xff]  }
 0x7d7   :  { %v9864_v3 = vpop.eup %9863 }
 0x7d8   :  { %v9866_v4 = vpop.eup %9865  ;;  %v5324_v8 = vpack.c.bf16 %v9864_v3, %v9864_v3  ;;  %v9674_v3 = vld [vmem:[#allocation5 + $0xe8c] ss:$12 sps:$4 sm:$0xff]  }
 0x7d9   :  { %v5325_v5 = vpack.c.bf16 %v9866_v4, %v9866_v4  ;;  %v9868_v18 = vpop.eup %9867  ;;  %v9672_v4 = vld [vmem:[#allocation5 + $0xe88] ss:$12 sps:$4 sm:$0xff]  }
 0x7da   :  { %v5326_v37 = vpack.c.bf16 %v9868_v18, %v9868_v18 }
 0x7db   :  { %5858 = vmatprep.mubr.bf16.mxu1 %v5325_v5  ;;  %5940 = vmatprep.mubr.bf16.mxu0 %v5325_v5  ;;  %v9679_v5 = vld [vmem:[#allocation5 + $0xea4] ss:$12 sps:$4 sm:$0xff]  }
 0x7dc   :  { %5859 = vmatmul.mubr.bf16.vlgmr.msra.gmra.mrb[40].mxu1 %v5324_v8  ;;  %5941 = vmatmul.mubr.bf16.vlgmr.msra.gmra.mrb[36].mxu0 %v5324_v8  ;;  %v9681_v8 = vld [vmem:[#allocation5 + $0xde8] ss:$12 sps:$4 sm:$0xff]  }
 0x7dd   :  { %5868 = vmatpush1.bf16.msra.mxu1 %v9601_v6  ;;  %8526 = vmatpush3.bf16.msra.mxu0 %v9604_v7  ;;  %v9680_v6 = vld [vmem:[#allocation5 + $0xea8] ss:$12 sps:$4 sm:$0xff]   ;;  %v9677_v7 = vld [vmem:[#allocation5 + $0xea0] ss:$12 sps:$4 sm:$0xff]  }
 0x7de   :  { %5869 = vmatprep.subr.bf16.mxu1 %v9607_v13  ;;  %8527 = vmatprep.subr.bf16.mxu0 %v9984_v29  ;;  %v9684_v13 = vld [vmem:[#allocation5 + $0xebc] ss:$12 sps:$4 sm:$0xff]  }
 0x7df   :  { %5899 = vmatprep.mubr.bf16.mxu1 %v9985_v51  ;;  %8541 = vmatprep.mubr.msk.bf16.mxu0 %vm9986_vm0, %v9984_v29 }
 0x7e1   :  { %5870 = vmatpush1.bf16.msra.mxu1 %v9605_v14  ;;  %8528 = vmatpush3.bf16.msra.mxu0 %v9608_v15  ;;  %v9685_v14 = vld [vmem:[#allocation5 + $0xec0] ss:$12 sps:$4 sm:$0xff]   ;;  %v9682_v15 = vld [vmem:[#allocation5 + $0xeb8] ss:$12 sps:$4 sm:$0xff]  }
 0x7e2   :  { %5871 = vmatprep.subr.bf16.mxu1 %v9611_v16  ;;  %8529 = vmatprep.subr.bf16.mxu0 %v9984_v29  ;;  %v9686_v16 = vld [vmem:[#allocation5 + $0xe00] ss:$12 sps:$4 sm:$0xff]  }
 0x7e5   :  { %5872 = vmatpush1.bf16.msra.mxu1 %v9609_v17  ;;  %8530 = vmatpush3.bf16.msra.mxu0 %v9612_v20  ;;  %v9689_v17 = vld [vmem:[#allocation5 + $0xed4] ss:$12 sps:$4 sm:$0xff]   ;;  %v9690_v20 = vld [vmem:[#allocation5 + $0xed8] ss:$12 sps:$4 sm:$0xff]  }
 0x7e6   :  { %5873 = vmatprep.subr.bf16.mxu1 %v9615_v21  ;;  %8531 = vmatprep.subr.bf16.mxu0 %v9984_v29  ;;  %v9687_v21 = vld [vmem:[#allocation5 + $0xed0] ss:$12 sps:$4 sm:$0xff]  }
 0x7e9   :  { %5874 = vmatpush1.bf16.msra.mxu1 %v9613_v22  ;;  %8532 = vmatpush3.bf16.msra.mxu0 %v9616_v23  ;;  %v9691_v22 = vld [vmem:[#allocation5 + $0xe18] ss:$12 sps:$4 sm:$0xff]  }
 0x7ea   :  { %5875 = vmatprep.subr.bf16.mxu1 %v9619_v24  ;;  %8533 = vmatprep.subr.bf16.mxu0 %v9984_v29  ;;  %v9694_v23 = vld [vmem:[#allocation5 + $0xeec] ss:$12 sps:$4 sm:$0xff]   ;;  %v9695_v24 = vld [vmem:[#allocation5 + $0xef0] ss:$12 sps:$4 sm:$0xff]  }
 0x7ed   :  { %5876 = vmatpush1.bf16.msra.mxu1 %v9617_v25  ;;  %8534 = vmatpush3.bf16.msra.mxu0 %v9620_v26  ;;  %v9692_v25 = vld [vmem:[#allocation5 + $0xee8] ss:$12 sps:$4 sm:$0xff]   ;;  %v9696_v26 = vld [vmem:[#allocation5 + $0xe30] ss:$12 sps:$4 sm:$0xff]  }
 0x7ee   :  { %5877 = vmatprep.subr.bf16.mxu1 %v9623_v27  ;;  %8535 = vmatprep.subr.bf16.mxu0 %v9984_v29  ;;  %v9699_v27 = vld [vmem:[#allocation5 + $0xf04] ss:$12 sps:$4 sm:$0xff]  }
 0x7f1   :  { %5878 = vmatpush1.bf16.msra.mxu1 %v9621_v9  ;;  %8536 = vmatpush3.bf16.msra.mxu0 %v9624_v28 }
 0x7f2   :  { %5879 = vmatprep.subr.bf16.mxu1 %v9627_v30  ;;  %8537 = vmatprep.subr.bf16.mxu0 %v9984_v29 }
 0x7f5   :  { %5880 = vmatpush1.bf16.msra.mxu1 %v9625_v31  ;;  %8538 = vmatpush3.bf16.msra.mxu0 %v9628_v32 }
 0x7f6   :  { %5881 = vmatprep.subr.bf16.mxu1 %v9631_v11  ;;  %8539 = vmatprep.subr.bf16.mxu0 %v9984_v29  ;;  %v5425_v11 = vld [vmem:[#allocation7 + $0x7] ss:$8 sm:$0x7] }
 0x7f9   :  { %5882 = vmatpush1.bf16.msra.mxu1 %v9629_v33  ;;  %8540 = vmatpush3.bf16.msra.mxu0 %v9632_v34  ;;  %v5438_v33 = vrot.slane %v5425_v11, %v10080_v19  ;;  %v5430_v34 = vrot.slane %v5425_v11, %v10064_v10 }
 0x7fa   :  { %6493 = vmatprep.subr.bf16.mxu0 %v9635_v35  ;;  %8363 = vmatprep.subr.bf16.mxu1 %v9660_v49  ;;  %v5434_v35 = vrot.slane %v5425_v11, %v10069_v12  ;;  %v9747_v11 = vld [vmem:[#allocation5 + $0x1050] ss:$12 sps:$4 sm:$0xff]  }
 0x7fc   :  { %5900 = vmatmul.mubr.bf16.vlgmr.msra.gmra.mrb[40].mxu1 %v5326_v37  ;;  %8542 = vmatmul.mubr.bf16.vlgmr.msra.gmra.mrb[40].mxu0 %v5326_v37 }
 0x7fd   :  { %6494 = vmatpush1.bf16.msra.mxu0 %v9633_v36  ;;  %8364 = vmatpush3.bf16.msra.mxu1 %v9661_v52  ;;  %v9700_v52 = vld [vmem:[#allocation5 + $0xf08] ss:$12 sps:$4 sm:$0xff]  }
 0x7fe   :  { %6495 = vmatprep.subr.bf16.mxu0 %v9638_v38  ;;  %8365 = vmatprep.subr.bf16.mxu1 %v9665_v54  ;;  %v9703_v54 = vld [vmem:[#allocation5 + $0xf1c] ss:$12 sps:$4 sm:$0xff]  }
 0x801   :  { %6496 = vmatpush1.bf16.msra.mxu0 %v9636_v39  ;;  %8366 = vmatpush3.bf16.msra.mxu1 %v9666_v55  ;;  %v9701_v55 = vld [vmem:[#allocation5 + $0xf18] ss:$12 sps:$4 sm:$0xff]  }
 0x802   :  { %6497 = vmatprep.subr.bf16.mxu0 %v9641_v40  ;;  %8367 = vmatprep.subr.bf16.mxu1 %v9670_v56  ;;  %v9704_v56 = vld [vmem:[#allocation5 + $0xf20] ss:$12 sps:$4 sm:$0xff]  }
 0x805   :  { %6498 = vmatpush1.bf16.msra.mxu0 %v9639_v41  ;;  %8368 = vmatpush3.bf16.msra.mxu1 %v9671_v59  ;;  %v9708_v59 = vld [vmem:[#allocation5 + $0xf38] ss:$12 sps:$4 sm:$0xff]  }
 0x806   :  { %6499 = vmatprep.subr.bf16.mxu0 %v9644_v42  ;;  %8369 = vmatprep.subr.bf16.mxu1 %v9675_v60  ;;  %v9711_v60 = vld [vmem:[#allocation5 + $0xf4c] ss:$12 sps:$4 sm:$0xff]  }
 0x809   :  { %6500 = vmatpush1.bf16.msra.mxu0 %v9642_v43  ;;  %8370 = vmatpush3.bf16.msra.mxu1 %v9676_v63  ;;  %v9715_v63 = vld [vmem:[#allocation5 + $0xf64] ss:$12 sps:$4 sm:$0xff]  }
 0x80a   :  { %6501 = vmatprep.subr.bf16.mxu0 %v9647_v44  ;;  %8371 = vmatprep.subr.bf16.mxu1 %v9680_v6  ;;  %v9721_v6 = vld [vmem:[#allocation5 + $0xf90] ss:$12 sps:$4 sm:$0xff]  }
 0x80d   :  { %6502 = vmatpush1.bf16.msra.mxu0 %v9645_v45  ;;  %8372 = vmatpush3.bf16.msra.mxu1 %v9681_v8  ;;  %v9727_v8 = vld [vmem:[#allocation5 + $0xfac] ss:$12 sps:$4 sm:$0xff]  }
 0x80e   :  { %6503 = vmatprep.subr.bf16.mxu0 %v9650_v47  ;;  %8373 = vmatprep.subr.bf16.mxu1 %v9685_v14  ;;  %v9728_v14 = vld [vmem:[#allocation5 + $0xfb0] ss:$12 sps:$4 sm:$0xff]  }
 0x811   :  { %6504 = vmatpush1.bf16.msra.mxu0 %v9648_v46  ;;  %8374 = vmatpush3.bf16.msra.mxu1 %v9686_v16 }
 0x812   :  { %6505 = vmatprep.subr.bf16.mxu0 %v9653_v48  ;;  %8375 = vmatprep.subr.bf16.mxu1 %v9690_v20 }
 0x815   :  { %6506 = vmatpush1.bf16.msra.mxu0 %v9651_v50  ;;  %8376 = vmatpush3.bf16.msra.mxu1 %v9691_v22  ;;  %v9697_v50 = vld [vmem:[#allocation5 + $0xf00] ss:$12 sps:$4 sm:$0xff]   ;;  %v9732_v22 = vld [vmem:[#allocation5 + $0xfd8] ss:$12 sps:$4 sm:$0xff]  }
 0x816   :  { %6507 = vmatprep.subr.bf16.mxu0 %v9656_v53  ;;  %8377 = vmatprep.subr.bf16.mxu1 %v9695_v24  ;;  %v9735_v24 = vld [vmem:[#allocation5 + $0xff0] ss:$12 sps:$4 sm:$0xff]  }
 0x819   :  { %6508 = vmatpush1.bf16.msra.mxu0 %v9654_v57  ;;  %8378 = vmatpush3.bf16.msra.mxu1 %v9696_v26  ;;  %v9707_v57 = vld [vmem:[#allocation5 + $0xf34] ss:$12 sps:$4 sm:$0xff]  }
 0x81a   :  { %6509 = vmatprep.subr.bf16.mxu0 %v9659_v58  ;;  %8545 = vmatprep.subr.bf16.mxu1 %v9984_v29  ;;  %v9705_v58 = vld [vmem:[#allocation5 + $0xf30] ss:$12 sps:$4 sm:$0xff]   ;;  %v9738_v26 = vld [vmem:[#allocation5 + $0x1008] ss:$12 sps:$4 sm:$0xff]  }
 0x81d   :  { %6510 = vmatpush1.bf16.msra.mxu0 %v9657_v61  ;;  %v9709_v61 = vld [vmem:[#allocation5 + $0xf48] ss:$12 sps:$4 sm:$0xff]  }
 0x81e   :  { %6511 = vmatprep.subr.bf16.mxu0 %v9664_v62  ;;  %v9712_v62 = vld [vmem:[#allocation5 + $0xf50] ss:$12 sps:$4 sm:$0xff]  }
 0x821   :  { %6512 = vmatpush1.bf16.msra.mxu0 %v9662_v0  ;;  %v9713_v0 = vld [vmem:[#allocation5 + $0xf60] ss:$12 sps:$4 sm:$0xff]  }
 0x822   :  { %6513 = vmatprep.subr.bf16.mxu0 %v9669_v1  ;;  %v9716_v1 = vld [vmem:[#allocation5 + $0xf68] ss:$12 sps:$4 sm:$0xff]  }
 0x825   :  { %6514 = vmatpush1.bf16.msra.mxu0 %v9667_v2  ;;  %v9719_v2 = vld [vmem:[#allocation5 + $0xf7c] ss:$12 sps:$4 sm:$0xff]  }
 0x826   :  { %6515 = vmatprep.subr.bf16.mxu0 %v9674_v3  ;;  %v9717_v3 = vld [vmem:[#allocation5 + $0xf78] ss:$12 sps:$4 sm:$0xff]  }
 0x829   :  { %6516 = vmatpush1.bf16.msra.mxu0 %v9672_v4  ;;  %v9720_v4 = vld [vmem:[#allocation5 + $0xf80] ss:$12 sps:$4 sm:$0xff]  }
 0x82a   :  { %6517 = vmatprep.subr.bf16.mxu0 %v9679_v5  ;;  %v9723_v5 = vld [vmem:[#allocation5 + $0xf94] ss:$12 sps:$4 sm:$0xff]  }
 0x82d   :  { %6518 = vmatpush1.bf16.msra.mxu0 %v9677_v7  ;;  %v9724_v7 = vld [vmem:[#allocation5 + $0xf98] ss:$12 sps:$4 sm:$0xff]  }
 0x82e   :  { %6519 = vmatprep.subr.bf16.mxu0 %v9684_v13  ;;  %v9725_v13 = vld [vmem:[#allocation5 + $0xfa8] ss:$12 sps:$4 sm:$0xff]  }
 0x831   :  { %6520 = vmatpush1.bf16.msra.mxu0 %v9682_v15  ;;  %v9731_v15 = vld [vmem:[#allocation5 + $0xfc4] ss:$12 sps:$4 sm:$0xff]  }
 0x832   :  { %6521 = vmatprep.subr.bf16.mxu0 %v9689_v17  ;;  %v9729_v17 = vld [vmem:[#allocation5 + $0xfc0] ss:$12 sps:$4 sm:$0xff]  }
 0x835   :  { %6522 = vmatpush1.bf16.msra.mxu0 %v9687_v21  ;;  %v9734_v21 = vld [vmem:[#allocation5 + $0xfdc] ss:$12 sps:$4 sm:$0xff]  }
 0x836   :  { %6523 = vmatprep.subr.bf16.mxu0 %v9694_v23  ;;  %v9737_v23 = vld [vmem:[#allocation5 + $0xff4] ss:$12 sps:$4 sm:$0xff]  }
 0x839   :  { %6524 = vmatpush1.bf16.msra.mxu0 %v9692_v25  ;;  %v9740_v25 = vld [vmem:[#allocation5 + $0x100c] ss:$12 sps:$4 sm:$0xff]  }
 0x83a   :  { %6534 = vmatprep.subr.bf16.mxu0 %v9699_v27  ;;  %v9743_v27 = vld [vmem:[#allocation5 + $0x1024] ss:$12 sps:$4 sm:$0xff]  }
 0x8af   :  { %v8348_v9 = vpop.f32.mrb[36].mxu0 }
 0x8b0   :  { %v8349_v28 = vpop.f32.mrb[37].mxu0 }
 0x8b1   :  { %v8350_v30 = vadd.f32 %v8349_v28, %v8348_v9  ;;  %v8351_v31 = vpop.f32.mrb[38].mxu0  ;;  %v9741_v9 = vld [vmem:[#allocation5 + $0x1020] ss:$12 sps:$4 sm:$0xff]   ;;  %v9744_v28 = vld [vmem:[#allocation5 + $0x1038] ss:$12 sps:$4 sm:$0xff]  }
 0x8b2   :  { %v8352_v32 = vpop.f32.mrb[39].mxu0  ;;  %v9749_v31 = vld [vmem:[#allocation5 + $0x1054] ss:$12 sps:$4 sm:$0xff]  }
 0x8b3   :  { %v5943_v18 = vadd.f32 %v8350_v30, %v5438_v33  ;;  %v9746_v30 = vld [vmem:[#allocation5 + $0x103c] ss:$12 sps:$4 sm:$0xff]  }
 0x8b4   :  { %v9756_v32 = vld [vmem:[#allocation5 + $0x1088] ss:$12 sps:$4 sm:$0xff]  }
 0x8b5   :  { %v9757_v33 = vld [vmem:[#allocation5 + $0xfc8] ss:$12 sps:$4 sm:$0xff]  }
 0x8cf   :  { %v5901_v36 = vpop.f32.mrb[40].mxu1  ;;  %v5982_v37 = vpop.f32.mrb[40].mxu0 }
 0x8d0   :  { %v8602_v38 = vadd.f32 %v5901_v36, %v5430_v34  ;;  %v5983_v39 = vadd.f32 %v5982_v37, %v5943_v18  ;;  %v5903_v40 = vpop.f32.mrb[41].mxu1  ;;  %v8543_v41 = vpop.f32.mrb[41].mxu0  ;;  %v9752_v34 = vld [vmem:[#allocation5 + $0x106c] ss:$12 sps:$4 sm:$0xff]   ;;  %v9750_v37 = vld [vmem:[#allocation5 + $0x1068] ss:$12 sps:$4 sm:$0xff]  }
 0x8d1   :  { %v8603_v42 = vadd.f32 %v5903_v40, %v5434_v35  ;;  %v5905_v43 = vpop.f32.mrb[42].mxu1  ;;  %v5985_v44 = vpop.f32.mrb[42].mxu0  ;;  %v9761_v35 = vld [vmem:[#allocation5 + $0x10a0] ss:$12 sps:$4 sm:$0xff]   ;;  %v9766_v36 = vld [vmem:[#allocation5 + $0x10b8] ss:$12 sps:$4 sm:$0xff]  }
 0x8d2   :  { %v5906_v45 = vpop.f32.mrb[43].mxu1  ;;  %v8544_v46 = vpop.f32.mrb[43].mxu0  ;;  %9869 = vtanh.f32 %v8602_v38  ;;  %v9762_v18 = vld [vmem:[#allocation5 + $0xfe0] ss:$12 sps:$4 sm:$0xff]   ;;  %v9755_v38 = vld [vmem:[#allocation5 + $0x1084] ss:$12 sps:$4 sm:$0xff]  }
 0x8d3   :  { %9871 = vtanh.f32 %v8603_v42  ;;  %v9771_v40 = vld [vmem:[#allocation5 + $0x10d0] ss:$12 sps:$4 sm:$0xff]   ;;  %v9753_v41 = vld [vmem:[#allocation5 + $0x1080] ss:$12 sps:$4 sm:$0xff]   ;;  %v9758_v44 = vld [vmem:[#allocation5 + $0x1098] ss:$12 sps:$4 sm:$0xff]  }
 0x8d4   :  { %9873 = vtanh.f32 %v5983_v39  ;;  %v9767_v39 = vld [vmem:[#allocation5 + $0xff8] ss:$12 sps:$4 sm:$0xff]   ;;  %v9760_v42 = vld [vmem:[#allocation5 + $0x109c] ss:$12 sps:$4 sm:$0xff]   ;;  %v9765_v45 = vld [vmem:[#allocation5 + $0x10b4] ss:$12 sps:$4 sm:$0xff]  }
 0x8d5   :  { %v9772_v43 = vld [vmem:[#allocation5 + $0x1010] ss:$12 sps:$4 sm:$0xff]  }
 0x8d6   :  { %v9763_v46 = vld [vmem:[#allocation5 + $0x10b0] ss:$12 sps:$4 sm:$0xff]  }
 0x8dc   :  { %v9870_v47 = vpop.eup %9869 }
 0x8dd   :  { %v9872_v48 = vpop.eup %9871  ;;  %v5991_v53 = vpack.c.bf16 %v9870_v47, %v9870_v47  ;;  %v9770_v47 = vld [vmem:[#allocation5 + $0x10cc] ss:$12 sps:$4 sm:$0xff]  }
 0x8de   :  { %v5992_v49 = vpack.c.bf16 %v9872_v48, %v9872_v48  ;;  %v9874_v16 = vpop.eup %9873  ;;  %v9768_v48 = vld [vmem:[#allocation5 + $0x10c8] ss:$12 sps:$4 sm:$0xff]  }
 0x8df   :  { %v5993_v20 = vpack.c.bf16 %v9874_v16, %v9874_v16 }
 0x8e0   :  { %6525 = vmatprep.mubr.bf16.mxu0 %v5992_v49  ;;  %6607 = vmatprep.mubr.bf16.mxu1 %v5992_v49  ;;  %v9775_v49 = vld [vmem:[#allocation5 + $0x10e4] ss:$12 sps:$4 sm:$0xff]  }
 0x8e1   :  { %6526 = vmatmul.mubr.bf16.vlgmr.msra.gmra.mrb[44].mxu0 %v5991_v53  ;;  %6608 = vmatmul.mubr.bf16.vlgmr.msra.gmra.mrb[44].mxu1 %v5991_v53  ;;  %v9777_v53 = vld [vmem:[#allocation5 + $0x1028] ss:$12 sps:$4 sm:$0xff]  }
 0x8e2   :  { %6535 = vmatpush1.bf16.msra.mxu0 %v9697_v50  ;;  %8546 = vmatpush3.bf16.msra.mxu1 %v9700_v52  ;;  %v9776_v50 = vld [vmem:[#allocation5 + $0x10e8] ss:$12 sps:$4 sm:$0xff]   ;;  %v9773_v52 = vld [vmem:[#allocation5 + $0x10e0] ss:$12 sps:$4 sm:$0xff]  }
 0x8e3   :  { %6536 = vmatprep.subr.bf16.mxu0 %v9703_v54  ;;  %8547 = vmatprep.subr.bf16.mxu1 %v9984_v29  ;;  %v9780_v54 = vld [vmem:[#allocation5 + $0x10fc] ss:$12 sps:$4 sm:$0xff]  }
 0x8e4   :  { %6566 = vmatprep.mubr.bf16.mxu0 %v9985_v51  ;;  %8561 = vmatprep.mubr.msk.bf16.mxu1 %vm9986_vm0, %v9984_v29 }
 0x8e6   :  { %6537 = vmatpush1.bf16.msra.mxu0 %v9701_v55  ;;  %8548 = vmatpush3.bf16.msra.mxu1 %v9704_v56  ;;  %v9781_v55 = vld [vmem:[#allocation5 + $0x1100] ss:$12 sps:$4 sm:$0xff]   ;;  %v9778_v56 = vld [vmem:[#allocation5 + $0x10f8] ss:$12 sps:$4 sm:$0xff]  }
 0x8e7   :  { %6538 = vmatprep.subr.bf16.mxu0 %v9707_v57  ;;  %8549 = vmatprep.subr.bf16.mxu1 %v9984_v29  ;;  %v9782_v57 = vld [vmem:[#allocation5 + $0x1040] ss:$12 sps:$4 sm:$0xff]  }
 0x8ea   :  { %6539 = vmatpush1.bf16.msra.mxu0 %v9705_v58  ;;  %8550 = vmatpush3.bf16.msra.mxu1 %v9708_v59  ;;  %v9785_v58 = vld [vmem:[#allocation5 + $0x1114] ss:$12 sps:$4 sm:$0xff]   ;;  %v9786_v59 = vld [vmem:[#allocation5 + $0x1118] ss:$12 sps:$4 sm:$0xff]  }
 0x8eb   :  { %6540 = vmatprep.subr.bf16.mxu0 %v9711_v60  ;;  %8551 = vmatprep.subr.bf16.mxu1 %v9984_v29  ;;  %v9783_v60 = vld [vmem:[#allocation5 + $0x1110] ss:$12 sps:$4 sm:$0xff]  }
 0x8ee   :  { %6541 = vmatpush1.bf16.msra.mxu0 %v9709_v61  ;;  %8552 = vmatpush3.bf16.msra.mxu1 %v9712_v62  ;;  %v9787_v61 = vld [vmem:[#allocation5 + $0x1058] ss:$12 sps:$4 sm:$0xff]  }
 0x8ef   :  { %6542 = vmatprep.subr.bf16.mxu0 %v9715_v63  ;;  %8553 = vmatprep.subr.bf16.mxu1 %v9984_v29  ;;  %v9790_v62 = vld [vmem:[#allocation5 + $0x112c] ss:$12 sps:$4 sm:$0xff]   ;;  %v9791_v63 = vld [vmem:[#allocation5 + $0x1130] ss:$12 sps:$4 sm:$0xff]  }
 0x8f2   :  { %6543 = vmatpush1.bf16.msra.mxu0 %v9713_v0  ;;  %8554 = vmatpush3.bf16.msra.mxu1 %v9716_v1  ;;  %v9788_v0 = vld [vmem:[#allocation5 + $0x1128] ss:$12 sps:$4 sm:$0xff]   ;;  %v9792_v1 = vld [vmem:[#allocation5 + $0x1070] ss:$12 sps:$4 sm:$0xff]  }
 0x8f3   :  { %6544 = vmatprep.subr.bf16.mxu0 %v9719_v2  ;;  %8555 = vmatprep.subr.bf16.mxu1 %v9984_v29  ;;  %v9795_v2 = vld [vmem:[#allocation5 + $0x1144] ss:$12 sps:$4 sm:$0xff]  }
 0x8f6   :  { %6545 = vmatpush1.bf16.msra.mxu0 %v9717_v3  ;;  %8556 = vmatpush3.bf16.msra.mxu1 %v9720_v4 }
 0x8f7   :  { %6546 = vmatprep.subr.bf16.mxu0 %v9723_v5  ;;  %8557 = vmatprep.subr.bf16.mxu1 %v9984_v29 }
 0x8fa   :  { %6547 = vmatpush1.bf16.msra.mxu0 %v9721_v6  ;;  %8558 = vmatpush3.bf16.msra.mxu1 %v9724_v7 }
 0x8fb   :  { %6548 = vmatprep.subr.bf16.mxu0 %v9727_v8  ;;  %8559 = vmatprep.subr.bf16.mxu1 %v9984_v29  ;;  %v6092_v8 = vld [vmem:[#allocation7 + $0x20] ss:$8 sm:$0x7] }
 0x8fe   :  { %6549 = vmatpush1.bf16.msra.mxu0 %v9725_v13  ;;  %8560 = vmatpush3.bf16.msra.mxu1 %v9728_v14  ;;  %v6105_v13 = vrot.slane %v6092_v8, %v10080_v19  ;;  %v6097_v14 = vrot.slane %v6092_v8, %v10064_v10 }
 0x8ff   :  { %7160 = vmatprep.subr.bf16.mxu1 %v9731_v15  ;;  %8394 = vmatprep.subr.bf16.mxu0 %v9756_v32  ;;  %v6101_v15 = vrot.slane %v6092_v8, %v10069_v12 }
 0x901   :  { %6567 = vmatmul.mubr.bf16.vlgmr.msra.gmra.mrb[44].mxu0 %v5993_v20  ;;  %8562 = vmatmul.mubr.bf16.vlgmr.msra.gmra.mrb[48].mxu1 %v5993_v20 }
 0x902   :  { %7161 = vmatpush1.bf16.msra.mxu1 %v9729_v17  ;;  %8395 = vmatpush3.bf16.msra.mxu0 %v9757_v33  ;;  %v9796_v33 = vld [vmem:[#allocation5 + $0x1148] ss:$12 sps:$4 sm:$0xff]  }
 0x903   :  { %7162 = vmatprep.subr.bf16.mxu1 %v9734_v21  ;;  %8396 = vmatprep.subr.bf16.mxu0 %v9761_v35  ;;  %v9799_v35 = vld [vmem:[#allocation5 + $0x115c] ss:$12 sps:$4 sm:$0xff]  }
 0x906   :  { %7163 = vmatpush1.bf16.msra.mxu1 %v9732_v22  ;;  %8397 = vmatpush3.bf16.msra.mxu0 %v9762_v18  ;;  %v9797_v18 = vld [vmem:[#allocation5 + $0x1158] ss:$12 sps:$4 sm:$0xff]  }
 0x907   :  { %7164 = vmatprep.subr.bf16.mxu1 %v9737_v23  ;;  %8398 = vmatprep.subr.bf16.mxu0 %v9766_v36  ;;  %v9800_v36 = vld [vmem:[#allocation5 + $0x1160] ss:$12 sps:$4 sm:$0xff]  }
 0x90a   :  { %7165 = vmatpush1.bf16.msra.mxu1 %v9735_v24  ;;  %8399 = vmatpush3.bf16.msra.mxu0 %v9767_v39  ;;  %v9804_v39 = vld [vmem:[#allocation5 + $0x1178] ss:$12 sps:$4 sm:$0xff]  }
 0x90b   :  { %7166 = vmatprep.subr.bf16.mxu1 %v9740_v25  ;;  %8400 = vmatprep.subr.bf16.mxu0 %v9771_v40  ;;  %v9807_v40 = vld [vmem:[#allocation5 + $0x118c] ss:$12 sps:$4 sm:$0xff]  }
 0x90e   :  { %7167 = vmatpush1.bf16.msra.mxu1 %v9738_v26  ;;  %8401 = vmatpush3.bf16.msra.mxu0 %v9772_v43  ;;  %v9811_v43 = vld [vmem:[#allocation5 + $0x11a4] ss:$12 sps:$4 sm:$0xff]  }
 0x90f   :  { %7168 = vmatprep.subr.bf16.mxu1 %v9743_v27  ;;  %8402 = vmatprep.subr.bf16.mxu0 %v9776_v50  ;;  %v9820_v50 = vld [vmem:[#allocation5 + $0x11d8] ss:$12 sps:$4 sm:$0xff]  }
 0x912   :  { %7169 = vmatpush1.bf16.msra.mxu1 %v9741_v9  ;;  %8403 = vmatpush3.bf16.msra.mxu0 %v9777_v53  ;;  %v9821_v53 = vld [vmem:[#allocation5 + $0x11e8] ss:$12 sps:$4 sm:$0xff]  }
 0x913   :  { %7170 = vmatprep.subr.bf16.mxu1 %v9746_v30  ;;  %8404 = vmatprep.subr.bf16.mxu0 %v9781_v55 }
 0x916   :  { %7171 = vmatpush1.bf16.msra.mxu1 %v9744_v28  ;;  %8405 = vmatpush3.bf16.msra.mxu0 %v9782_v57 }
 0x917   :  { %7172 = vmatprep.subr.bf16.mxu1 %v9749_v31  ;;  %8406 = vmatprep.subr.bf16.mxu0 %v9786_v59 }
 0x91a   :  { %7173 = vmatpush1.bf16.msra.mxu1 %v9747_v11  ;;  %8407 = vmatpush3.bf16.msra.mxu0 %v9787_v61  ;;  %v9793_v11 = vld [vmem:[#allocation5 + $0x1140] ss:$12 sps:$4 sm:$0xff]  }
 0x91b   :  { %7174 = vmatprep.subr.bf16.mxu1 %v9752_v34  ;;  %8408 = vmatprep.subr.bf16.mxu0 %v9791_v63 }
 0x91e   :  { %7175 = vmatpush1.bf16.msra.mxu1 %v9750_v37  ;;  %8409 = vmatpush3.bf16.msra.mxu0 %v9792_v1  ;;  %v9803_v37 = vld [vmem:[#allocation5 + $0x1174] ss:$12 sps:$4 sm:$0xff]  }
 0x91f   :  { %7176 = vmatprep.subr.bf16.mxu1 %v9755_v38  ;;  %8565 = vmatprep.subr.bf16.mxu0 %v9984_v29  ;;  %v9801_v38 = vld [vmem:[#allocation5 + $0x1170] ss:$12 sps:$4 sm:$0xff]  }
 0x922   :  { %7177 = vmatpush1.bf16.msra.mxu1 %v9753_v41  ;;  %v9805_v41 = vld [vmem:[#allocation5 + $0x1188] ss:$12 sps:$4 sm:$0xff]  }
 0x923   :  { %7178 = vmatprep.subr.bf16.mxu1 %v9760_v42  ;;  %v9808_v42 = vld [vmem:[#allocation5 + $0x1190] ss:$12 sps:$4 sm:$0xff]  }
 0x926   :  { %7179 = vmatpush1.bf16.msra.mxu1 %v9758_v44  ;;  %v9812_v44 = vld [vmem:[#allocation5 + $0x11a8] ss:$12 sps:$4 sm:$0xff]  }
 0x927   :  { %7180 = vmatprep.subr.bf16.mxu1 %v9765_v45  ;;  %v9815_v45 = vld [vmem:[#allocation5 + $0x11bc] ss:$12 sps:$4 sm:$0xff]  }
 0x92a   :  { %7181 = vmatpush1.bf16.msra.mxu1 %v9763_v46  ;;  %v9813_v46 = vld [vmem:[#allocation5 + $0x11b8] ss:$12 sps:$4 sm:$0xff]  }
 0x92b   :  { %7182 = vmatprep.subr.bf16.mxu1 %v9770_v47  ;;  %v9816_v47 = vld [vmem:[#allocation5 + $0x11c0] ss:$12 sps:$4 sm:$0xff]  }
 0x92e   :  { %7183 = vmatpush1.bf16.msra.mxu1 %v9768_v48  ;;  %v9819_v48 = vld [vmem:[#allocation5 + $0x11d4] ss:$12 sps:$4 sm:$0xff]  }
 0x92f   :  { %7184 = vmatprep.subr.bf16.mxu1 %v9775_v49  ;;  %v9817_v49 = vld [vmem:[#allocation5 + $0x11d0] ss:$12 sps:$4 sm:$0xff]  }
 0x932   :  { %7185 = vmatpush1.bf16.msra.mxu1 %v9773_v52  ;;  %v9823_v52 = vld [vmem:[#allocation5 + $0x11ec] ss:$12 sps:$4 sm:$0xff]  }
 0x933   :  { %7186 = vmatprep.subr.bf16.mxu1 %v9780_v54  ;;  %v9824_v54 = vld [vmem:[#allocation5 + $0x11f0] ss:$12 sps:$4 sm:$0xff]  }
 0x936   :  { %7187 = vmatpush1.bf16.msra.mxu1 %v9778_v56 }
 0x937   :  { %7188 = vmatprep.subr.bf16.mxu1 %v9785_v58 }
 0x93a   :  { %7189 = vmatpush1.bf16.msra.mxu1 %v9783_v60 }
 0x93b   :  { %7190 = vmatprep.subr.bf16.mxu1 %v9790_v62  ;;  %v6759_v62 = vld [vmem:[#allocation7 + $0x21] ss:$8 sm:$0x7] }
 0x93c   :  { %v6772_v63 = vrot.slane %v6759_v62, %v10080_v19  ;;  %v6768_v1 = vrot.slane %v6759_v62, %v10069_v12 }
 0x93e   :  { %7191 = vmatpush1.bf16.msra.mxu1 %v9788_v0  ;;  %v6764_v0 = vrot.slane %v6759_v62, %v10064_v10 }
 0x93f   :  { %7201 = vmatprep.subr.bf16.mxu1 %v9795_v2 }
 0x9b4   :  { %v8379_v3 = vpop.f32.mrb[44].mxu1 }
 0x9b5   :  { %v8380_v4 = vpop.f32.mrb[45].mxu1 }
 0x9b6   :  { %v8381_v5 = vadd.f32 %v8380_v4, %v8379_v3  ;;  %v8382_v6 = vpop.f32.mrb[46].mxu1 }
 0x9b7   :  { %v8383_v7 = vpop.f32.mrb[47].mxu1 }
 0x9b8   :  { %v6610_v16 = vadd.f32 %v8381_v5, %v6105_v13 }
 0x9d4   :  { %v6568_v17 = vpop.f32.mrb[44].mxu0  ;;  %v6649_v20 = vpop.f32.mrb[48].mxu1 }
 0x9d5   :  { %v8604_v21 = vadd.f32 %v6568_v17, %v6097_v14  ;;  %v6650_v22 = vadd.f32 %v6649_v20, %v6610_v16  ;;  %v6570_v23 = vpop.f32.mrb[45].mxu0  ;;  %v8563_v24 = vpop.f32.mrb[49].mxu1 }
 0x9d6   :  { %v8605_v25 = vadd.f32 %v6570_v23, %v6101_v15  ;;  %v6572_v26 = vpop.f32.mrb[46].mxu0  ;;  %v6652_v27 = vpop.f32.mrb[50].mxu1 }
 0x9d7   :  { %v6573_v9 = vpop.f32.mrb[47].mxu0  ;;  %v8564_v28 = vpop.f32.mrb[51].mxu1  ;;  %9875 = vtanh.f32 %v8604_v21 }
 0x9d8   :  { %9877 = vtanh.f32 %v8605_v25 }
 0x9d9   :  { %9879 = vtanh.f32 %v6650_v22 }
 0x9e1   :  { %v9876_v30 = vpop.eup %9875 }
 0x9e2   :  { %v9878_v31 = vpop.eup %9877  ;;  %v6658_v34 = vpack.c.bf16 %v9876_v30, %v9876_v30 }
 0x9e3   :  { %v6659_v32 = vpack.c.bf16 %v9878_v31, %v9878_v31  ;;  %v9880_v55 = vpop.eup %9879 }
 0x9e4   :  { %v6660_v56 = vpack.c.bf16 %v9880_v55, %v9880_v55 }
 0x9e5   :  { %7192 = vmatprep.mubr.bf16.mxu1 %v6659_v32  ;;  %7274 = vmatprep.mubr.bf16.mxu0 %v6659_v32 }
 0x9e6   :  { %7193 = vmatmul.mubr.bf16.vlgmr.msra.gmra.mrb[52].mxu1 %v6658_v34  ;;  %7275 = vmatmul.mubr.bf16.vlgmr.msra.gmra.mrb[48].mxu0 %v6658_v34 }
 0x9e7   :  { %7202 = vmatpush1.bf16.msra.mxu1 %v9793_v11  ;;  %8566 = vmatpush3.bf16.msra.mxu0 %v9796_v33 }
 0x9e8   :  { %7203 = vmatprep.subr.bf16.mxu1 %v9799_v35  ;;  %8567 = vmatprep.subr.bf16.mxu0 %v9984_v29 }
 0x9e9   :  { %7233 = vmatprep.mubr.bf16.mxu1 %v9985_v51  ;;  %8581 = vmatprep.mubr.msk.bf16.mxu0 %vm9986_vm0, %v9984_v29  ;;  %v9809_v51 = vld [vmem:[#allocation5 + $0x11a0] ss:$12 sps:$4 sm:$0xff]  }
 0x9eb   :  { %7204 = vmatpush1.bf16.msra.mxu1 %v9797_v18  ;;  %8568 = vmatpush3.bf16.msra.mxu0 %v9800_v36 }
 0x9ec   :  { %7205 = vmatprep.subr.bf16.mxu1 %v9803_v37  ;;  %8569 = vmatprep.subr.bf16.mxu0 %v9984_v29 }
 0x9ef   :  { %7206 = vmatpush1.bf16.msra.mxu1 %v9801_v38  ;;  %8570 = vmatpush3.bf16.msra.mxu0 %v9804_v39 }
 0x9f0   :  { %7207 = vmatprep.subr.bf16.mxu1 %v9807_v40  ;;  %8571 = vmatprep.subr.bf16.mxu0 %v9984_v29 }
 0x9f3   :  { %7208 = vmatpush1.bf16.msra.mxu1 %v9805_v41  ;;  %8572 = vmatpush3.bf16.msra.mxu0 %v9808_v42 }
 0x9f4   :  { %7209 = vmatprep.subr.bf16.mxu1 %v9811_v43  ;;  %8573 = vmatprep.subr.bf16.mxu0 %v9984_v29 }
 0x9f7   :  { %7210 = vmatpush1.bf16.msra.mxu1 %v9809_v51  ;;  %8574 = vmatpush3.bf16.msra.mxu0 %v9812_v44 }
 0x9f8   :  { %7211 = vmatprep.subr.bf16.mxu1 %v9815_v45  ;;  %8575 = vmatprep.subr.bf16.mxu0 %v9984_v29 }
 0x9fb   :  { %7212 = vmatpush1.bf16.msra.mxu1 %v9813_v46  ;;  %8576 = vmatpush3.bf16.msra.mxu0 %v9816_v47 }
 0x9fc   :  { %7213 = vmatprep.subr.bf16.mxu1 %v9819_v48  ;;  %8577 = vmatprep.subr.bf16.mxu0 %v9984_v29 }
 0x9ff   :  { %7214 = vmatpush1.bf16.msra.mxu1 %v9817_v49  ;;  %8578 = vmatpush3.bf16.msra.mxu0 %v9820_v50 }
 0xa00   :  { %7215 = vmatprep.subr.bf16.mxu1 %v9823_v52  ;;  %8579 = vmatprep.subr.bf16.mxu0 %v9984_v29 }
 0xa03   :  { %7216 = vmatpush1.bf16.msra.mxu1 %v9821_v53  ;;  %8580 = vmatpush3.bf16.msra.mxu0 %v9824_v54 }
 0xa06   :  { %7234 = vmatmul.mubr.bf16.vlgmr.msra.gmra.mrb[52].mxu1 %v6660_v56  ;;  %8582 = vmatmul.mubr.bf16.vlgmr.msra.gmra.mrb[52].mxu0 %v6660_v56 }
 0xab9   :  { %v8410_v57 = vpop.f32.mrb[48].mxu0 }
 0xaba   :  { %v8411_v58 = vpop.f32.mrb[49].mxu0 }
 0xabb   :  { %v8412_v59 = vadd.f32 %v8411_v58, %v8410_v57  ;;  %v8413_v60 = vpop.f32.mrb[50].mxu0 }
 0xabc   :  { %v8414_v61 = vpop.f32.mrb[51].mxu0 }
 0xabd   :  { %v7277_v2 = vadd.f32 %v8412_v59, %v6772_v63 }
 0xad9   :  { %v7235_v29 = vpop.f32.mrb[52].mxu1  ;;  %v7316_v3 = vpop.f32.mrb[52].mxu0 }
 0xada   :  { %v8606_v4 = vadd.f32 %v7235_v29, %v6764_v0  ;;  %v7317_v5 = vadd.f32 %v7316_v3, %v7277_v2  ;;  %v7237_v6 = vpop.f32.mrb[53].mxu1  ;;  %v8583_v7 = vpop.f32.mrb[53].mxu0 }
 0xadb   :  { %v8607_v8 = vadd.f32 %v7237_v6, %v6768_v1  ;;  %v7239_v13 = vpop.f32.mrb[54].mxu1  ;;  %v7319_v14 = vpop.f32.mrb[54].mxu0 }
 0xadc   :  { %7322 = vst [vmem:[#allocation8] sm:$0xff] %v8606_v4  ;;  %7324 = vst [vmem:[#allocation8 + $0x10] sm:$0xff] %v7317_v5  ;;  %v7240_v19 = vpop.f32.mrb[55].mxu1  ;;  %v8584_v15 = vpop.f32.mrb[55].mxu0 }
 0xadd   :  { %7323 = vst [vmem:[#allocation8 + $0x8] sm:$0xff] %v8607_v8 }
 0xade   :  { %9958 = shalt.err (!%p9955_p0)
}
 0xadf   :  { %s9959_s10 = scalar_lea.hbm %s10216_s4, 384 }
 0xae0   :  { %p9960_p1 = scmp.ne.s32.totalorder %s10216_s4, %s9959_s10  ;;  %p9963_p2 = scmp.lt.u32.totalorder %s9959_s10, %s10216_s4 }
 0xae2   :  { %p9965_p3 = pnand %p9963_p2, %p9960_p1 }
 0xae4   :  { %9968 = shalt.err (!%p9965_p3)
}
 0xae5   :  { %7334 = dma.vmem_to_hbm [thread:$0]  %s7332_s6, 384, %s10216_s4, [#allocation4]  }
 0xae6   :  { %9973 = dma.done.wait [#allocation4], 384  }
 0xae7   :  { %9974 = vsyncadd [#allocation4], 4294966912 }
 0xae8   :  { %7338 = vsyncpa [#allocation3], 1 }
 0xae9   :  { %7339 = vsyncpa [#allocation6], 1 }
 0xaea   :  { %7340 = vsyncpa [#allocation4], 1 }

</bundles_post_ra>
